<compile_context>
chip_gen: v6e
topology: v6e:2x2x1
jax: 0.10.0
libtpu: 0.0.40
codegen_flags: <defaults>
</compile_context>

<pallas_src>
import math

import jax
import jax.numpy as jnp
from jax.experimental import pallas as pl
from jax.experimental.pallas import tpu as pltpu

Z_DIM = 10
C_DIM = 2                    # per-view private dim (all three views identical)
I_SHAPE = 50                 # per-view input dim (all three views identical)
MID = 512                    # hardcoded in the module
NUM_VIEW = 3
BATCH = 8

K_PAD = 128                  # padded input-feature (contraction) dim: 50 -> 128
SP_PAD = 128                 # padded shared+private dim: 12 -> 128
OUT_PAD = 128                # padded reconstruction dim: 50 -> 128


def _dae_kernel(x_ref,
                w1, b1, w2, b2, w3, b3, wsp, bsp,
                wd1, bd1, wd2, bd2, wd3, bd3, wd4, bd4,
                sp_ref, recon_ref):
    """Encoder + decoder MLP chain for one view (grid axis = view)."""
    f32 = jnp.float32
    bf16 = jnp.bfloat16
    x = x_ref[0]                                              # (B, K_PAD) bf16

    # ---------------- encoder ----------------
    # tmp = sec(relu(one(x))); tmp = thr(relu(tmp)); [S|P] head fused
    h = jnp.dot(x, w1[0], preferred_element_type=f32) + b1[0]
    h = jnp.maximum(h, 0.0)
    h = jnp.dot(h.astype(bf16), w2[0], preferred_element_type=f32) + b2[0]
    h = jnp.maximum(h, 0.0)
    t = jnp.dot(h.astype(bf16), w3[0], preferred_element_type=f32) + b3[0]
    sp = jnp.dot(t.astype(bf16), wsp[0], preferred_element_type=f32) + bsp[0]
    sp_ref[0] = sp                                            # dense [B, 128] store

    # ---------------- decoder ----------------
    # de1(cat(s, p)) -> relu -> de2 -> relu -> de3 -> relu -> de4
    # (sp's padded lanes are zero; wd1's padded rows are zero, so this equals
    #  the unpadded cat(s, p) @ Wd1.)
    y = jnp.dot(sp.astype(bf16), wd1[0], preferred_element_type=f32) + bd1[0]
    y = jnp.maximum(y, 0.0)
    y = jnp.dot(y.astype(bf16), wd2[0], preferred_element_type=f32) + bd2[0]
    y = jnp.maximum(y, 0.0)
    y = jnp.dot(y.astype(bf16), wd3[0], preferred_element_type=f32) + bd3[0]
    y = jnp.maximum(y, 0.0)
    recon_ref[0] = jnp.dot(y.astype(bf16), wd4[0],
                           preferred_element_type=f32) + bd4[0]


_PARAM_ORDER = ("w1", "b1", "w2", "b2", "w3", "b3", "wsp", "bsp",
                "wd1", "bd1", "wd2", "bd2", "wd3", "bd3", "wd4", "bd4")


@jax.jit
def dae_forward(x_stacked, params):
    """Mirrors DAE.forward. x_stacked: [NUM_VIEW, B, I_SHAPE] f32.
    Returns (shared list, private list, recons list)."""
    nv, b, i_sh = x_stacked.shape

    # Pad input features to lane width and cast to bf16 (padded lanes are zero,
    # and w1's padded rows are zero, so the first matmul is unchanged).
    x_pad = jnp.zeros((nv, b, K_PAD), jnp.bfloat16)
    x_pad = x_pad.at[:, :, :i_sh].set(x_stacked.astype(jnp.bfloat16))

    args = (x_pad,) + tuple(params[k] for k in _PARAM_ORDER)

    def vspec(a):
        return pl.BlockSpec((1,) + a.shape[1:], lambda v: (v, 0, 0))

    in_specs = [vspec(a) for a in args]
    out_shape = (jax.ShapeDtypeStruct((nv, b, SP_PAD), jnp.float32),
                 jax.ShapeDtypeStruct((nv, b, OUT_PAD), jnp.float32))
    out_specs = (pl.BlockSpec((1, b, SP_PAD), lambda v: (v, 0, 0)),
                 pl.BlockSpec((1, b, OUT_PAD), lambda v: (v, 0, 0)))

    flops = 2 * b * nv * (K_PAD * MID + 2 * MID * MID + MID * SP_PAD
                          + SP_PAD * MID + 2 * MID * MID + MID * OUT_PAD)
    bytes_accessed = (sum(int(a.size) * a.dtype.itemsize for a in args)
                      + sum(math.prod(s.shape) * 4 for s in out_shape))

    sp_out, recon_out = pl.pallas_call(
        _dae_kernel,
        out_shape=out_shape,
        grid=(nv,),
        in_specs=in_specs,
        out_specs=out_specs,
        compiler_params=pltpu.CompilerParams(
            dimension_semantics=("parallel",)),
        cost_estimate=pl.CostEstimate(flops=flops, transcendentals=0,
                                      bytes_accessed=bytes_accessed),
    )(*args)

    shared = [sp_out[v, :, :Z_DIM] for v in range(nv)]
    private = [sp_out[v, :, Z_DIM:Z_DIM + C_DIM] for v in range(nv)]
    recons = [recon_out[v, :, :i_sh] for v in range(nv)]
    return shared, private, recons


# ---------------- deterministic parameter construction ----------------
def _init_linear(key, fan_in, fan_out):
    """nn.Linear-style uniform(-1/sqrt(fan_in), 1/sqrt(fan_in)) init, stored as
    [in, out] so forward is x @ W + b (equivalent to PyTorch's x @ W.T + b)."""
    kw, kb = jax.random.split(key)
    lim = 1.0 / jnp.sqrt(jnp.float32(fan_in))
    w = jax.random.uniform(kw, (fan_in, fan_out), jnp.float32, -lim, lim)
    b = jax.random.uniform(kb, (1, fan_out), jnp.float32, -lim, lim)
    return w, b


def make_params(key):
    """Per-view f32 reference parameters (unpadded, unfused)."""
    views = []
    for v in range(NUM_VIEW):
        keys = jax.random.split(jax.random.fold_in(key, v), 9)
        p = {}
        p["w1"], p["b1"] = _init_linear(keys[0], I_SHAPE, MID)
        p["w2"], p["b2"] = _init_linear(keys[1], MID, MID)
        p["w3"], p["b3"] = _init_linear(keys[2], MID, MID)
        p["ws"], p["bs"] = _init_linear(keys[3], MID, Z_DIM)
        p["wp"], p["bp"] = _init_linear(keys[4], MID, C_DIM)
        p["wd1"], p["bd1"] = _init_linear(keys[5], Z_DIM + C_DIM, MID)
        p["wd2"], p["bd2"] = _init_linear(keys[6], MID, MID)
        p["wd3"], p["bd3"] = _init_linear(keys[7], MID, MID)
        p["wd4"], p["bd4"] = _init_linear(keys[8], MID, I_SHAPE)
        views.append(p)
    return views


def pack_params(views):
    """Pad to lane-aligned shapes, fuse S|P heads, stack across views, cast to bf16."""
    bf16, f32 = jnp.bfloat16, jnp.float32

    def pad_to(a, rows, cols):
        out = jnp.zeros((rows, cols), a.dtype)
        return out.at[:a.shape[0], :a.shape[1]].set(a)

    stk = {}
    stk["w1"] = jnp.stack([pad_to(p["w1"], K_PAD, MID) for p in views]).astype(bf16)
    stk["b1"] = jnp.stack([p["b1"] for p in views]).astype(f32)
    stk["w2"] = jnp.stack([p["w2"] for p in views]).astype(bf16)
    stk["b2"] = jnp.stack([p["b2"] for p in views]).astype(f32)
    stk["w3"] = jnp.stack([p["w3"] for p in views]).astype(bf16)
    stk["b3"] = jnp.stack([p["b3"] for p in views]).astype(f32)
    stk["wsp"] = jnp.stack(
        [pad_to(jnp.concatenate([p["ws"], p["wp"]], axis=1), MID, SP_PAD)
         for p in views]).astype(bf16)
    stk["bsp"] = jnp.stack(
        [pad_to(jnp.concatenate([p["bs"], p["bp"]], axis=1), 1, SP_PAD)
         for p in views]).astype(f32)
    stk["wd1"] = jnp.stack([pad_to(p["wd1"], SP_PAD, MID) for p in views]).astype(bf16)
    stk["bd1"] = jnp.stack([p["bd1"] for p in views]).astype(f32)
    stk["wd2"] = jnp.stack([p["wd2"] for p in views]).astype(bf16)
    stk["bd2"] = jnp.stack([p["bd2"] for p in views]).astype(f32)
    stk["wd3"] = jnp.stack([p["wd3"] for p in views]).astype(bf16)
    stk["bd3"] = jnp.stack([p["bd3"] for p in views]).astype(f32)
    stk["wd4"] = jnp.stack([pad_to(p["wd4"], MID, OUT_PAD) for p in views]).astype(bf16)
    stk["bd4"] = jnp.stack([pad_to(p["bd4"], 1, OUT_PAD) for p in views]).astype(f32)
    return stk


def dae_reference(xs, views):
    """Pure-JAX f32 reference matching DAE.forward (dropout p=0 == identity)."""
    shared, private, recons = [], [], []
    for v in range(NUM_VIEW):
        p, x = views[v], xs[v]
        h = jnp.maximum(x @ p["w1"] + p["b1"], 0.0)
        h = jnp.maximum(h @ p["w2"] + p["b2"], 0.0)
        t = h @ p["w3"] + p["b3"]
        s = t @ p["ws"] + p["bs"]
        pr = t @ p["wp"] + p["bp"]
        y = jnp.maximum(jnp.concatenate([s, pr], axis=1) @ p["wd1"] + p["bd1"], 0.0)
        y = jnp.maximum(y @ p["wd2"] + p["bd2"], 0.0)
        y = jnp.maximum(y @ p["wd3"] + p["bd3"], 0.0)
        r = y @ p["wd4"] + p["bd4"]
        shared.append(s)
        private.append(pr)
        recons.append(r)
    return shared, private, recons


if __name__ == "__main__":
    key = jax.random.PRNGKey(0)
    k_params, k_x = jax.random.split(key)

    views = make_params(k_params)
    params = pack_params(views)
    x_stacked = jax.random.normal(k_x, (NUM_VIEW, BATCH, I_SHAPE), jnp.float32)

    shared, private, recons = dae_forward(x_stacked, params)
    jax.block_until_ready((shared, private, recons))

    # shape sanity (matches PyTorch forward semantics)
    assert all(s.shape == (BATCH, Z_DIM) for s in shared)
    assert all(p.shape == (BATCH, C_DIM) for p in private)
    assert all(r.shape == (BATCH, I_SHAPE) for r in recons)

    # loose numeric check vs f32 reference (weights run in bf16 on the MXU)
    xs = [x_stacked[v] for v in range(NUM_VIEW)]
    ref_s, ref_p, ref_r = dae_reference(xs, views)

    def rel_err(a, b):
        return float(jnp.linalg.norm(a - b) / (jnp.linalg.norm(b) + 1e-6))

    for a, b in zip(shared + private + recons, ref_s + ref_p + ref_r):
        assert bool(jnp.all(jnp.isfinite(a)))
        assert rel_err(a, b) < 0.1, rel_err(a, b)

    print("KERNEL_OK")
</pallas_src>

<mosaic_0001>
module attributes {stable_mosaic.version = 11 : i64} {
  func.func @_dae_kernel(%arg0: i32, %arg1: memref<1x8x128xbf16, #tpu.memory_space<vmem>>, %arg2: memref<1x128x512xbf16, #tpu.memory_space<vmem>>, %arg3: memref<1x1x512xf32, #tpu.memory_space<vmem>>, %arg4: memref<1x512x512xbf16, #tpu.memory_space<vmem>>, %arg5: memref<1x1x512xf32, #tpu.memory_space<vmem>>, %arg6: memref<1x512x512xbf16, #tpu.memory_space<vmem>>, %arg7: memref<1x1x512xf32, #tpu.memory_space<vmem>>, %arg8: memref<1x512x128xbf16, #tpu.memory_space<vmem>>, %arg9: memref<1x1x128xf32, #tpu.memory_space<vmem>>, %arg10: memref<1x128x512xbf16, #tpu.memory_space<vmem>>, %arg11: memref<1x1x512xf32, #tpu.memory_space<vmem>>, %arg12: memref<1x512x512xbf16, #tpu.memory_space<vmem>>, %arg13: memref<1x1x512xf32, #tpu.memory_space<vmem>>, %arg14: memref<1x512x512xbf16, #tpu.memory_space<vmem>>, %arg15: memref<1x1x512xf32, #tpu.memory_space<vmem>>, %arg16: memref<1x512x128xbf16, #tpu.memory_space<vmem>>, %arg17: memref<1x1x128xf32, #tpu.memory_space<vmem>>, %arg18: memref<1x8x128xf32, #tpu.memory_space<vmem>>, %arg19: memref<1x8x128xf32, #tpu.memory_space<vmem>>) attributes {dimension_semantics = [#tpu.dimension_semantics<parallel>], iteration_bounds = array<i64: 3>, scalar_prefetch = 0 : i64, scratch_operands = 0 : i64, tpu.core_type = #tpu.core_type<tc>, window_params = [{transform_indices = @transform_0, window_bounds = array<i64: 1, 8, 128>}, {transform_indices = @transform_1, window_bounds = array<i64: 1, 128, 512>}, {transform_indices = @transform_2, window_bounds = array<i64: 1, 1, 512>}, {transform_indices = @transform_3, window_bounds = array<i64: 1, 512, 512>}, {transform_indices = @transform_4, window_bounds = array<i64: 1, 1, 512>}, {transform_indices = @transform_5, window_bounds = array<i64: 1, 512, 512>}, {transform_indices = @transform_6, window_bounds = array<i64: 1, 1, 512>}, {transform_indices = @transform_7, window_bounds = array<i64: 1, 512, 128>}, {transform_indices = @transform_8, window_bounds = array<i64: 1, 1, 128>}, {transform_indices = @transform_9, window_bounds = array<i64: 1, 128, 512>}, {transform_indices = @transform_10, window_bounds = array<i64: 1, 1, 512>}, {transform_indices = @transform_11, window_bounds = array<i64: 1, 512, 512>}, {transform_indices = @transform_12, window_bounds = array<i64: 1, 1, 512>}, {transform_indices = @transform_13, window_bounds = array<i64: 1, 512, 512>}, {transform_indices = @transform_14, window_bounds = array<i64: 1, 1, 512>}, {transform_indices = @transform_15, window_bounds = array<i64: 1, 512, 128>}, {transform_indices = @transform_16, window_bounds = array<i64: 1, 1, 128>}, {transform_indices = @transform_17, window_bounds = array<i64: 1, 8, 128>}, {transform_indices = @transform_18, window_bounds = array<i64: 1, 8, 128>}]} {
    %c0 = arith.constant 0 : index
    %c0_0 = arith.constant 0 : index
    %c0_1 = arith.constant 0 : index
    %0 = vector.load %arg1[%c0, %c0_0, %c0_1] : memref<1x8x128xbf16, #tpu.memory_space<vmem>>, vector<1x8x128xbf16>
    %1 = vector.shape_cast %0 : vector<1x8x128xbf16> to vector<8x128xbf16>
    %c0_2 = arith.constant 0 : index
    %c0_3 = arith.constant 0 : index
    %c0_4 = arith.constant 0 : index
    %2 = vector.load %arg2[%c0_2, %c0_3, %c0_4] : memref<1x128x512xbf16, #tpu.memory_space<vmem>>, vector<1x128x512xbf16>
    %3 = vector.shape_cast %2 : vector<1x128x512xbf16> to vector<128x512xbf16>
    %cst = arith.constant dense<0.000000e+00> : vector<8x512xf32>
    %4 = tpu.matmul %1, %3, %cst {dimension_numbers = #tpu.dot_dimension_numbers<[1], [0], [0], [1], [0, 0, 1, 1], [], []>} : vector<8x128xbf16>, vector<128x512xbf16>, vector<8x512xf32> -> vector<8x512xf32>
    %c0_5 = arith.constant 0 : index
    %c0_6 = arith.constant 0 : index
    %c0_7 = arith.constant 0 : index
    %5 = vector.load %arg3[%c0_5, %c0_6, %c0_7] : memref<1x1x512xf32, #tpu.memory_space<vmem>>, vector<1x1x512xf32>
    %6 = vector.shape_cast %5 : vector<1x1x512xf32> to vector<1x512xf32>
    %7 = vector.broadcast %6 : vector<1x512xf32> to vector<8x512xf32>
    %8 = arith.addf %4, %7 : vector<8x512xf32>
    %cst_8 = arith.constant 0.000000e+00 : f32
    %9 = vector.broadcast %cst_8 : f32 to vector<8x512xf32>
    %10 = arith.maximumf %8, %9 : vector<8x512xf32>
    %11 = arith.truncf %10 : vector<8x512xf32> to vector<8x512xbf16>
    %c0_9 = arith.constant 0 : index
    %c0_10 = arith.constant 0 : index
    %c0_11 = arith.constant 0 : index
    %12 = vector.load %arg4[%c0_9, %c0_10, %c0_11] : memref<1x512x512xbf16, #tpu.memory_space<vmem>>, vector<1x512x512xbf16>
    %13 = vector.shape_cast %12 : vector<1x512x512xbf16> to vector<512x512xbf16>
    %cst_12 = arith.constant dense<0.000000e+00> : vector<8x512xf32>
    %14 = tpu.matmul %11, %13, %cst_12 {dimension_numbers = #tpu.dot_dimension_numbers<[1], [0], [0], [1], [0, 0, 1, 1], [], []>} : vector<8x512xbf16>, vector<512x512xbf16>, vector<8x512xf32> -> vector<8x512xf32>
    %c0_13 = arith.constant 0 : index
    %c0_14 = arith.constant 0 : index
    %c0_15 = arith.constant 0 : index
    %15 = vector.load %arg5[%c0_13, %c0_14, %c0_15] : memref<1x1x512xf32, #tpu.memory_space<vmem>>, vector<1x1x512xf32>
    %16 = vector.shape_cast %15 : vector<1x1x512xf32> to vector<1x512xf32>
    %17 = vector.broadcast %16 : vector<1x512xf32> to vector<8x512xf32>
    %18 = arith.addf %14, %17 : vector<8x512xf32>
    %cst_16 = arith.constant 0.000000e+00 : f32
    %19 = vector.broadcast %cst_16 : f32 to vector<8x512xf32>
    %20 = arith.maximumf %18, %19 : vector<8x512xf32>
    %21 = arith.truncf %20 : vector<8x512xf32> to vector<8x512xbf16>
    %c0_17 = arith.constant 0 : index
    %c0_18 = arith.constant 0 : index
    %c0_19 = arith.constant 0 : index
    %22 = vector.load %arg6[%c0_17, %c0_18, %c0_19] : memref<1x512x512xbf16, #tpu.memory_space<vmem>>, vector<1x512x512xbf16>
    %23 = vector.shape_cast %22 : vector<1x512x512xbf16> to vector<512x512xbf16>
    %cst_20 = arith.constant dense<0.000000e+00> : vector<8x512xf32>
    %24 = tpu.matmul %21, %23, %cst_20 {dimension_numbers = #tpu.dot_dimension_numbers<[1], [0], [0], [1], [0, 0, 1, 1], [], []>} : vector<8x512xbf16>, vector<512x512xbf16>, vector<8x512xf32> -> vector<8x512xf32>
    %c0_21 = arith.constant 0 : index
    %c0_22 = arith.constant 0 : index
    %c0_23 = arith.constant 0 : index
    %25 = vector.load %arg7[%c0_21, %c0_22, %c0_23] : memref<1x1x512xf32, #tpu.memory_space<vmem>>, vector<1x1x512xf32>
    %26 = vector.shape_cast %25 : vector<1x1x512xf32> to vector<1x512xf32>
    %27 = vector.broadcast %26 : vector<1x512xf32> to vector<8x512xf32>
    %28 = arith.addf %24, %27 : vector<8x512xf32>
    %29 = arith.truncf %28 : vector<8x512xf32> to vector<8x512xbf16>
    %c0_24 = arith.constant 0 : index
    %c0_25 = arith.constant 0 : index
    %c0_26 = arith.constant 0 : index
    %30 = vector.load %arg8[%c0_24, %c0_25, %c0_26] : memref<1x512x128xbf16, #tpu.memory_space<vmem>>, vector<1x512x128xbf16>
    %31 = vector.shape_cast %30 : vector<1x512x128xbf16> to vector<512x128xbf16>
    %cst_27 = arith.constant dense<0.000000e+00> : vector<8x128xf32>
    %32 = tpu.matmul %29, %31, %cst_27 {dimension_numbers = #tpu.dot_dimension_numbers<[1], [0], [0], [1], [0, 0, 1, 1], [], []>} : vector<8x512xbf16>, vector<512x128xbf16>, vector<8x128xf32> -> vector<8x128xf32>
    %c0_28 = arith.constant 0 : index
    %c0_29 = arith.constant 0 : index
    %c0_30 = arith.constant 0 : index
    %33 = vector.load %arg9[%c0_28, %c0_29, %c0_30] : memref<1x1x128xf32, #tpu.memory_space<vmem>>, vector<1x1x128xf32>
    %34 = vector.shape_cast %33 : vector<1x1x128xf32> to vector<1x128xf32>
    %35 = vector.broadcast %34 : vector<1x128xf32> to vector<8x128xf32>
    %36 = arith.addf %32, %35 : vector<8x128xf32>
    %c0_31 = arith.constant 0 : index
    %c0_32 = arith.constant 0 : index
    %c0_33 = arith.constant 0 : index
    %37 = vector.load %arg18[%c0_31, %c0_32, %c0_33] : memref<1x8x128xf32, #tpu.memory_space<vmem>>, vector<1x8x128xf32>
    %38 = vector.shape_cast %37 : vector<1x8x128xf32> to vector<8x128xf32>
    %39 = vector.shape_cast %36 : vector<8x128xf32> to vector<1x8x128xf32>
    tpu.vector_store %arg18[%c0_31, %c0_32, %c0_33], %39 {strides = array<i32>} : memref<1x8x128xf32, #tpu.memory_space<vmem>>, vector<1x8x128xf32>,
    %40 = arith.truncf %36 : vector<8x128xf32> to vector<8x128xbf16>
    %c0_34 = arith.constant 0 : index
    %c0_35 = arith.constant 0 : index
    %c0_36 = arith.constant 0 : index
    %41 = vector.load %arg10[%c0_34, %c0_35, %c0_36] : memref<1x128x512xbf16, #tpu.memory_space<vmem>>, vector<1x128x512xbf16>
    %42 = vector.shape_cast %41 : vector<1x128x512xbf16> to vector<128x512xbf16>
    %cst_37 = arith.constant dense<0.000000e+00> : vector<8x512xf32>
    %43 = tpu.matmul %40, %42, %cst_37 {dimension_numbers = #tpu.dot_dimension_numbers<[1], [0], [0], [1], [0, 0, 1, 1], [], []>} : vector<8x128xbf16>, vector<128x512xbf16>, vector<8x512xf32> -> vector<8x512xf32>
    %c0_38 = arith.constant 0 : index
    %c0_39 = arith.constant 0 : index
    %c0_40 = arith.constant 0 : index
    %44 = vector.load %arg11[%c0_38, %c0_39, %c0_40] : memref<1x1x512xf32, #tpu.memory_space<vmem>>, vector<1x1x512xf32>
    %45 = vector.shape_cast %44 : vector<1x1x512xf32> to vector<1x512xf32>
    %46 = vector.broadcast %45 : vector<1x512xf32> to vector<8x512xf32>
    %47 = arith.addf %43, %46 : vector<8x512xf32>
    %cst_41 = arith.constant 0.000000e+00 : f32
    %48 = vector.broadcast %cst_41 : f32 to vector<8x512xf32>
    %49 = arith.maximumf %47, %48 : vector<8x512xf32>
    %50 = arith.truncf %49 : vector<8x512xf32> to vector<8x512xbf16>
    %c0_42 = arith.constant 0 : index
    %c0_43 = arith.constant 0 : index
    %c0_44 = arith.constant 0 : index
    %51 = vector.load %arg12[%c0_42, %c0_43, %c0_44] : memref<1x512x512xbf16, #tpu.memory_space<vmem>>, vector<1x512x512xbf16>
    %52 = vector.shape_cast %51 : vector<1x512x512xbf16> to vector<512x512xbf16>
    %cst_45 = arith.constant dense<0.000000e+00> : vector<8x512xf32>
    %53 = tpu.matmul %50, %52, %cst_45 {dimension_numbers = #tpu.dot_dimension_numbers<[1], [0], [0], [1], [0, 0, 1, 1], [], []>} : vector<8x512xbf16>, vector<512x512xbf16>, vector<8x512xf32> -> vector<8x512xf32>
    %c0_46 = arith.constant 0 : index
    %c0_47 = arith.constant 0 : index
    %c0_48 = arith.constant 0 : index
    %54 = vector.load %arg13[%c0_46, %c0_47, %c0_48] : memref<1x1x512xf32, #tpu.memory_space<vmem>>, vector<1x1x512xf32>
    %55 = vector.shape_cast %54 : vector<1x1x512xf32> to vector<1x512xf32>
    %56 = vector.broadcast %55 : vector<1x512xf32> to vector<8x512xf32>
    %57 = arith.addf %53, %56 : vector<8x512xf32>
    %cst_49 = arith.constant 0.000000e+00 : f32
    %58 = vector.broadcast %cst_49 : f32 to vector<8x512xf32>
    %59 = arith.maximumf %57, %58 : vector<8x512xf32>
    %60 = arith.truncf %59 : vector<8x512xf32> to vector<8x512xbf16>
    %c0_50 = arith.constant 0 : index
    %c0_51 = arith.constant 0 : index
    %c0_52 = arith.constant 0 : index
    %61 = vector.load %arg14[%c0_50, %c0_51, %c0_52] : memref<1x512x512xbf16, #tpu.memory_space<vmem>>, vector<1x512x512xbf16>
    %62 = vector.shape_cast %61 : vector<1x512x512xbf16> to vector<512x512xbf16>
    %cst_53 = arith.constant dense<0.000000e+00> : vector<8x512xf32>
    %63 = tpu.matmul %60, %62, %cst_53 {dimension_numbers = #tpu.dot_dimension_numbers<[1], [0], [0], [1], [0, 0, 1, 1], [], []>} : vector<8x512xbf16>, vector<512x512xbf16>, vector<8x512xf32> -> vector<8x512xf32>
    %c0_54 = arith.constant 0 : index
    %c0_55 = arith.constant 0 : index
    %c0_56 = arith.constant 0 : index
    %64 = vector.load %arg15[%c0_54, %c0_55, %c0_56] : memref<1x1x512xf32, #tpu.memory_space<vmem>>, vector<1x1x512xf32>
    %65 = vector.shape_cast %64 : vector<1x1x512xf32> to vector<1x512xf32>
    %66 = vector.broadcast %65 : vector<1x512xf32> to vector<8x512xf32>
    %67 = arith.addf %63, %66 : vector<8x512xf32>
    %cst_57 = arith.constant 0.000000e+00 : f32
    %68 = vector.broadcast %cst_57 : f32 to vector<8x512xf32>
    %69 = arith.maximumf %67, %68 : vector<8x512xf32>
    %70 = arith.truncf %69 : vector<8x512xf32> to vector<8x512xbf16>
    %c0_58 = arith.constant 0 : index
    %c0_59 = arith.constant 0 : index
    %c0_60 = arith.constant 0 : index
    %71 = vector.load %arg16[%c0_58, %c0_59, %c0_60] : memref<1x512x128xbf16, #tpu.memory_space<vmem>>, vector<1x512x128xbf16>
    %72 = vector.shape_cast %71 : vector<1x512x128xbf16> to vector<512x128xbf16>
    %cst_61 = arith.constant dense<0.000000e+00> : vector<8x128xf32>
    %73 = tpu.matmul %70, %72, %cst_61 {dimension_numbers = #tpu.dot_dimension_numbers<[1], [0], [0], [1], [0, 0, 1, 1], [], []>} : vector<8x512xbf16>, vector<512x128xbf16>, vector<8x128xf32> -> vector<8x128xf32>
    %c0_62 = arith.constant 0 : index
    %c0_63 = arith.constant 0 : index
    %c0_64 = arith.constant 0 : index
    %74 = vector.load %arg17[%c0_62, %c0_63, %c0_64] : memref<1x1x128xf32, #tpu.memory_space<vmem>>, vector<1x1x128xf32>
    %75 = vector.shape_cast %74 : vector<1x1x128xf32> to vector<1x128xf32>
    %76 = vector.broadcast %75 : vector<1x128xf32> to vector<8x128xf32>
    %77 = arith.addf %73, %76 : vector<8x128xf32>
    %c0_65 = arith.constant 0 : index
    %c0_66 = arith.constant 0 : index
    %c0_67 = arith.constant 0 : index
    %78 = vector.load %arg19[%c0_65, %c0_66, %c0_67] : memref<1x8x128xf32, #tpu.memory_space<vmem>>, vector<1x8x128xf32>
    %79 = vector.shape_cast %78 : vector<1x8x128xf32> to vector<8x128xf32>
    %80 = vector.shape_cast %77 : vector<8x128xf32> to vector<1x8x128xf32>
    tpu.vector_store %arg19[%c0_65, %c0_66, %c0_67], %80 {strides = array<i32>} : memref<1x8x128xf32, #tpu.memory_space<vmem>>, vector<1x8x128xf32>,
    return
  }
  func.func @transform_0(%arg0: i32) -> (i32, i32, i32) {
    %c0_i32 = arith.constant 0 : i32
    %c0_i32_0 = arith.constant 0 : i32
    %c0_i32_1 = arith.constant 0 : i32
    return %arg0, %c0_i32, %c0_i32_0 : i32, i32, i32
  }
  func.func @transform_1(%arg0: i32) -> (i32, i32, i32) {
    %c0_i32 = arith.constant 0 : i32
    %c0_i32_0 = arith.constant 0 : i32
    %c0_i32_1 = arith.constant 0 : i32
    return %arg0, %c0_i32, %c0_i32_0 : i32, i32, i32
  }
  func.func @transform_2(%arg0: i32) -> (i32, i32, i32) {
    %c0_i32 = arith.constant 0 : i32
    %c0_i32_0 = arith.constant 0 : i32
    %c0_i32_1 = arith.constant 0 : i32
    return %arg0, %c0_i32, %c0_i32_0 : i32, i32, i32
  }
  func.func @transform_3(%arg0: i32) -> (i32, i32, i32) {
    %c0_i32 = arith.constant 0 : i32
    %c0_i32_0 = arith.constant 0 : i32
    %c0_i32_1 = arith.constant 0 : i32
    return %arg0, %c0_i32, %c0_i32_0 : i32, i32, i32
  }
  func.func @transform_4(%arg0: i32) -> (i32, i32, i32) {
    %c0_i32 = arith.constant 0 : i32
    %c0_i32_0 = arith.constant 0 : i32
    %c0_i32_1 = arith.constant 0 : i32
    return %arg0, %c0_i32, %c0_i32_0 : i32, i32, i32
  }
  func.func @transform_5(%arg0: i32) -> (i32, i32, i32) {
    %c0_i32 = arith.constant 0 : i32
    %c0_i32_0 = arith.constant 0 : i32
    %c0_i32_1 = arith.constant 0 : i32
    return %arg0, %c0_i32, %c0_i32_0 : i32, i32, i32
  }
  func.func @transform_6(%arg0: i32) -> (i32, i32, i32) {
    %c0_i32 = arith.constant 0 : i32
    %c0_i32_0 = arith.constant 0 : i32
    %c0_i32_1 = arith.constant 0 : i32
    return %arg0, %c0_i32, %c0_i32_0 : i32, i32, i32
  }
  func.func @transform_7(%arg0: i32) -> (i32, i32, i32) {
    %c0_i32 = arith.constant 0 : i32
    %c0_i32_0 = arith.constant 0 : i32
    %c0_i32_1 = arith.constant 0 : i32
    return %arg0, %c0_i32, %c0_i32_0 : i32, i32, i32
  }
  func.func @transform_8(%arg0: i32) -> (i32, i32, i32) {
    %c0_i32 = arith.constant 0 : i32
    %c0_i32_0 = arith.constant 0 : i32
    %c0_i32_1 = arith.constant 0 : i32
    return %arg0, %c0_i32, %c0_i32_0 : i32, i32, i32
  }
  func.func @transform_9(%arg0: i32) -> (i32, i32, i32) {
    %c0_i32 = arith.constant 0 : i32
    %c0_i32_0 = arith.constant 0 : i32
    %c0_i32_1 = arith.constant 0 : i32
    return %arg0, %c0_i32, %c0_i32_0 : i32, i32, i32
  }
  func.func @transform_10(%arg0: i32) -> (i32, i32, i32) {
    %c0_i32 = arith.constant 0 : i32
    %c0_i32_0 = arith.constant 0 : i32
    %c0_i32_1 = arith.constant 0 : i32
    return %arg0, %c0_i32, %c0_i32_0 : i32, i32, i32
  }
  func.func @transform_11(%arg0: i32) -> (i32, i32, i32) {
    %c0_i32 = arith.constant 0 : i32
    %c0_i32_0 = arith.constant 0 : i32
    %c0_i32_1 = arith.constant 0 : i32
    return %arg0, %c0_i32, %c0_i32_0 : i32, i32, i32
  }
  func.func @transform_12(%arg0: i32) -> (i32, i32, i32) {
    %c0_i32 = arith.constant 0 : i32
    %c0_i32_0 = arith.constant 0 : i32
    %c0_i32_1 = arith.constant 0 : i32
    return %arg0, %c0_i32, %c0_i32_0 : i32, i32, i32
  }
  func.func @transform_13(%arg0: i32) -> (i32, i32, i32) {
    %c0_i32 = arith.constant 0 : i32
    %c0_i32_0 = arith.constant 0 : i32
    %c0_i32_1 = arith.constant 0 : i32
    return %arg0, %c0_i32, %c0_i32_0 : i32, i32, i32
  }
  func.func @transform_14(%arg0: i32) -> (i32, i32, i32) {
    %c0_i32 = arith.constant 0 : i32
    %c0_i32_0 = arith.constant 0 : i32
    %c0_i32_1 = arith.constant 0 : i32
    return %arg0, %c0_i32, %c0_i32_0 : i32, i32, i32
  }
  func.func @transform_15(%arg0: i32) -> (i32, i32, i32) {
    %c0_i32 = arith.constant 0 : i32
    %c0_i32_0 = arith.constant 0 : i32
    %c0_i32_1 = arith.constant 0 : i32
    return %arg0, %c0_i32, %c0_i32_0 : i32, i32, i32
  }
  func.func @transform_16(%arg0: i32) -> (i32, i32, i32) {
    %c0_i32 = arith.constant 0 : i32
    %c0_i32_0 = arith.constant 0 : i32
    %c0_i32_1 = arith.constant 0 : i32
    return %arg0, %c0_i32, %c0_i32_0 : i32, i32, i32
  }
  func.func @transform_17(%arg0: i32) -> (i32, i32, i32) {
    %c0_i32 = arith.constant 0 : i32
    %c0_i32_0 = arith.constant 0 : i32
    %c0_i32_1 = arith.constant 0 : i32
    return %arg0, %c0_i32, %c0_i32_0 : i32, i32, i32
  }
  func.func @transform_18(%arg0: i32) -> (i32, i32, i32) {
    %c0_i32 = arith.constant 0 : i32
    %c0_i32_0 = arith.constant 0 : i32
    %c0_i32_1 = arith.constant 0 : i32
    return %arg0, %c0_i32, %c0_i32_0 : i32, i32, i32
  }
}

</mosaic_0001>

<bundles_post_ra>
// kernel: dae_forward.1
= control target key start
LH: loop header
LB: loop body
LE: loop exit
PB: predicated region body
PF: predicated region fallthrough
CT: control target
= control target key end

     0   :  { %s10524_s0 = inlined_call_operand.vmem [shape: bf16[3,8,128], index: 0, kind: input, shape index: {}]   ;;  %s10525_s1 = inlined_call_operand.hbm [shape: bf16[3,128,512], index: 1, kind: input, shape index: {}]   ;;  %s10526_s2 = inlined_call_operand.hbm [shape: f32[3,1,512], index: 2, kind: input, shape index: {}]   ;;  %s10527_s3 = inlined_call_operand.hbm [shape: bf16[3,512,512], index: 3, kind: input, shape index: {}]   ;;  %s10528_s4 = inlined_call_operand.hbm [shape: f32[3,1,512], index: 4, kind: input, shape index: {}]   ;;  %s10529_s5 = inlined_call_operand.hbm [shape: bf16[3,512,512], index: 5, kind: input, shape index: {}]   ;;  %s10530_s6 = inlined_call_operand.hbm [shape: f32[3,1,512], index: 6, kind: input, shape index: {}]   ;;  %s10531_s7 = inlined_call_operand.hbm [shape: bf16[3,512,128], index: 7, kind: input, shape index: {}]   ;;  %s10532_s8 = inlined_call_operand.hbm [shape: f32[3,1,128], index: 8, kind: input, shape index: {}]   ;;  %s10533_s9 = inlined_call_operand.hbm [shape: bf16[3,128,512], index: 9, kind: input, shape index: {}]   ;;  %s10534_s10 = inlined_call_operand.hbm [shape: f32[3,1,512], index: 10, kind: input, shape index: {}]   ;;  %s10535_s11 = inlined_call_operand.hbm [shape: bf16[3,512,512], index: 11, kind: input, shape index: {}]   ;;  %s10536_s12 = inlined_call_operand.hbm [shape: f32[3,1,512], index: 12, kind: input, shape index: {}]   ;;  %s10537_s13 = inlined_call_operand.hbm [shape: bf16[3,512,512], index: 13, kind: input, shape index: {}]   ;;  %s10538_s14 = inlined_call_operand.hbm [shape: f32[3,1,512], index: 14, kind: input, shape index: {}]   ;;  %s10539_s15 = inlined_call_operand.hbm [shape: bf16[3,512,128], index: 15, kind: input, shape index: {}]   ;;  %s10540_s16 = inlined_call_operand.hbm [shape: f32[3,1,128], index: 16, kind: input, shape index: {}]   ;;  %s10541_s17 = inlined_call_operand.vmem [shape: f32[3,8,128], index: 17, kind: output, shape index: {0}]   ;;  %s10542_s18 = inlined_call_operand.vmem [shape: f32[3,8,128], index: 18, kind: output, shape index: {1}]  }
   0x1   :  { %10562 = sst [smem:[#allocation42_spill]] %s10524_s0 }
   0x2   :  { %10563 = sst [smem:[#allocation43_spill]] %s10525_s1 }
   0x3   :  { %10564 = sst [smem:[#allocation44_spill]] %s10526_s2 }
   0x4   :  { %10565 = sst [smem:[#allocation45_spill]] %s10527_s3 }
   0x5   :  { %10566 = sst [smem:[#allocation46_spill]] %s10528_s4 }
   0x6   :  { %10567 = sst [smem:[#allocation47_spill]] %s10529_s5 }
   0x7   :  { %10568 = sst [smem:[#allocation48_spill]] %s10530_s6 }
   0x8   :  { %10569 = sst [smem:[#allocation49_spill]] %s10532_s8 }
   0x9   :  { %10570 = sst [smem:[#allocation50_spill]] %s10534_s10 }
   0xa   :  { %10571 = sst [smem:[#allocation51_spill]] %s10539_s15 }
   0xb   :  { %10572 = sst [smem:[#allocation52_spill]] %s10540_s16 }
   0xc   :  { %10573 = sst [smem:[#allocation53_spill]] %s10541_s17 }
   0xd   :  { %10574 = sst [smem:[#allocation54_spill]] %s10542_s18 }
   0xe   :  { %24 = vsyncpa [#allocation3], 0 }
   0xf   :  { %26 = vsyncpa [#allocation3 + $0x1], 0 }
  0x10   :  { %27 = vsyncpa [#allocation5], 0 }
  0x11   :  { %29 = vsyncpa [#allocation5 + $0x1], 0 }
  0x12   :  { %30 = vsyncpa [#allocation8], 0 }
  0x13   :  { %32 = vsyncpa [#allocation8 + $0x1], 0 }
  0x14   :  { %33 = vsyncpa [#allocation11], 0 }
  0x15   :  { %35 = vsyncpa [#allocation11 + $0x1], 0 }
  0x16   :  { %36 = vsyncpa [#allocation14], 0 }
  0x17   :  { %38 = vsyncpa [#allocation14 + $0x1], 0 }
  0x18   :  { %39 = vsyncpa [#allocation17], 0 }
  0x19   :  { %41 = vsyncpa [#allocation17 + $0x1], 0 }
  0x1a   :  { %42 = vsyncpa [#allocation20], 0 }
  0x1b   :  { %44 = vsyncpa [#allocation20 + $0x1], 0 }
  0x1c   :  { %45 = vsyncpa [#allocation23], 0 }
  0x1d   :  { %47 = vsyncpa [#allocation23 + $0x1], 0 }
  0x1e   :  { %48 = vsyncpa [#allocation26], 0 }
  0x1f   :  { %50 = vsyncpa [#allocation26 + $0x1], 0  ;;  %s9154_s27 = smov 0   ;;  %s9156_s28 = smov 0  }
  0x20   :  { %s9158_s29 = smov 0   ;;  %s9160_s30 = smov 0  }
  0x21 LB: > { %10575 = sst [smem:[#allocation36_spill]] %s9028_s28  ;;  %s9173_s0 = sadd.s32 4294967295, %s9036_s30   ;;  %s9036_s30 = sphi %s9160_s30, %s10622_s30   ;;  %s9032_s29 = sphi %s9158_s29, %s10625_s29   ;;  %s9028_s28 = sphi %s9156_s28, %s10624_s28   ;;  %s9024_s27 = sphi %s9154_s27, %s10623_s27  }
  0x22   : > { %10576 = sst [smem:[#allocation37_spill]] %s9032_s29  ;;  %s9176_s19 = sadd.s32 1, %s9036_s30  }
  0x23   : > { %10577 = sst [smem:[#allocation38_spill]] %s9173_s0  ;;  %s86_s1 = ssub.s32 %s9036_s30, %s9176_s19 }
  0x24   : > { %10578 = sst [smem:[#allocation39_spill]] %s9176_s19  ;;  %s89_s20 = sadd.s32 1, %s9032_s29 }
  0x25   : > { %p87_p0 = scmp.eq.s32.totalorder %s86_s1, 0  ;;  %p96_p1 = scmp.ne.s32.totalorder %s9032_s29, %s9028_s28 }
  0x26   : > { %p97_p2 = scmp.eq.s32.totalorder %s9036_s30, 0  ;;  %p102_p3 = scmp.ne.s32.totalorder %s9028_s28, %s9024_s27 }
  0x27   : > { %s9186_s21 = scalar_select %p87_p0, %s9032_s29, %s89_s20  }
  0x28   : > { %p9188_p4 = por %p97_p2, %p96_p1  ;;  %p103_p5 = scmp.eq.s32.totalorder %s9173_s0, 0 }
  0x29   : > { %10579 = sst [smem:[#allocation40_spill]] %s9186_s21  ;;  %p6748_p7 = scmp.ge.s32.totalorder %s9036_s30, 3 }
  0x2a   : > { %p9193_p6 = por %p103_p5, %p102_p3  ;;  %s9199_s23 = sand.u32 (!%p6748_p7), 1, %s9032_s29  }
  0x2b   : > { %564 = sbr.rel (%p6748_p7) target bundleno = 462 (0x1ce), region = 16  ;;  %s9202_s24 = sand.u32 (!%p6748_p7), 1, %s9036_s30  }
  0x2c   : > { %s10581_s2 = scalar_select %p9193_p6, 1, 0 }
  0x2d   : > { %s9205_s25 = sshll.u32 (!%p6748_p7), %s9199_s23, 2  ;;  %s9208_s26 = sshll.u32 (!%p6748_p7), %s9036_s30, 6 }
  0x2e   : > { %10582 = sst [smem:[#allocation41_spill]] %s10581_s2  ;;  %s600_s29 = scalar_lea.vmem (!%p6748_p7), [#allocation4], %s9205_s25 }
  0x2f   : > { %s10583_s20 = sld [smem:[#allocation44_spill]] (!%p6748_p7)  ;;  %s608_s19 = sshll.u32 (!%p6748_p7), %s600_s29, 4  ;;  %s609_s19 = int_to_ptr.vmem [resolvable:$true] %s608_s19 }
  0x35   : > { %s9214_s21 = scalar_lea.hbm %s10583_s20, %s9208_s26  ;;  %s8558_s28 = scalar_lea.hbm %s10583_s20, 192 }
  0x36   : > { %s8554_s17 = scalar_lea.hbm %s9214_s21, 64  ;;  %p8559_p11 = scmp.lt.s32.totalorder %s9214_s21, %s10583_s20 }
  0x37   : > { %p8555_p8 = scmp.ne.s32.totalorder %s9214_s21, %s8554_s17  ;;  %p8560_p12 = scmp.lt.s32.totalorder %s8558_s28, %s8554_s17 }
  0x39   : > { %p8556_p9 = pnand %p8555_p8, %p9188_p4  ;;  %p8561_p13 = por %p8560_p12, %p8559_p11 }
  0x3b   : > { %p8557_p10 = pneg %p8556_p9 }
  0x3d   : > { %p8562_p0 = pnand %p8561_p13, %p8557_p10 }
  0x3f   : > { %8565 = shalt.err (!%p8562_p0)
}
  0x40   : > { %s8566_s29 = scalar_lea.vmem %s609_s19, 64  ;;  %s9038_s1 = smov [#allocation4]  }
  0x41   : > { %p8567_p1 = scmp.ne.s32.totalorder %s609_s19, %s8566_s29  ;;  %s8570_s18 = sshll.u32 %s9038_s1, 4  ;;  %s8571_s18 = int_to_ptr.vmem [resolvable:$false] %s8570_s18 }
  0x42   : > { %s8572_s15 = scalar_lea.vmem %s8571_s18, 128  ;;  %p8573_p5 = scmp.lt.s32.totalorder %s609_s19, %s8571_s18 }
  0x43   : > { %p8568_p2 = pnand %p8567_p1, %p9188_p4  ;;  %p8574_p7 = scmp.lt.s32.totalorder %s8572_s15, %s8566_s29 }
  0x45   : > { %p8569_p3 = pneg %p8568_p2  ;;  %p8575_p8 = por %p8574_p7, %p8573_p5 }
  0x47   : > { %p8576_p9 = pnand %p8575_p8, %p8569_p3 }
  0x49   : > { %8579 = shalt.err (!%p8576_p9)
}
  0x4a   : > { %s10584_s16 = scalar_lea.sflag [#allocation5], %s9202_s24  ;;  %s10585_s4 = sld [smem:[#allocation46_spill]] }
  0x4b   : > { %7558 = dma.hbm_to_vmem [thread:$0]  (%p9188_p4), %s9214_s21, 64, %s609_s19, %s10584_s16  }
  0x4c   : > { %s640_s15 = scalar_lea.vmem [#allocation7], %s9205_s25 }
  0x4d   : > { %s648_s18 = sshll.u32 %s640_s15, 4  ;;  %s649_s18 = int_to_ptr.vmem [resolvable:$true] %s648_s18 }
  0x50   : > { %s9240_s0 = scalar_lea.hbm %s10585_s4, %s9208_s26  ;;  %s8584_s19 = scalar_lea.hbm %s10585_s4, 192 }
  0x51   : > { %s8580_s27 = scalar_lea.hbm %s9240_s0, 64  ;;  %p8585_p13 = scmp.lt.s32.totalorder %s9240_s0, %s10585_s4 }
  0x52   : > { %p8581_p10 = scmp.ne.s32.totalorder %s9240_s0, %s8580_s27  ;;  %p8586_p0 = scmp.lt.s32.totalorder %s8584_s19, %s8580_s27 }
  0x54   : > { %p8582_p11 = pnand %p8581_p10, %p9188_p4  ;;  %p8587_p1 = por %p8586_p0, %p8585_p13 }
  0x56   : > { %p8583_p12 = pneg %p8582_p11 }
  0x58   : > { %p8588_p2 = pnand %p8587_p1, %p8583_p12 }
  0x5a   : > { %8591 = shalt.err (!%p8588_p2)
}
  0x5b   : > { %s8592_s17 = scalar_lea.vmem %s649_s18, 64  ;;  %s9039_s28 = smov [#allocation7]  }
  0x5c   : > { %p8593_p3 = scmp.ne.s32.totalorder %s649_s18, %s8592_s17  ;;  %s8596_s15 = sshll.u32 %s9039_s28, 4  ;;  %s8597_s15 = int_to_ptr.vmem [resolvable:$false] %s8596_s15 }
  0x5d   : > { %s8598_s2 = scalar_lea.vmem %s8597_s15, 128  ;;  %p8599_p8 = scmp.lt.s32.totalorder %s649_s18, %s8597_s15 }
  0x5e   : > { %p8594_p5 = pnand %p8593_p3, %p9188_p4  ;;  %p8600_p9 = scmp.lt.s32.totalorder %s8598_s2, %s8592_s17 }
  0x60   : > { %p8595_p7 = pneg %p8594_p5  ;;  %p8601_p10 = por %p8600_p9, %p8599_p8 }
  0x62   : > { %p8602_p11 = pnand %p8601_p10, %p8595_p7 }
  0x64   : > { %8605 = shalt.err (!%p8602_p11)
}
  0x65   : > { %s10586_s27 = scalar_lea.sflag [#allocation8], %s9202_s24  ;;  %s10587_s6 = sld [smem:[#allocation48_spill]] }
  0x66   : > { %7560 = dma.hbm_to_vmem [thread:$0]  (%p9188_p4), %s9240_s0, 64, %s649_s18, %s10586_s27  }
  0x67   : > { %s680_s2 = scalar_lea.vmem [#allocation10], %s9205_s25 }
  0x68   : > { %s688_s21 = sshll.u32 %s680_s2, 4  ;;  %s689_s21 = int_to_ptr.vmem [resolvable:$true] %s688_s21 }
  0x6b   : > { %s9266_s19 = scalar_lea.hbm %s10587_s6, %s9208_s26  ;;  %s8610_s0 = scalar_lea.hbm %s10587_s6, 192 }
  0x6c   : > { %s8606_s17 = scalar_lea.hbm %s9266_s19, 64  ;;  %p8611_p1 = scmp.lt.s32.totalorder %s9266_s19, %s10587_s6 }
  0x6d   : > { %p8607_p12 = scmp.ne.s32.totalorder %s9266_s19, %s8606_s17  ;;  %p8612_p2 = scmp.lt.s32.totalorder %s8610_s0, %s8606_s17 }
  0x6f   : > { %p8608_p13 = pnand %p8607_p12, %p9188_p4  ;;  %p8613_p3 = por %p8612_p2, %p8611_p1 }
  0x71   : > { %p8609_p0 = pneg %p8608_p13 }
  0x73   : > { %p8614_p5 = pnand %p8613_p3, %p8609_p0 }
  0x75   : > { %8617 = shalt.err (!%p8614_p5)
}
  0x76   : > { %s8618_s29 = scalar_lea.vmem %s689_s21, 64  ;;  %s9040_s1 = smov [#allocation10]  }
  0x77   : > { %p8619_p7 = scmp.ne.s32.totalorder %s689_s21, %s8618_s29  ;;  %s8622_s2 = sshll.u32 %s9040_s1, 4  ;;  %s8623_s2 = int_to_ptr.vmem [resolvable:$false] %s8622_s2 }
  0x78   : > { %s8624_s16 = scalar_lea.vmem %s8623_s2, 128  ;;  %p8625_p10 = scmp.lt.s32.totalorder %s689_s21, %s8623_s2 }
  0x79   : > { %p8620_p8 = pnand %p8619_p7, %p9188_p4  ;;  %p8626_p11 = scmp.lt.s32.totalorder %s8624_s16, %s8618_s29 }
  0x7b   : > { %p8621_p9 = pneg %p8620_p8  ;;  %p8627_p12 = por %p8626_p11, %p8625_p10 }
  0x7d   : > { %p8628_p13 = pnand %p8627_p12, %p8621_p9 }
  0x7f   : > { %8631 = shalt.err (!%p8628_p13)
}
  0x80   : > { %s10588_s17 = scalar_lea.sflag [#allocation11], %s9202_s24  ;;  %s10555_s28 = sshll.u32 %s9036_s30, 4 }
  0x81   : > { %7562 = dma.hbm_to_vmem [thread:$0]  (%p9188_p4), %s9266_s19, 64, %s689_s21, %s10588_s17  }
  0x82   : > { %s10589_s8 = sld [smem:[#allocation49_spill]]  ;;  %s719_s18 = scalar_lea.vmem [#allocation13], %s9199_s23 }
  0x83   : > { %s726_s27 = sshll.u32 %s719_s18, 4  ;;  %s727_s27 = int_to_ptr.vmem [resolvable:$true] %s726_s27 }
  0x88   : > { %s9294_s16 = scalar_lea.hbm %s10589_s8, %s10555_s28  ;;  %s8636_s2 = scalar_lea.hbm %s10589_s8, 48 }
  0x89   : > { %s8632_s1 = scalar_lea.hbm %s9294_s16, 16  ;;  %p8637_p3 = scmp.lt.s32.totalorder %s9294_s16, %s10589_s8 }
  0x8a   : > { %p8633_p0 = scmp.ne.s32.totalorder %s9294_s16, %s8632_s1  ;;  %p8638_p5 = scmp.lt.s32.totalorder %s8636_s2, %s8632_s1 }
  0x8c   : > { %p8634_p1 = pnand %p8633_p0, %p9188_p4  ;;  %p8639_p7 = por %p8638_p5, %p8637_p3 }
  0x8e   : > { %p8635_p2 = pneg %p8634_p1 }
  0x90   : > { %p8640_p8 = pnand %p8639_p7, %p8635_p2 }
  0x92   : > { %8643 = shalt.err (!%p8640_p8)
}
  0x93   : > { %s8644_s0 = scalar_lea.vmem %s727_s27, 16  ;;  %s9041_s18 = smov [#allocation13]  }
  0x94   : > { %p8645_p9 = scmp.ne.s32.totalorder %s727_s27, %s8644_s0  ;;  %s8648_s28 = sshll.u32 %s9041_s18, 4  ;;  %s8649_s28 = int_to_ptr.vmem [resolvable:$false] %s8648_s28 }
  0x95   : > { %s8650_s29 = scalar_lea.vmem %s8649_s28, 32  ;;  %p8651_p12 = scmp.lt.s32.totalorder %s727_s27, %s8649_s28 }
  0x96   : > { %p8646_p10 = pnand %p8645_p9, %p9188_p4  ;;  %p8652_p13 = scmp.lt.s32.totalorder %s8650_s29, %s8644_s0 }
  0x98   : > { %p8647_p11 = pneg %p8646_p10  ;;  %p8653_p0 = por %p8652_p13, %p8651_p12 }
  0x9a   : > { %p8654_p1 = pnand %p8653_p0, %p8647_p11 }
  0x9c   : > { %8657 = shalt.err (!%p8654_p1)
}
  0x9d   : > { %s10590_s1 = scalar_lea.sflag [#allocation14], %s9202_s24  ;;  %s10591_s10 = sld [smem:[#allocation50_spill]] }
  0x9e   : > { %7564 = dma.hbm_to_vmem [thread:$0]  (%p9188_p4), %s9294_s16, 16, %s727_s27, %s10590_s1  }
  0x9f   : > { %s758_s28 = scalar_lea.vmem [#allocation16], %s9205_s25 }
  0xa0   : > { %s766_s29 = sshll.u32 %s758_s28, 4  ;;  %s767_s29 = int_to_ptr.vmem [resolvable:$true] %s766_s29 }
  0xa3   : > { %s9320_s2 = scalar_lea.hbm %s10591_s10, %s9208_s26  ;;  %s8662_s16 = scalar_lea.hbm %s10591_s10, 192 }
  0xa4   : > { %s8658_s15 = scalar_lea.hbm %s9320_s2, 64  ;;  %p8663_p7 = scmp.lt.s32.totalorder %s9320_s2, %s10591_s10 }
  0xa5   : > { %p8659_p2 = scmp.ne.s32.totalorder %s9320_s2, %s8658_s15  ;;  %p8664_p8 = scmp.lt.s32.totalorder %s8662_s16, %s8658_s15 }
  0xa7   : > { %p8660_p3 = pnand %p8659_p2, %p9188_p4  ;;  %p8665_p9 = por %p8664_p8, %p8663_p7 }
  0xa9   : > { %p8661_p5 = pneg %p8660_p3 }
  0xab   : > { %p8666_p10 = pnand %p8665_p9, %p8661_p5 }
  0xad   : > { %8669 = shalt.err (!%p8666_p10)
}
  0xae   : > { %s8670_s19 = scalar_lea.vmem %s767_s29, 64  ;;  %s9042_s21 = smov [#allocation16]  }
  0xaf   : > { %p8671_p11 = scmp.ne.s32.totalorder %s767_s29, %s8670_s19  ;;  %s8674_s28 = sshll.u32 %s9042_s21, 4  ;;  %s8675_s28 = int_to_ptr.vmem [resolvable:$false] %s8674_s28 }
  0xb0   : > { %s8676_s17 = scalar_lea.vmem %s8675_s28, 128  ;;  %p8677_p0 = scmp.lt.s32.totalorder %s767_s29, %s8675_s28 }
  0xb1   : > { %p8672_p12 = pnand %p8671_p11, %p9188_p4  ;;  %p8678_p1 = scmp.lt.s32.totalorder %s8676_s17, %s8670_s19 }
  0xb3   : > { %p8673_p13 = pneg %p8672_p12  ;;  %p8679_p2 = por %p8678_p1, %p8677_p0 }
  0xb5   : > { %p8680_p3 = pnand %p8679_p2, %p8673_p13 }
  0xb7   : > { %8683 = shalt.err (!%p8680_p3)
}
  0xb8   : > { %s10592_s15 = scalar_lea.sflag [#allocation17], %s9202_s24  ;;  %s9346_s16 = scalar_lea.hbm %s10536_s12, %s9208_s26 }
  0xb9   : > { %7566 = dma.hbm_to_vmem [thread:$0]  (%p9188_p4), %s9320_s2, 64, %s767_s29, %s10592_s15  }
  0xba   : > { %s798_s17 = scalar_lea.vmem [#allocation19], %s9205_s25  ;;  %s8684_s19 = scalar_lea.hbm %s9346_s16, 64 }
  0xbb   : > { %s806_s27 = sshll.u32 %s798_s17, 4  ;;  %p8685_p5 = scmp.ne.s32.totalorder %s9346_s16, %s8684_s19  ;;  %s807_s27 = int_to_ptr.vmem [resolvable:$true] %s806_s27 }
  0xbc   : > { %s8688_s2 = scalar_lea.hbm %s10536_s12, 192  ;;  %p8689_p9 = scmp.lt.s32.totalorder %s9346_s16, %s10536_s12 }
  0xbd   : > { %p8686_p7 = pnand %p8685_p5, %p9188_p4  ;;  %p8690_p10 = scmp.lt.s32.totalorder %s8688_s2, %s8684_s19 }
  0xbf   : > { %p8687_p8 = pneg %p8686_p7  ;;  %p8691_p11 = por %p8690_p10, %p8689_p9 }
  0xc1   : > { %p8692_p12 = pnand %p8691_p11, %p8687_p8 }
  0xc3   : > { %8695 = shalt.err (!%p8692_p12)
}
  0xc4   : > { %s8696_s0 = scalar_lea.vmem %s807_s27, 64  ;;  %s9043_s18 = smov [#allocation19]  }
  0xc5   : > { %p8697_p13 = scmp.ne.s32.totalorder %s807_s27, %s8696_s0  ;;  %s8700_s17 = sshll.u32 %s9043_s18, 4  ;;  %s8701_s17 = int_to_ptr.vmem [resolvable:$false] %s8700_s17 }
  0xc6   : > { %s8702_s1 = scalar_lea.vmem %s8701_s17, 128  ;;  %p8703_p2 = scmp.lt.s32.totalorder %s807_s27, %s8701_s17 }
  0xc7   : > { %p8698_p0 = pnand %p8697_p13, %p9188_p4  ;;  %p8704_p3 = scmp.lt.s32.totalorder %s8702_s1, %s8696_s0 }
  0xc9   : > { %p8699_p1 = pneg %p8698_p0  ;;  %p8705_p5 = por %p8704_p3, %p8703_p2 }
  0xcb   : > { %p8706_p7 = pnand %p8705_p5, %p8699_p1 }
  0xcd   : > { %8709 = shalt.err (!%p8706_p7)
}
  0xce   : > { %s10593_s19 = scalar_lea.sflag [#allocation20], %s9202_s24  ;;  %s9372_s2 = scalar_lea.hbm %s10538_s14, %s9208_s26 }
  0xcf   : > { %7568 = dma.hbm_to_vmem [thread:$0]  (%p9188_p4), %s9346_s16, 64, %s807_s27, %s10593_s19  }
  0xd0   : > { %s838_s1 = scalar_lea.vmem [#allocation22], %s9205_s25  ;;  %s9376_s15 = sshll.u32 %s9199_s23, 8 }
  0xd1   : > { %s846_s29 = sshll.u32 %s838_s1, 4  ;;  %s10556_s0 = scalar_lea.sflag [#allocation23], %s9202_s24  ;;  %s847_s29 = int_to_ptr.vmem [resolvable:$true] %s846_s29 }
  0xd2   : > { %s8710_s18 = scalar_lea.hbm %s9372_s2, 64  ;;  %s8714_s17 = scalar_lea.hbm %s10538_s14, 192 }
  0xd3   : > { %p8711_p8 = scmp.ne.s32.totalorder %s9372_s2, %s8710_s18  ;;  %p8715_p11 = scmp.lt.s32.totalorder %s9372_s2, %s10538_s14 }
  0xd4   : > { %p8716_p12 = scmp.lt.s32.totalorder %s8714_s17, %s8710_s18 }
  0xd5   : > { %p8712_p9 = pnand %p8711_p8, %p9188_p4 }
  0xd6   : > { %p8717_p13 = por %p8716_p12, %p8715_p11 }
  0xd7   : > { %p8713_p10 = pneg %p8712_p9 }
  0xd9   : > { %p8718_p0 = pnand %p8717_p13, %p8713_p10 }
  0xdb   : > { %8721 = shalt.err (!%p8718_p0)
}
  0xdc   : > { %s8722_s25 = scalar_lea.vmem %s847_s29, 64  ;;  %s9044_s21 = smov [#allocation22]  }
  0xdd   : > { %p8723_p1 = scmp.ne.s32.totalorder %s847_s29, %s8722_s25  ;;  %s8726_s28 = sshll.u32 %s9044_s21, 4  ;;  %s8727_s28 = int_to_ptr.vmem [resolvable:$false] %s8726_s28 }
  0xde   : > { %s8728_s1 = scalar_lea.vmem %s8727_s28, 128  ;;  %p8729_p5 = scmp.lt.s32.totalorder %s847_s29, %s8727_s28 }
  0xdf   : > { %p8724_p2 = pnand %p8723_p1, %p9188_p4  ;;  %p8730_p7 = scmp.lt.s32.totalorder %s8728_s1, %s8722_s25 }
  0xe1   : > { %p8725_p3 = pneg %p8724_p2  ;;  %p8731_p8 = por %p8730_p7, %p8729_p5 }
  0xe3   : > { %p8732_p9 = pnand %p8731_p8, %p8725_p3 }
  0xe5   : > { %8735 = shalt.err (!%p8732_p9)
}
  0xe6   : > { %7570 = dma.hbm_to_vmem [thread:$0]  (%p9188_p4), %s9372_s2, 64, %s847_s29, %s10556_s0  }
  0xe7   : > { %s9398_s18 = sshll.u32 %s9036_s30, 12  ;;  %s10594_s17 = sld [smem:[#allocation43_spill]] }
  0xe8   : > { %s579_s19 = scalar_lea.vmem [#allocation2], %s9376_s15  ;;  %s9410_s21 = sshll.u32 %s9199_s23, 10 }
  0xe9   : > { %s586_s25 = sshll.u32 %s579_s19, 4  ;;  %s9407_s25 = int_to_ptr.vmem [resolvable:$true] %s586_s25 }
  0xed   : > { %s9404_s26 = scalar_lea.hbm %s10594_s17, %s9398_s18  ;;  %s8740_s16 = scalar_lea.hbm %s10594_s17, 12288 }
  0xee   : > { %s8736_s1 = scalar_lea.hbm %s9404_s26, 4096  ;;  %p8741_p13 = scmp.lt.s32.totalorder %s9404_s26, %s10594_s17 }
  0xef   : > { %p8737_p10 = scmp.ne.s32.totalorder %s9404_s26, %s8736_s1  ;;  %p8742_p0 = scmp.lt.s32.totalorder %s8740_s16, %s8736_s1 }
  0xf1   : > { %p8738_p11 = pnand %p8737_p10, %p9188_p4  ;;  %p8743_p1 = por %p8742_p0, %p8741_p13 }
  0xf3   : > { %p8739_p12 = pneg %p8738_p11 }
  0xf5   : > { %p8744_p2 = pnand %p8743_p1, %p8739_p12 }
  0xf7   : > { %8747 = shalt.err (!%p8744_p2)
}
  0xf8   : > { %s8748_s19 = scalar_lea.vmem %s9407_s25, 4096  ;;  %s9045_s28 = smov [#allocation2]  }
  0xf9   : > { %p8749_p3 = scmp.ne.s32.totalorder %s9407_s25, %s8748_s19  ;;  %s8752_s2 = sshll.u32 %s9045_s28, 4  ;;  %s8753_s2 = int_to_ptr.vmem [resolvable:$false] %s8752_s2 }
  0xfa   : > { %s8754_s29 = scalar_lea.vmem %s8753_s2, 8192  ;;  %p8755_p8 = scmp.lt.s32.totalorder %s9407_s25, %s8753_s2 }
  0xfb   : > { %p8750_p5 = pnand %p8749_p3, %p9188_p4  ;;  %p8756_p9 = scmp.lt.s32.totalorder %s8754_s29, %s8748_s19 }
  0xfd   : > { %p8751_p7 = pneg %p8750_p5  ;;  %p8757_p10 = por %p8756_p9, %p8755_p8 }
  0xff   : > { %p8758_p11 = pnand %p8757_p10, %p8751_p7 }
 0x101   : > { %8761 = shalt.err (!%p8758_p11)
}
 0x102   : > { %s10557_s0 = smov 256   ;;  %s10559_s1 = smov 16  }
 0x103   : > { %s10595_s28 = scalar_lea.sflag [#allocation3], %s9199_s23  ;;  %s9439_s16 = sshll.u32 %s9036_s30, 14 }
 0x104   : > { %7557 = dma.hbm_to_vmem [thread:$0]  (%p9188_p4), %s9404_s26, 4096, %s9407_s25, %s10595_s28, %s10557_s0, %s10557_s0, %s10559_s1  }
 0x105   : > { %s10596_s3 = sld [smem:[#allocation45_spill]]  ;;  %s619_s29 = scalar_lea.vmem [#allocation6], %s9410_s21 }
 0x106   : > { %s626_s4 = sshll.u32 %s619_s29, 4  ;;  %s627_s4 = int_to_ptr.vmem [resolvable:$true] %s626_s4 }
 0x10b   : > { %s9445_s2 = scalar_lea.hbm %s10596_s3, %s9439_s16  ;;  %s8766_s28 = scalar_lea.hbm %s10596_s3, 49152 }
 0x10c   : > { %s8762_s6 = scalar_lea.hbm %s9445_s2, 16384  ;;  %p8767_p1 = scmp.lt.s32.totalorder %s9445_s2, %s10596_s3 }
 0x10d   : > { %p8763_p12 = scmp.ne.s32.totalorder %s9445_s2, %s8762_s6  ;;  %p8768_p2 = scmp.lt.s32.totalorder %s8766_s28, %s8762_s6 }
 0x10f   : > { %p8764_p13 = pnand %p8763_p12, %p9188_p4  ;;  %p8769_p3 = por %p8768_p2, %p8767_p1 }
 0x111   : > { %p8765_p0 = pneg %p8764_p13 }
 0x113   : > { %p8770_p5 = pnand %p8769_p3, %p8765_p0 }
 0x115   : > { %8773 = shalt.err (!%p8770_p5)
}
 0x116   : > { %s8774_s27 = scalar_lea.vmem %s627_s4, 16384  ;;  %s9048_s19 = smov [#allocation6]  }
 0x117   : > { %p8775_p7 = scmp.ne.s32.totalorder %s627_s4, %s8774_s27  ;;  %s8778_s29 = sshll.u32 %s9048_s19, 4  ;;  %s8779_s29 = int_to_ptr.vmem [resolvable:$false] %s8778_s29 }
 0x118   : > { %s8780_s8 = scalar_lea.vmem %s8779_s29, 32768  ;;  %p8781_p10 = scmp.lt.s32.totalorder %s627_s4, %s8779_s29 }
 0x119   : > { %p8776_p8 = pnand %p8775_p7, %p9188_p4  ;;  %p8782_p11 = scmp.lt.s32.totalorder %s8780_s8, %s8774_s27 }
 0x11b   : > { %p8777_p9 = pneg %p8776_p8  ;;  %p8783_p12 = por %p8782_p11, %p8781_p10 }
 0x11d   : > { %p8784_p13 = pnand %p8783_p12, %p8777_p9 }
 0x11f   : > { %8787 = shalt.err (!%p8784_p13)
}
 0x120   : > { %s10597_s6 = smov 16   ;;  %s10598_s0 = smov 256  }
 0x121   : > { %s10599_s1 = scalar_lea.sflag [#allocation5], %s9202_s24  ;;  %s10600_s5 = sld [smem:[#allocation47_spill]] }
 0x122   : > { %7559 = dma.hbm_to_vmem [thread:$0]  (%p9188_p4), %s9445_s2, 16384, %s627_s4, %s10599_s1, %s10598_s0, %s10598_s0, %s10597_s6  }
 0x123   : > { %s659_s8 = scalar_lea.vmem [#allocation9], %s9410_s21 }
 0x124   : > { %s666_s27 = sshll.u32 %s659_s8, 4  ;;  %s667_s27 = int_to_ptr.vmem [resolvable:$true] %s666_s27 }
 0x127   : > { %s9473_s28 = scalar_lea.hbm %s10600_s5, %s9439_s16  ;;  %s8792_s4 = scalar_lea.hbm %s10600_s5, 49152 }
 0x128   : > { %s8788_s19 = scalar_lea.hbm %s9473_s28, 16384  ;;  %p8793_p3 = scmp.lt.s32.totalorder %s9473_s28, %s10600_s5 }
 0x129   : > { %p8789_p0 = scmp.ne.s32.totalorder %s9473_s28, %s8788_s19  ;;  %p8794_p5 = scmp.lt.s32.totalorder %s8792_s4, %s8788_s19 }
 0x12b   : > { %p8790_p1 = pnand %p8789_p0, %p9188_p4  ;;  %p8795_p7 = por %p8794_p5, %p8793_p3 }
 0x12d   : > { %p8791_p2 = pneg %p8790_p1 }
 0x12f   : > { %p8796_p8 = pnand %p8795_p7, %p8791_p2 }
 0x131   : > { %8799 = shalt.err (!%p8796_p8)
}
 0x132   : > { %s8800_s26 = scalar_lea.vmem %s667_s27, 16384  ;;  %s9049_s25 = smov [#allocation9]  }
 0x133   : > { %p8801_p9 = scmp.ne.s32.totalorder %s667_s27, %s8800_s26  ;;  %s8804_s8 = sshll.u32 %s9049_s25, 4  ;;  %s8805_s8 = int_to_ptr.vmem [resolvable:$false] %s8804_s8 }
 0x134   : > { %s8806_s10 = scalar_lea.vmem %s8805_s8, 32768  ;;  %p8807_p12 = scmp.lt.s32.totalorder %s667_s27, %s8805_s8 }
 0x135   : > { %p8802_p10 = pnand %p8801_p9, %p9188_p4  ;;  %p8808_p13 = scmp.lt.s32.totalorder %s8806_s10, %s8800_s26 }
 0x137   : > { %p8803_p11 = pneg %p8802_p10  ;;  %p8809_p0 = por %p8808_p13, %p8807_p12 }
 0x139   : > { %p8810_p1 = pnand %p8809_p0, %p8803_p11 }
 0x13b   : > { %8813 = shalt.err (!%p8810_p1)
}
 0x13c   : > { %s10601_s3 = scalar_lea.sflag [#allocation8], %s9202_s24  ;;  %s9501_s4 = scalar_lea.hbm %s10531_s7, %s9398_s18 }
 0x13d   : > { %7561 = dma.hbm_to_vmem [thread:$0]  (%p9188_p4), %s9473_s28, 16384, %s667_s27, %s10601_s3, %s10598_s0, %s10598_s0, %s10597_s6  }
 0x13e   : > { %s699_s10 = scalar_lea.vmem [#allocation12], %s9376_s15  ;;  %s8814_s1 = scalar_lea.hbm %s9501_s4, 4096 }
 0x13f   : > { %s706_s2 = sshll.u32 %s699_s10, 4  ;;  %p8815_p2 = scmp.ne.s32.totalorder %s9501_s4, %s8814_s1  ;;  %s9504_s2 = int_to_ptr.vmem [resolvable:$true] %s706_s2 }
 0x140   : > { %s8818_s28 = scalar_lea.hbm %s10531_s7, 12288  ;;  %p8819_p7 = scmp.lt.s32.totalorder %s9501_s4, %s10531_s7 }
 0x141   : > { %p8816_p3 = pnand %p8815_p2, %p9188_p4  ;;  %p8820_p8 = scmp.lt.s32.totalorder %s8818_s28, %s8814_s1 }
 0x143   : > { %p8817_p5 = pneg %p8816_p3  ;;  %p8821_p9 = por %p8820_p8, %p8819_p7 }
 0x145   : > { %p8822_p10 = pnand %p8821_p9, %p8817_p5 }
 0x147   : > { %8825 = shalt.err (!%p8822_p10)
}
 0x148   : > { %s8826_s3 = scalar_lea.vmem %s9504_s2, 4096  ;;  %s9050_s19 = smov [#allocation12]  }
 0x149   : > { %p8827_p11 = scmp.ne.s32.totalorder %s9504_s2, %s8826_s3  ;;  %s8830_s29 = sshll.u32 %s9050_s19, 4  ;;  %s8831_s29 = int_to_ptr.vmem [resolvable:$false] %s8830_s29 }
 0x14a   : > { %s8832_s10 = scalar_lea.vmem %s8831_s29, 8192  ;;  %p8833_p0 = scmp.lt.s32.totalorder %s9504_s2, %s8831_s29 }
 0x14b   : > { %p8828_p12 = pnand %p8827_p11, %p9188_p4  ;;  %p8834_p1 = scmp.lt.s32.totalorder %s8832_s10, %s8826_s3 }
 0x14d   : > { %p8829_p13 = pneg %p8828_p12  ;;  %p8835_p2 = por %p8834_p1, %p8833_p0 }
 0x14f   : > { %p8836_p3 = pnand %p8835_p2, %p8829_p13 }
 0x151   : > { %8839 = shalt.err (!%p8836_p3)
}
 0x152   : > { %s10561_s1 = smov 64   ;;  %s9052_s26 = smov 4  }
 0x153   : > { %s10602_s25 = scalar_lea.sflag [#allocation11], %s9202_s24  ;;  %s9535_s8 = scalar_lea.hbm %s10533_s9, %s9398_s18 }
 0x154   : > { %7563 = dma.hbm_to_vmem [thread:$0]  (%p9188_p4), %s9501_s4, 4096, %s9504_s2, %s10602_s25, %s10561_s1, %s10561_s1, %s9052_s26  }
 0x155   : > { %s737_s3 = scalar_lea.vmem [#allocation15], %s9376_s15  ;;  %s8840_s29 = scalar_lea.hbm %s9535_s8, 4096 }
 0x156   : > { %s744_s19 = sshll.u32 %s737_s3, 4  ;;  %p8841_p5 = scmp.ne.s32.totalorder %s9535_s8, %s8840_s29  ;;  %s745_s19 = int_to_ptr.vmem [resolvable:$true] %s744_s19 }
 0x157   : > { %s8844_s4 = scalar_lea.hbm %s10533_s9, 12288  ;;  %p8845_p9 = scmp.lt.s32.totalorder %s9535_s8, %s10533_s9 }
 0x158   : > { %p8842_p7 = pnand %p8841_p5, %p9188_p4  ;;  %p8846_p10 = scmp.lt.s32.totalorder %s8844_s4, %s8840_s29 }
 0x15a   : > { %p8843_p8 = pneg %p8842_p7  ;;  %p8847_p11 = por %p8846_p10, %p8845_p9 }
 0x15c   : > { %p8848_p12 = pnand %p8847_p11, %p8843_p8 }
 0x15e   : > { %8851 = shalt.err (!%p8848_p12)
}
 0x15f   : > { %s8852_s28 = scalar_lea.vmem %s745_s19, 4096  ;;  %s9053_s27 = smov [#allocation15]  }
 0x160   : > { %p8853_p13 = scmp.ne.s32.totalorder %s745_s19, %s8852_s28  ;;  %s8856_s3 = sshll.u32 %s9053_s27, 4  ;;  %s8857_s3 = int_to_ptr.vmem [resolvable:$false] %s8856_s3 }
 0x161   : > { %s8858_s1 = scalar_lea.vmem %s8857_s3, 8192  ;;  %p8859_p2 = scmp.lt.s32.totalorder %s745_s19, %s8857_s3 }
 0x162   : > { %p8854_p0 = pnand %p8853_p13, %p9188_p4  ;;  %p8860_p3 = scmp.lt.s32.totalorder %s8858_s1, %s8852_s28 }
 0x164   : > { %p8855_p1 = pneg %p8854_p0  ;;  %p8861_p5 = por %p8860_p3, %p8859_p2 }
 0x166   : > { %p8862_p7 = pnand %p8861_p5, %p8855_p1 }
 0x168   : > { %8865 = shalt.err (!%p8862_p7)
}
 0x169   : > { %s10603_s5 = scalar_lea.sflag [#allocation14], %s9202_s24  ;;  %s9563_s4 = scalar_lea.hbm %s10535_s11, %s9439_s16 }
 0x16a   : > { %7565 = dma.hbm_to_vmem [thread:$0]  (%p9188_p4), %s9535_s8, 4096, %s745_s19, %s10603_s5, %s10598_s0, %s10598_s0, %s10597_s6  }
 0x16b   : > { %s777_s1 = scalar_lea.vmem [#allocation18], %s9410_s21  ;;  %s8866_s25 = scalar_lea.hbm %s9563_s4, 16384 }
 0x16c   : > { %s784_s2 = sshll.u32 %s777_s1, 4  ;;  %p8867_p8 = scmp.ne.s32.totalorder %s9563_s4, %s8866_s25  ;;  %s785_s2 = int_to_ptr.vmem [resolvable:$true] %s784_s2 }
 0x16d   : > { %s8870_s8 = scalar_lea.hbm %s10535_s11, 49152  ;;  %p8871_p11 = scmp.lt.s32.totalorder %s9563_s4, %s10535_s11 }
 0x16e   : > { %p8868_p9 = pnand %p8867_p8, %p9188_p4  ;;  %p8872_p12 = scmp.lt.s32.totalorder %s8870_s8, %s8866_s25 }
 0x170   : > { %p8869_p10 = pneg %p8868_p9  ;;  %p8873_p13 = por %p8872_p12, %p8871_p11 }
 0x172   : > { %p8874_p0 = pnand %p8873_p13, %p8869_p10 }
 0x174   : > { %8877 = shalt.err (!%p8874_p0)
}
 0x175   : > { %s8878_s5 = scalar_lea.vmem %s785_s2, 16384  ;;  %s9054_s29 = smov [#allocation18]  }
 0x176   : > { %p8879_p1 = scmp.ne.s32.totalorder %s785_s2, %s8878_s5  ;;  %s8882_s10 = sshll.u32 %s9054_s29, 4  ;;  %s8883_s10 = int_to_ptr.vmem [resolvable:$false] %s8882_s10 }
 0x177   : > { %s8884_s1 = scalar_lea.vmem %s8883_s10, 32768  ;;  %p8885_p5 = scmp.lt.s32.totalorder %s785_s2, %s8883_s10 }
 0x178   : > { %p8880_p2 = pnand %p8879_p1, %p9188_p4  ;;  %p8886_p7 = scmp.lt.s32.totalorder %s8884_s1, %s8878_s5 }
 0x17a   : > { %p8881_p3 = pneg %p8880_p2  ;;  %p8887_p8 = por %p8886_p7, %p8885_p5 }
 0x17c   : > { %p8888_p9 = pnand %p8887_p8, %p8881_p3 }
 0x17e   : > { %8891 = shalt.err (!%p8888_p9)
}
 0x17f   : > { %s10604_s25 = scalar_lea.sflag [#allocation17], %s9202_s24  ;;  %s9591_s8 = scalar_lea.hbm %s10537_s13, %s9439_s16 }
 0x180   : > { %7567 = dma.hbm_to_vmem [thread:$0]  (%p9188_p4), %s9563_s4, 16384, %s785_s2, %s10604_s25, %s10598_s0, %s10598_s0, %s10597_s6  }
 0x181   : > { %s817_s19 = scalar_lea.vmem [#allocation21], %s9410_s21  ;;  %s8892_s5 = scalar_lea.hbm %s9591_s8, 16384 }
 0x182   : > { %s824_s3 = sshll.u32 %s817_s19, 4  ;;  %p8893_p10 = scmp.ne.s32.totalorder %s9591_s8, %s8892_s5  ;;  %s825_s3 = int_to_ptr.vmem [resolvable:$true] %s824_s3 }
 0x183   : > { %s8896_s4 = scalar_lea.hbm %s10537_s13, 49152  ;;  %p8897_p13 = scmp.lt.s32.totalorder %s9591_s8, %s10537_s13 }
 0x184   : > { %p8894_p11 = pnand %p8893_p10, %p9188_p4  ;;  %p8898_p0 = scmp.lt.s32.totalorder %s8896_s4, %s8892_s5 }
 0x186   : > { %p8895_p12 = pneg %p8894_p11  ;;  %p8899_p1 = por %p8898_p0, %p8897_p13 }
 0x188   : > { %p8900_p2 = pnand %p8899_p1, %p8895_p12 }
 0x18a   : > { %8903 = shalt.err (!%p8900_p2)
}
 0x18b   : > { %s8904_s21 = scalar_lea.vmem %s825_s3, 16384  ;;  %s9055_s16 = smov [#allocation21]  }
 0x18c   : > { %p8905_p3 = scmp.ne.s32.totalorder %s825_s3, %s8904_s21  ;;  %s8908_s25 = sshll.u32 %s9055_s16, 4  ;;  %s8909_s25 = int_to_ptr.vmem [resolvable:$false] %s8908_s25 }
 0x18d   : > { %s8910_s28 = scalar_lea.vmem %s8909_s25, 32768  ;;  %p8911_p8 = scmp.lt.s32.totalorder %s825_s3, %s8909_s25 }
 0x18e   : > { %p8906_p5 = pnand %p8905_p3, %p9188_p4  ;;  %p8912_p9 = scmp.lt.s32.totalorder %s8910_s28, %s8904_s21 }
 0x190   : > { %p8907_p7 = pneg %p8906_p5  ;;  %p8913_p10 = por %p8912_p9, %p8911_p8 }
 0x192   : > { %p8914_p11 = pnand %p8913_p10, %p8907_p7 }
 0x194   : > { %8917 = shalt.err (!%p8914_p11)
}
 0x195   : > { %s10605_s27 = scalar_lea.sflag [#allocation20], %s9202_s24  ;;  %s10606_s29 = sld [smem:[#allocation51_spill]] }
 0x196   : > { %7569 = dma.hbm_to_vmem [thread:$0]  (%p9188_p4), %s9591_s8, 16384, %s825_s3, %s10605_s27, %s10598_s0, %s10598_s0, %s10597_s6  }
 0x197   : > { %s857_s2 = scalar_lea.vmem [#allocation24], %s9376_s15 }
 0x198   : > { %s864_s1 = sshll.u32 %s857_s2, 4  ;;  %s865_s1 = int_to_ptr.vmem [resolvable:$true] %s864_s1 }
 0x19b   : > { %s10607_s10 = smov %s10606_s29  ;;  %s9619_s4 = scalar_lea.hbm %s10606_s29, %s9398_s18 }
 0x19c   : > { %s8918_s21 = scalar_lea.hbm %s9619_s4, 4096  ;;  %s8922_s6 = scalar_lea.hbm %s10607_s10, 12288 }
 0x19d   : > { %p8919_p12 = scmp.ne.s32.totalorder %s9619_s4, %s8918_s21  ;;  %p8923_p1 = scmp.lt.s32.totalorder %s9619_s4, %s10607_s10 }
 0x19e   : > { %p8924_p2 = scmp.lt.s32.totalorder %s8922_s6, %s8918_s21 }
 0x19f   : > { %p8920_p13 = pnand %p8919_p12, %p9188_p4 }
 0x1a0   : > { %p8925_p3 = por %p8924_p2, %p8923_p1 }
 0x1a1   : > { %p8921_p0 = pneg %p8920_p13 }
 0x1a3   : > { %p8926_p5 = pnand %p8925_p3, %p8921_p0 }
 0x1a5   : > { %8929 = shalt.err (!%p8926_p5)
}
 0x1a6   : > { %s8930_s15 = scalar_lea.vmem %s865_s1, 4096  ;;  %s9056_s18 = smov [#allocation24]  }
 0x1a7   : > { %p8931_p7 = scmp.ne.s32.totalorder %s865_s1, %s8930_s15  ;;  %s8934_s3 = sshll.u32 %s9056_s18, 4  ;;  %s8935_s3 = int_to_ptr.vmem [resolvable:$false] %s8934_s3 }
 0x1a8   : > { %s8936_s28 = scalar_lea.vmem %s8935_s3, 8192  ;;  %p8937_p10 = scmp.lt.s32.totalorder %s865_s1, %s8935_s3 }
 0x1a9   : > { %p8932_p8 = pnand %p8931_p7, %p9188_p4  ;;  %p8938_p11 = scmp.lt.s32.totalorder %s8936_s28, %s8930_s15 }
 0x1ab   : > { %p8933_p9 = pneg %p8932_p8  ;;  %p8939_p12 = por %p8938_p11, %p8937_p10 }
 0x1ad   : > { %p8940_p13 = pnand %p8939_p12, %p8933_p9 }
 0x1af   : > { %8943 = shalt.err (!%p8940_p13)
}
 0x1b0   : > { %s10608_s27 = smov 64   ;;  %s10609_s19 = scalar_lea.sflag [#allocation23], %s9202_s24 }
 0x1b1   : > { %7571 = dma.hbm_to_vmem [thread:$0]  (%p9188_p4), %s9619_s4, 4096, %s865_s1, %s10609_s19, %s10608_s27, %s10608_s27, %s9052_s26  }
 0x1b2   : > { %s10610_s5 = sshll.u32 %s9036_s30, 4  ;;  %s10611_s21 = sld [smem:[#allocation52_spill]] }
 0x1b3   : > { %s877_s25 = scalar_lea.vmem [#allocation25], %s9199_s23  ;;  %s875_s0 = scalar_lea.sflag [#allocation26], %s9199_s23 }
 0x1b4   : > { %s884_s6 = sshll.u32 %s877_s25, 4  ;;  %s885_s6 = int_to_ptr.vmem [resolvable:$true] %s884_s6 }
 0x1b8   : > { %s9648_s16 = scalar_lea.hbm %s10611_s21, %s10610_s5  ;;  %s8948_s4 = scalar_lea.hbm %s10611_s21, 48 }
 0x1b9   : > { %s8944_s24 = scalar_lea.hbm %s9648_s16, 16  ;;  %p8949_p3 = scmp.lt.s32.totalorder %s9648_s16, %s10611_s21 }
 0x1ba   : > { %p8945_p0 = scmp.ne.s32.totalorder %s9648_s16, %s8944_s24  ;;  %p8950_p5 = scmp.lt.s32.totalorder %s8948_s4, %s8944_s24 }
 0x1bc   : > { %p8946_p1 = pnand %p8945_p0, %p9188_p4  ;;  %p8951_p7 = por %p8950_p5, %p8949_p3 }
 0x1be   : > { %p8947_p2 = pneg %p8946_p1 }
 0x1c0   : > { %p8952_p8 = pnand %p8951_p7, %p8947_p2 }
 0x1c2   : > { %8955 = shalt.err (!%p8952_p8)
}
 0x1c3   : > { %s8956_s18 = scalar_lea.vmem %s885_s6, 16  ;;  %s9057_s23 = smov [#allocation25]  }
 0x1c4   : > { %p8957_p9 = scmp.ne.s32.totalorder %s885_s6, %s8956_s18  ;;  %s8960_s3 = sshll.u32 %s9057_s23, 4  ;;  %s8961_s3 = int_to_ptr.vmem [resolvable:$false] %s8960_s3 }
 0x1c5   : > { %s8962_s28 = scalar_lea.vmem %s8961_s3, 32  ;;  %p8963_p12 = scmp.lt.s32.totalorder %s885_s6, %s8961_s3 }
 0x1c6   : > { %p8958_p10 = pnand %p8957_p9, %p9188_p4  ;;  %p8964_p13 = scmp.lt.s32.totalorder %s8962_s28, %s8956_s18 }
 0x1c8   : > { %p8959_p11 = pneg %p8958_p10  ;;  %p8965_p0 = por %p8964_p13, %p8963_p12 }
 0x1ca   : > { %p8966_p1 = pnand %p8965_p0, %p8959_p11 }
 0x1cc   : > { %8969 = shalt.err (!%p8966_p1)
}
 0x1cd   : > { %7572 = dma.hbm_to_vmem [thread:$0]  (%p9188_p4), %s9648_s16, 16, %s885_s6, %s875_s0  }
 0x1ce PF: > { %p6793_p2 = scmp.ge.s32.totalorder %s9036_s30, 1  ;;  %p889_p3 = scmp.lt.s32.totalorder %s9036_s30, 4 }
 0x1d0   : > { %p890_p5 = pnand %p6793_p2, %p889_p3 }
 0x1d1   : > { %s10612_s27 = sld [smem:[#allocation36_spill]] (!%p890_p5) }
 0x1d2   : > { %893 = sbr.rel (%p890_p5) target bundleno = 2406 (0x966), region = 88 }
 0x1d7   : > { %s9671_s5 = sand.u32 1, %s10612_s27  }
 0x1d8   : > { %s9674_s29 = sshll.u32 %s9671_s5, 8  ;;  %s896_s2 = scalar_lea.sflag [#allocation3], %s9671_s5 }
 0x1d9   : > { %s9678_s22 = scalar_lea.vmem [#allocation2], %s9674_s29 }
 0x1da   : > { %8987 = dma.done.wait (%p9193_p6), %s896_s2, 4096  }
 0x1db   : > { %8989 = vsyncadd (%p9193_p6), %s896_s2, 4294963200  ;;  %s10614_s30 = sld [smem:[#allocation38_spill]]  ;;  %s9688_s25 = sshll.u32 %s9671_s5, 2 }
 0x1dc   : > { %s908_s0 = scalar_lea.vmem [#allocation4], %s9688_s25 }
 0x1e1   : > { %s9685_s16 = sand.u32 1, %s10614_s30  }
 0x1e2   : > { %s905_s6 = scalar_lea.sflag [#allocation5], %s9685_s16 }
 0x1e3   : > { %8991 = dma.done.wait (%p9193_p6), %s905_s6, 16448  }
 0x1e4   : > { %8993 = vsyncadd (%p9193_p6), %s905_s6, 4294950848  ;;  %s6796_s24 = sshll.u32 %s9671_s5, 10  ;;  %s923_s26 = scalar_lea.sflag [#allocation8], %s9685_s16 }
 0x1e5   : > { %s9697_s8 = scalar_lea.vmem [#allocation6], %s6796_s24  ;;  %s926_s4 = scalar_lea.vmem [#allocation7], %s9688_s25 }
 0x1e6   : > { %8995 = dma.done.wait (%p9193_p6), %s923_s26, 16448  }
 0x1e7   : > { %8997 = vsyncadd (%p9193_p6), %s923_s26, 4294950848  ;;  %s9705_s1 = scalar_lea.vmem [#allocation9], %s6796_s24  ;;  %s941_s15 = scalar_lea.sflag [#allocation11], %s9685_s16 }
 0x1e8   : > { %8999 = dma.done.wait (%p9193_p6), %s941_s15, 4160  }
 0x1e9   : > { %9001 = vsyncadd (%p9193_p6), %s941_s15, 4294963136  ;;  %s9714_s23 = scalar_lea.vmem [#allocation12], %s9674_s29  ;;  %s959_s3 = scalar_lea.sflag [#allocation14], %s9685_s16 }
 0x1ea   : > { %9003 = dma.done.wait (%p9193_p6), %s959_s3, 4112  }
 0x1eb   : > { %9005 = vsyncadd (%p9193_p6), %s959_s3, 4294963184  ;;  %s9723_s27 = scalar_lea.vmem [#allocation15], %s9674_s29  ;;  %s976_s2 = scalar_lea.sflag [#allocation17], %s9685_s16 }
 0x1ec   : > { %9007 = dma.done.wait (%p9193_p6), %s976_s2, 16448  }
 0x1ed   : > { %9009 = vsyncadd (%p9193_p6), %s976_s2, 4294950848  ;;  %s9731_s26 = scalar_lea.vmem [#allocation18], %s6796_s24  ;;  %s994_s15 = scalar_lea.sflag [#allocation20], %s9685_s16 }
 0x1ee   : > { %9011 = dma.done.wait (%p9193_p6), %s994_s15, 16448  }
 0x1ef   : > { %9013 = vsyncadd (%p9193_p6), %s994_s15, 4294950848  ;;  %s9739_s6 = scalar_lea.vmem [#allocation21], %s6796_s24  ;;  %s1012_s28 = scalar_lea.sflag [#allocation23], %s9685_s16 }
 0x1f0   : > { %s1015_s18 = scalar_lea.vmem [#allocation22], %s9688_s25 }
 0x1f1   : > { %9015 = dma.done.wait (%p9193_p6), %s1012_s28, 4160  }
 0x1f2   : > { %9017 = vsyncadd (%p9193_p6), %s1012_s28, 4294963136  ;;  %s9748_s2 = scalar_lea.vmem [#allocation24], %s9674_s29  ;;  %s1030_s3 = scalar_lea.sflag [#allocation26], %s9671_s5 }
 0x1f3   : > { %s1032_s15 = scalar_lea.vmem [#allocation25], %s9671_s5 }
 0x1f4   : > { %9019 = dma.done.wait (%p9193_p6), %s1030_s3, 16  }
 0x1f5   : > { %9021 = vsyncadd (%p9193_p6), %s1030_s3, 4294967280  ;;  %v9058_v0 = vmov 0   ;;  %v7626_v1 = vld [vmem:[%s9678_s22 + $0xe4] ss:$16 sps:$4 sm:$0xff]   ;;  %v7628_v2 = vld [vmem:[%s9678_s22 + $0xec] ss:$16 sps:$4 sm:$0xff]  }
 0x1f6   : > { %1425 = vmatprep.mubr.bf16.mxu0 %v9058_v0  ;;  %1466 = vmatprep.mubr.bf16.mxu1 %v9058_v0  ;;  %v7630_v3 = vld [vmem:[%s9678_s22 + $0xe0] ss:$16 sps:$4 sm:$0xff]   ;;  %v7631_v4 = vld [vmem:[%s9678_s22 + $0xe8] ss:$16 sps:$4 sm:$0xff]   ;;  %v7632_v5 = vld [vmem:[%s9678_s22 + $0xc4] ss:$16 sps:$4 sm:$0xff]  }
 0x1f7   : > { %1393 = vmatprep.subr.bf16.mxu0 %v7626_v1  ;;  %1434 = vmatprep.subr.bf16.mxu1 %v7628_v2  ;;  %v7634_v6 = vld [vmem:[%s9678_s22 + $0xcc] ss:$16 sps:$4 sm:$0xff]   ;;  %v7636_v7 = vld [vmem:[%s9678_s22 + $0xc0] ss:$16 sps:$4 sm:$0xff]   ;;  %v7637_v8 = vld [vmem:[%s9678_s22 + $0xc8] ss:$16 sps:$4 sm:$0xff]  }
 0x1f8   : > { %1394 = vmatpush1.bf16.msra.mxu0 %v7630_v3  ;;  %1435 = vmatpush1.bf16.msra.mxu1 %v7631_v4  ;;  %v7638_v9 = vld [vmem:[%s9678_s22 + $0xa4] ss:$16 sps:$4 sm:$0xff]   ;;  %v7640_v10 = vld [vmem:[%s9678_s22 + $0xac] ss:$16 sps:$4 sm:$0xff]   ;;  %v7642_v11 = vld [vmem:[%s9678_s22 + $0xa0] ss:$16 sps:$4 sm:$0xff]  }
 0x1f9   : > { %1395 = vmatprep.subr.bf16.mxu0 %v7632_v5  ;;  %1436 = vmatprep.subr.bf16.mxu1 %v7634_v6  ;;  %v7643_v12 = vld [vmem:[%s9678_s22 + $0xa8] ss:$16 sps:$4 sm:$0xff]   ;;  %v7644_v13 = vld [vmem:[%s9678_s22 + $0x84] ss:$16 sps:$4 sm:$0xff]   ;;  %v7646_v14 = vld [vmem:[%s9678_s22 + $0x8c] ss:$16 sps:$4 sm:$0xff]  }
 0x1fa   : > { %v7648_v15 = vld [vmem:[%s9678_s22 + $0x80] ss:$16 sps:$4 sm:$0xff]   ;;  %v7649_v16 = vld [vmem:[%s9678_s22 + $0x88] ss:$16 sps:$4 sm:$0xff]   ;;  %v7650_v17 = vld [vmem:[%s9678_s22 + $0x64] ss:$16 sps:$4 sm:$0xff]  }
 0x1fb   : > { %v7652_v18 = vld [vmem:[%s9678_s22 + $0x6c] ss:$16 sps:$4 sm:$0xff]   ;;  %v7654_v19 = vld [vmem:[%s9678_s22 + $0x60] ss:$16 sps:$4 sm:$0xff]   ;;  %v7655_v20 = vld [vmem:[%s9678_s22 + $0x68] ss:$16 sps:$4 sm:$0xff]  }
 0x1fc   : > { %1396 = vmatpush1.bf16.msra.mxu0 %v7636_v7  ;;  %1437 = vmatpush1.bf16.msra.mxu1 %v7637_v8  ;;  %v7656_v21 = vld [vmem:[%s9678_s22 + $0x44] ss:$16 sps:$4 sm:$0xff]   ;;  %p1165_p4 = scmp.lt.s32.totalorder %s10614_s30, 2  ;;  %v7658_v22 = vld [vmem:[%s9678_s22 + $0x4c] ss:$16 sps:$4 sm:$0xff]   ;;  %s10615_s24 = sld [smem:[#allocation42_spill]] }
 0x1fd   : > { %1397 = vmatprep.subr.bf16.mxu0 %v7638_v9  ;;  %1438 = vmatprep.subr.bf16.mxu1 %v7640_v10  ;;  %v7660_v23 = vld [vmem:[%s9678_s22 + $0x40] ss:$16 sps:$4 sm:$0xff]   ;;  %v7661_v24 = vld [vmem:[%s9678_s22 + $0x48] ss:$16 sps:$4 sm:$0xff]   ;;  %v7662_v25 = vld [vmem:[%s9678_s22 + $0x24] ss:$16 sps:$4 sm:$0xff]  }
 0x1fe   : > { %s10627_s30 = smov (!%p1165_p4, %s10614_s30), 2  ;;  %v7664_v26 = vld [vmem:[%s9678_s22 + $0x2c] ss:$16 sps:$4 sm:$0xff]   ;;  %v7666_v27 = vld [vmem:[%s9678_s22 + $0x20] ss:$16 sps:$4 sm:$0xff]   ;;  %s10619_s3 = scalar_lea.vmem [#allocation16], %s9688_s25 }
 0x1ff   : > { %v7667_v28 = vld [vmem:[%s9678_s22 + $0x28] ss:$16 sps:$4 sm:$0xff]   ;;  %s6808_s19 = sshll.u32 %s10627_s30, 2  ;;  %v7668_v29 = vld [vmem:[%s9678_s22 + $0x4] ss:$16 sps:$4 sm:$0xff]  }
 0x200   : > { %1398 = vmatpush1.bf16.msra.mxu0 %v7642_v11  ;;  %1439 = vmatpush1.bf16.msra.mxu1 %v7643_v12  ;;  %v7670_v30 = vld [vmem:[%s9678_s22 + $0xc] ss:$16 sps:$4 sm:$0xff]   ;;  %v7672_v31 = vld [vmem:[%s9678_s22] ss:$16 sps:$4 sm:$0xff]   ;;  %v7673_v32 = vld [vmem:[%s9678_s22 + $0x8] ss:$16 sps:$4 sm:$0xff]  }
 0x201   : > { %1399 = vmatprep.subr.bf16.mxu0 %v7644_v13  ;;  %1440 = vmatprep.subr.bf16.mxu1 %v7646_v14  ;;  %v7676_v33 = vld [vmem:[%s9697_s8 + $0xe4] ss:$16 sps:$4 sm:$0xff]   ;;  %v7674_v36 = vld [vmem:[%s9697_s8 + $0xe0] ss:$16 sps:$4 sm:$0xff]   ;;  %s10616_s22 = scalar_lea.vmem [#allocation10], %s9688_s25 }
 0x202   : > { %s1168_s28 = scalar_lea.vmem %s10615_s24, %s6808_s19  ;;  %v7679_v34 = vld [vmem:[%s9697_s8 + $0x2e4] ss:$16 sps:$4 sm:$0xff]   ;;  %v7677_v37 = vld [vmem:[%s9697_s8 + $0x2e0] ss:$16 sps:$4 sm:$0xff]  }
 0x203   : > { %v1178_v35 = vld [vmem:[%s1168_s28] sm:$0xf]  ;;  %v7682_v38 = vld [vmem:[%s9697_s8 + $0xc4] ss:$16 sps:$4 sm:$0xff]   ;;  %v7680_v40 = vld [vmem:[%s9697_s8 + $0xc0] ss:$16 sps:$4 sm:$0xff]  }
 0x204   : > { %1400 = vmatpush1.bf16.msra.mxu0 %v7648_v15  ;;  %1441 = vmatpush1.bf16.msra.mxu1 %v7649_v16  ;;  %v7685_v39 = vld [vmem:[%s9697_s8 + $0x2c4] ss:$16 sps:$4 sm:$0xff]   ;;  %v7683_v41 = vld [vmem:[%s9697_s8 + $0x2c0] ss:$16 sps:$4 sm:$0xff]  }
 0x205   : > { %1401 = vmatprep.subr.bf16.mxu0 %v7650_v17  ;;  %1442 = vmatprep.subr.bf16.mxu1 %v7652_v18  ;;  %v7688_v42 = vld [vmem:[%s9697_s8 + $0xa4] ss:$16 sps:$4 sm:$0xff]   ;;  %v7686_v44 = vld [vmem:[%s9697_s8 + $0xa0] ss:$16 sps:$4 sm:$0xff]  }
 0x206   : > { %v7691_v43 = vld [vmem:[%s9697_s8 + $0x2a4] ss:$16 sps:$4 sm:$0xff]   ;;  %v7689_v45 = vld [vmem:[%s9697_s8 + $0x2a0] ss:$16 sps:$4 sm:$0xff]  }
 0x207   : > { %v7694_v46 = vld [vmem:[%s9697_s8 + $0x84] ss:$16 sps:$4 sm:$0xff]   ;;  %v7692_v48 = vld [vmem:[%s9697_s8 + $0x80] ss:$16 sps:$4 sm:$0xff]  }
 0x208   : > { %1402 = vmatpush1.bf16.msra.mxu0 %v7654_v19  ;;  %1443 = vmatpush1.bf16.msra.mxu1 %v7655_v20  ;;  %v7697_v47 = vld [vmem:[%s9697_s8 + $0x284] ss:$16 sps:$4 sm:$0xff]   ;;  %v7695_v49 = vld [vmem:[%s9697_s8 + $0x280] ss:$16 sps:$4 sm:$0xff]  }
 0x209   : > { %1403 = vmatprep.subr.bf16.mxu0 %v7656_v21  ;;  %1444 = vmatprep.subr.bf16.mxu1 %v7658_v22  ;;  %v7700_v50 = vld [vmem:[%s9697_s8 + $0x64] ss:$16 sps:$4 sm:$0xff]   ;;  %v7698_v52 = vld [vmem:[%s9697_s8 + $0x60] ss:$16 sps:$4 sm:$0xff]  }
 0x20a   : > { %v7703_v51 = vld [vmem:[%s9697_s8 + $0x264] ss:$16 sps:$4 sm:$0xff]   ;;  %v7701_v53 = vld [vmem:[%s9697_s8 + $0x260] ss:$16 sps:$4 sm:$0xff]  }
 0x20b   : > { %v7706_v54 = vld [vmem:[%s9697_s8 + $0x44] ss:$16 sps:$4 sm:$0xff]   ;;  %v7704_v56 = vld [vmem:[%s9697_s8 + $0x40] ss:$16 sps:$4 sm:$0xff]  }
 0x20c   : > { %1404 = vmatpush1.bf16.msra.mxu0 %v7660_v23  ;;  %1445 = vmatpush1.bf16.msra.mxu1 %v7661_v24  ;;  %v7709_v55 = vld [vmem:[%s9697_s8 + $0x244] ss:$16 sps:$4 sm:$0xff]   ;;  %v7707_v57 = vld [vmem:[%s9697_s8 + $0x240] ss:$16 sps:$4 sm:$0xff]  }
 0x20d   : > { %1405 = vmatprep.subr.bf16.mxu0 %v7662_v25  ;;  %1446 = vmatprep.subr.bf16.mxu1 %v7664_v26  ;;  %v7712_v58 = vld [vmem:[%s9697_s8 + $0x24] ss:$16 sps:$4 sm:$0xff]   ;;  %v7710_v60 = vld [vmem:[%s9697_s8 + $0x20] ss:$16 sps:$4 sm:$0xff]  }
 0x20e   : > { %v7715_v59 = vld [vmem:[%s9697_s8 + $0x224] ss:$16 sps:$4 sm:$0xff]   ;;  %v7713_v61 = vld [vmem:[%s9697_s8 + $0x220] ss:$16 sps:$4 sm:$0xff]  }
 0x20f   : > { %v7718_v62 = vld [vmem:[%s9697_s8 + $0x4] ss:$16 sps:$4 sm:$0xff]   ;;  %v7716_v1 = vld [vmem:[%s9697_s8] ss:$16 sps:$4 sm:$0xff]  }
 0x210   : > { %1406 = vmatpush1.bf16.msra.mxu0 %v7666_v27  ;;  %1447 = vmatpush1.bf16.msra.mxu1 %v7667_v28  ;;  %v7721_v63 = vld [vmem:[%s9697_s8 + $0x204] ss:$16 sps:$4 sm:$0xff]   ;;  %v7719_v2 = vld [vmem:[%s9697_s8 + $0x200] ss:$16 sps:$4 sm:$0xff]  }
 0x211   : > { %1407 = vmatprep.subr.bf16.mxu0 %v7668_v29  ;;  %1448 = vmatprep.subr.bf16.mxu1 %v7670_v30  ;;  %v7724_v3 = vld [vmem:[%s9697_s8 + $0x1e4] ss:$16 sps:$4 sm:$0xff]   ;;  %v7722_v5 = vld [vmem:[%s9697_s8 + $0x1e0] ss:$16 sps:$4 sm:$0xff]  }
 0x212   : > { %v7727_v4 = vld [vmem:[%s9697_s8 + $0x3e4] ss:$16 sps:$4 sm:$0xff]   ;;  %v7725_v6 = vld [vmem:[%s9697_s8 + $0x3e0] ss:$16 sps:$4 sm:$0xff]  }
 0x213   : > { %v7730_v7 = vld [vmem:[%s9697_s8 + $0x1c4] ss:$16 sps:$4 sm:$0xff]   ;;  %v7728_v9 = vld [vmem:[%s9697_s8 + $0x1c0] ss:$16 sps:$4 sm:$0xff]  }
 0x214   : > { %1408 = vmatpush1.bf16.msra.mxu0 %v7672_v31  ;;  %1449 = vmatpush1.bf16.msra.mxu1 %v7673_v32  ;;  %v7733_v8 = vld [vmem:[%s9697_s8 + $0x3c4] ss:$16 sps:$4 sm:$0xff]   ;;  %v7731_v10 = vld [vmem:[%s9697_s8 + $0x3c0] ss:$16 sps:$4 sm:$0xff]  }
 0x215   : > { %2273 = vmatprep.subr.bf16.mxu0 %v7676_v33  ;;  %2314 = vmatprep.subr.bf16.mxu1 %v7679_v34  ;;  %v7736_v11 = vld [vmem:[%s9697_s8 + $0x1a4] ss:$16 sps:$4 sm:$0xff]   ;;  %v7734_v13 = vld [vmem:[%s9697_s8 + $0x1a0] ss:$16 sps:$4 sm:$0xff]  }
 0x216   : > { %v7739_v12 = vld [vmem:[%s9697_s8 + $0x3a4] ss:$16 sps:$4 sm:$0xff]   ;;  %v7737_v14 = vld [vmem:[%s9697_s8 + $0x3a0] ss:$16 sps:$4 sm:$0xff]  }
 0x217   : > { %1426 = vmatmul.mubr.bf16.vlgmr.msra.gmra.mxu0 %v1178_v35  ;;  %1467 = vmatmul.mubr.bf16.vlgmr.msra.gmra.mxu1 %v1178_v35  ;;  %v7742_v15 = vld [vmem:[%s9697_s8 + $0x184] ss:$16 sps:$4 sm:$0xff]   ;;  %v7740_v17 = vld [vmem:[%s9697_s8 + $0x180] ss:$16 sps:$4 sm:$0xff]   ;;  %v7772_v35 = vld [vmem:[%s9697_s8 + $0xec] ss:$16 sps:$4 sm:$0xff]  }
 0x218   : > { %2274 = vmatpush1.bf16.msra.mxu0 %v7674_v36  ;;  %2315 = vmatpush1.bf16.msra.mxu1 %v7677_v37  ;;  %v7745_v16 = vld [vmem:[%s9697_s8 + $0x384] ss:$16 sps:$4 sm:$0xff]   ;;  %v7743_v18 = vld [vmem:[%s9697_s8 + $0x380] ss:$16 sps:$4 sm:$0xff]   ;;  %v7775_v36 = vld [vmem:[%s9697_s8 + $0x2ec] ss:$16 sps:$4 sm:$0xff]   ;;  %v1213_v37 = vlaneseq }
 0x219   : > { %2275 = vmatprep.subr.bf16.mxu0 %v7682_v38  ;;  %2316 = vmatprep.subr.bf16.mxu1 %v7685_v39  ;;  %v7748_v19 = vld [vmem:[%s9697_s8 + $0x164] ss:$16 sps:$4 sm:$0xff]   ;;  %v7746_v21 = vld [vmem:[%s9697_s8 + $0x160] ss:$16 sps:$4 sm:$0xff]   ;;  %v1211_v39 = vld [vmem:[%s908_s0] sm:$0xf] }
 0x21a   : > { %v7751_v20 = vld [vmem:[%s9697_s8 + $0x364] ss:$16 sps:$4 sm:$0xff]   ;;  %v7749_v22 = vld [vmem:[%s9697_s8 + $0x360] ss:$16 sps:$4 sm:$0xff]   ;;  %v1214_v38 = vshrl.u32 %v1213_v37, 7  ;;  %s10617_s0 = scalar_lea.vmem [#allocation13], %s9671_s5 }
 0x21b   : > { %v7754_v23 = vld [vmem:[%s9697_s8 + $0x144] ss:$16 sps:$4 sm:$0xff]   ;;  %v7752_v25 = vld [vmem:[%s9697_s8 + $0x140] ss:$16 sps:$4 sm:$0xff]   ;;  %v7818_v37 = vld [vmem:[%s9697_s8 + $0x1e8] ss:$16 sps:$4 sm:$0xff]  }
 0x21c   : > { %2276 = vmatpush1.bf16.msra.mxu0 %v7680_v40  ;;  %2317 = vmatpush1.bf16.msra.mxu1 %v7683_v41  ;;  %v7757_v24 = vld [vmem:[%s9697_s8 + $0x344] ss:$16 sps:$4 sm:$0xff]   ;;  %v7755_v26 = vld [vmem:[%s9697_s8 + $0x340] ss:$16 sps:$4 sm:$0xff]   ;;  %v9866_v40 = vsub.s32 0, %v1214_v38  ;;  %v9868_v41 = vsub.s32 2, %v1214_v38 }
 0x21d   : > { %2277 = vmatprep.subr.bf16.mxu0 %v7688_v42  ;;  %2318 = vmatprep.subr.bf16.mxu1 %v7691_v43  ;;  %v7760_v27 = vld [vmem:[%s9697_s8 + $0x124] ss:$16 sps:$4 sm:$0xff]   ;;  %v7758_v29 = vld [vmem:[%s9697_s8 + $0x120] ss:$16 sps:$4 sm:$0xff]   ;;  %v9870_v42 = vsub.s32 1, %v1214_v38  ;;  %v9872_v43 = vsub.s32 3, %v1214_v38 }
 0x21e   : > { %v7763_v28 = vld [vmem:[%s9697_s8 + $0x324] ss:$16 sps:$4 sm:$0xff]   ;;  %v7761_v30 = vld [vmem:[%s9697_s8 + $0x320] ss:$16 sps:$4 sm:$0xff]   ;;  %v7821_v38 = vld [vmem:[%s9697_s8 + $0x3e8] ss:$16 sps:$4 sm:$0xff]  }
 0x21f   : > { %v7766_v31 = vld [vmem:[%s9697_s8 + $0x104] ss:$16 sps:$4 sm:$0xff]   ;;  %v7764_v33 = vld [vmem:[%s9697_s8 + $0x100] ss:$16 sps:$4 sm:$0xff]  }
 0x220   : > { %2278 = vmatpush1.bf16.msra.mxu0 %v7686_v44  ;;  %2319 = vmatpush1.bf16.msra.mxu1 %v7689_v45  ;;  %v7769_v32 = vld [vmem:[%s9697_s8 + $0x304] ss:$16 sps:$4 sm:$0xff]   ;;  %v7767_v34 = vld [vmem:[%s9697_s8 + $0x300] ss:$16 sps:$4 sm:$0xff]   ;;  %v1216_v44 = vrot.slane %v1211_v39, %v9866_v40  ;;  %v1224_v45 = vrot.slane %v1211_v39, %v9868_v41 }
 0x221   : > { %2279 = vmatprep.subr.bf16.mxu0 %v7694_v46  ;;  %2320 = vmatprep.subr.bf16.mxu1 %v7697_v47  ;;  %v1220_v46 = vrot.slane %v1211_v39, %v9870_v42  ;;  %v1228_v47 = vrot.slane %v1211_v39, %v9872_v43  ;;  %v7826_v39 = vld [vmem:[%s9697_s8 + $0x1cc] ss:$16 sps:$4 sm:$0xff]  }
 0x224   : > { %2280 = vmatpush1.bf16.msra.mxu0 %v7692_v48  ;;  %2321 = vmatpush1.bf16.msra.mxu1 %v7695_v49 }
 0x225   : > { %2281 = vmatprep.subr.bf16.mxu0 %v7700_v50  ;;  %2322 = vmatprep.subr.bf16.mxu1 %v7703_v51 }
 0x228   : > { %2282 = vmatpush1.bf16.msra.mxu0 %v7698_v52  ;;  %2323 = vmatpush1.bf16.msra.mxu1 %v7701_v53 }
 0x229   : > { %2283 = vmatprep.subr.bf16.mxu0 %v7706_v54  ;;  %2324 = vmatprep.subr.bf16.mxu1 %v7709_v55 }
 0x22c   : > { %2284 = vmatpush1.bf16.msra.mxu0 %v7704_v56  ;;  %2325 = vmatpush1.bf16.msra.mxu1 %v7707_v57 }
 0x22d   : > { %2285 = vmatprep.subr.bf16.mxu0 %v7712_v58  ;;  %2326 = vmatprep.subr.bf16.mxu1 %v7715_v59 }
 0x230   : > { %2286 = vmatpush1.bf16.msra.mxu0 %v7710_v60  ;;  %2327 = vmatpush1.bf16.msra.mxu1 %v7713_v61 }
 0x231   : > { %2287 = vmatprep.subr.bf16.mxu0 %v7718_v62  ;;  %2328 = vmatprep.subr.bf16.mxu1 %v7721_v63  ;;  %v7770_v62 = vld [vmem:[%s9697_s8 + $0xe8] ss:$16 sps:$4 sm:$0xff]  }
 0x232   : > { %v7773_v63 = vld [vmem:[%s9697_s8 + $0x2e8] ss:$16 sps:$4 sm:$0xff]  }
 0x234   : > { %2288 = vmatpush1.bf16.msra.mxu0 %v7716_v1  ;;  %2329 = vmatpush1.bf16.msra.mxu1 %v7719_v2 }
 0x235   : > { %2289 = vmatprep.subr.bf16.mxu0 %v7724_v3  ;;  %2330 = vmatprep.subr.bf16.mxu1 %v7727_v4 }
 0x238   : > { %2290 = vmatpush2.bf16.msra.mxu0 %v7722_v5  ;;  %2331 = vmatpush2.bf16.msra.mxu1 %v7725_v6  ;;  %v7778_v6 = vld [vmem:[%s9697_s8 + $0xcc] ss:$16 sps:$4 sm:$0xff]  }
 0x239   : > { %2291 = vmatprep.subr.bf16.mxu0 %v7730_v7  ;;  %2332 = vmatprep.subr.bf16.mxu1 %v7733_v8  ;;  %v7781_v7 = vld [vmem:[%s9697_s8 + $0x2cc] ss:$16 sps:$4 sm:$0xff]  }
 0x23c   : > { %2292 = vmatpush2.bf16.msra.mxu0 %v7728_v9  ;;  %2333 = vmatpush2.bf16.msra.mxu1 %v7731_v10  ;;  %v7776_v9 = vld [vmem:[%s9697_s8 + $0xc8] ss:$16 sps:$4 sm:$0xff]  }
 0x23d   : > { %2293 = vmatprep.subr.bf16.mxu0 %v7736_v11  ;;  %2334 = vmatprep.subr.bf16.mxu1 %v7739_v12  ;;  %v7779_v10 = vld [vmem:[%s9697_s8 + $0x2c8] ss:$16 sps:$4 sm:$0xff]   ;;  %v7784_v11 = vld [vmem:[%s9697_s8 + $0xac] ss:$16 sps:$4 sm:$0xff]  }
 0x23e   : > { %v7787_v12 = vld [vmem:[%s9697_s8 + $0x2ac] ss:$16 sps:$4 sm:$0xff]  }
 0x240   : > { %2294 = vmatpush2.bf16.msra.mxu0 %v7734_v13  ;;  %2335 = vmatpush2.bf16.msra.mxu1 %v7737_v14  ;;  %v7782_v13 = vld [vmem:[%s9697_s8 + $0xa8] ss:$16 sps:$4 sm:$0xff]  }
 0x241   : > { %2295 = vmatprep.subr.bf16.mxu0 %v7742_v15  ;;  %2336 = vmatprep.subr.bf16.mxu1 %v7745_v16  ;;  %v7785_v14 = vld [vmem:[%s9697_s8 + $0x2a8] ss:$16 sps:$4 sm:$0xff]   ;;  %v7790_v15 = vld [vmem:[%s9697_s8 + $0x8c] ss:$16 sps:$4 sm:$0xff]  }
 0x242   : > { %v7793_v16 = vld [vmem:[%s9697_s8 + $0x28c] ss:$16 sps:$4 sm:$0xff]  }
 0x244   : > { %2296 = vmatpush2.bf16.msra.mxu0 %v7740_v17  ;;  %2337 = vmatpush2.bf16.msra.mxu1 %v7743_v18  ;;  %v7788_v17 = vld [vmem:[%s9697_s8 + $0x88] ss:$16 sps:$4 sm:$0xff]  }
 0x245   : > { %2297 = vmatprep.subr.bf16.mxu0 %v7748_v19  ;;  %2338 = vmatprep.subr.bf16.mxu1 %v7751_v20  ;;  %v7791_v18 = vld [vmem:[%s9697_s8 + $0x288] ss:$16 sps:$4 sm:$0xff]   ;;  %v7796_v19 = vld [vmem:[%s9697_s8 + $0x6c] ss:$16 sps:$4 sm:$0xff]  }
 0x246   : > { %v7799_v20 = vld [vmem:[%s9697_s8 + $0x26c] ss:$16 sps:$4 sm:$0xff]  }
 0x248   : > { %2298 = vmatpush2.bf16.msra.mxu0 %v7746_v21  ;;  %2339 = vmatpush2.bf16.msra.mxu1 %v7749_v22  ;;  %v7794_v21 = vld [vmem:[%s9697_s8 + $0x68] ss:$16 sps:$4 sm:$0xff]  }
 0x249   : > { %2299 = vmatprep.subr.bf16.mxu0 %v7754_v23  ;;  %2340 = vmatprep.subr.bf16.mxu1 %v7757_v24  ;;  %v7797_v22 = vld [vmem:[%s9697_s8 + $0x268] ss:$16 sps:$4 sm:$0xff]   ;;  %v7802_v23 = vld [vmem:[%s9697_s8 + $0x4c] ss:$16 sps:$4 sm:$0xff]  }
 0x24a   : > { %v7805_v24 = vld [vmem:[%s9697_s8 + $0x24c] ss:$16 sps:$4 sm:$0xff]  }
 0x24c   : > { %2300 = vmatpush2.bf16.msra.mxu0 %v7752_v25  ;;  %2341 = vmatpush2.bf16.msra.mxu1 %v7755_v26  ;;  %v7800_v25 = vld [vmem:[%s9697_s8 + $0x48] ss:$16 sps:$4 sm:$0xff]  }
 0x24d   : > { %2301 = vmatprep.subr.bf16.mxu0 %v7760_v27  ;;  %2342 = vmatprep.subr.bf16.mxu1 %v7763_v28  ;;  %v7803_v26 = vld [vmem:[%s9697_s8 + $0x248] ss:$16 sps:$4 sm:$0xff]   ;;  %v7808_v27 = vld [vmem:[%s9697_s8 + $0x2c] ss:$16 sps:$4 sm:$0xff]  }
 0x24e   : > { %v7811_v28 = vld [vmem:[%s9697_s8 + $0x22c] ss:$16 sps:$4 sm:$0xff]  }
 0x250   : > { %2302 = vmatpush2.bf16.msra.mxu0 %v7758_v29  ;;  %2343 = vmatpush2.bf16.msra.mxu1 %v7761_v30  ;;  %v7806_v29 = vld [vmem:[%s9697_s8 + $0x28] ss:$16 sps:$4 sm:$0xff]  }
 0x251   : > { %2303 = vmatprep.subr.bf16.mxu0 %v7766_v31  ;;  %2344 = vmatprep.subr.bf16.mxu1 %v7769_v32  ;;  %v7809_v30 = vld [vmem:[%s9697_s8 + $0x228] ss:$16 sps:$4 sm:$0xff]   ;;  %v7814_v31 = vld [vmem:[%s9697_s8 + $0xc] ss:$16 sps:$4 sm:$0xff]  }
 0x252   : > { %v7817_v32 = vld [vmem:[%s9697_s8 + $0x20c] ss:$16 sps:$4 sm:$0xff]  }
 0x254   : > { %2304 = vmatpush2.bf16.msra.mxu0 %v7764_v33  ;;  %2345 = vmatpush2.bf16.msra.mxu1 %v7767_v34  ;;  %v7812_v33 = vld [vmem:[%s9697_s8 + $0x8] ss:$16 sps:$4 sm:$0xff]  }
 0x255   : > { %2355 = vmatprep.subr.bf16.mxu0 %v7772_v35  ;;  %2396 = vmatprep.subr.bf16.mxu1 %v7775_v36  ;;  %v7815_v34 = vld [vmem:[%s9697_s8 + $0x208] ss:$16 sps:$4 sm:$0xff]   ;;  %v7820_v35 = vld [vmem:[%s9697_s8 + $0x1ec] ss:$16 sps:$4 sm:$0xff]  }
 0x256   : > { %v7823_v36 = vld [vmem:[%s9697_s8 + $0x3ec] ss:$16 sps:$4 sm:$0xff]  }
 0x2d7   : > { %v1427_v48 = vpop.f32.mrf.mxu0  ;;  %v1468_v49 = vpop.f32.mrf.mxu1 }
 0x2d8   : > { %v1428_v50 = vadd.f32 %v1427_v48, %v1216_v44  ;;  %v1469_v51 = vadd.f32 %v1468_v49, %v1224_v45  ;;  %v7829_v44 = vld [vmem:[%s9697_s8 + $0x3cc] ss:$16 sps:$4 sm:$0xff]   ;;  %v7824_v45 = vld [vmem:[%s9697_s8 + $0x1c8] ss:$16 sps:$4 sm:$0xff]  }
 0x2d9   : > { %v1429_v52 = vpop.f32.mrf.mxu0  ;;  %v1470_v53 = vpop.f32.mrf.mxu1  ;;  %v7835_v48 = vld [vmem:[%s9697_s8 + $0x3ac] ss:$16 sps:$4 sm:$0xff]   ;;  %v7830_v49 = vld [vmem:[%s9697_s8 + $0x1a8] ss:$16 sps:$4 sm:$0xff]  }
 0x2da   : > { %v1477_v54 = vmax.f32 %v1469_v51, 0.0  ;;  %v1430_v55 = vadd.f32 %v1429_v52, %v1220_v46  ;;  %v1471_v56 = vadd.f32 %v1470_v53, %v1228_v47  ;;  %v1475_v57 = vmax.f32 %v1428_v50, 0.0  ;;  %v7827_v46 = vld [vmem:[%s9697_s8 + $0x3c8] ss:$16 sps:$4 sm:$0xff]   ;;  %v7832_v47 = vld [vmem:[%s9697_s8 + $0x1ac] ss:$16 sps:$4 sm:$0xff]  }
 0x2db   : > { %v1431_v58 = vpop.f32.mrf.mxu0  ;;  %v1472_v59 = vpop.f32.mrf.mxu1  ;;  %v7833_v50 = vld [vmem:[%s9697_s8 + $0x3a8] ss:$16 sps:$4 sm:$0xff]   ;;  %v7838_v51 = vld [vmem:[%s9697_s8 + $0x18c] ss:$16 sps:$4 sm:$0xff]  }
 0x2dc   : > { %v1476_v60 = vmax.f32 %v1430_v55, 0.0  ;;  %v1478_v61 = vmax.f32 %v1471_v56, 0.0  ;;  %v9880_v1 = vpack.c.bf16 %v1477_v54, %v1477_v54  ;;  %v9884_v8 = vpack.c.bf16 %v1475_v57, %v1475_v57  ;;  %v7841_v52 = vld [vmem:[%s9697_s8 + $0x38c] ss:$16 sps:$4 sm:$0xff]   ;;  %v7836_v53 = vld [vmem:[%s9697_s8 + $0x188] ss:$16 sps:$4 sm:$0xff]  }
 0x2dd   : > { %v1432_v2 = vpop.f32.mrf.mxu0  ;;  %v1473_v3 = vpop.f32.mrf.mxu1  ;;  %v7839_v54 = vld [vmem:[%s9697_s8 + $0x388] ss:$16 sps:$4 sm:$0xff]   ;;  %v7844_v55 = vld [vmem:[%s9697_s8 + $0x16c] ss:$16 sps:$4 sm:$0xff]  }
 0x2de   : > { %v1480_v4 = vpack.c.bf16 %v1476_v60, %v1476_v60  ;;  %v1482_v5 = vpack.c.bf16 %v1478_v61, %v1478_v61  ;;  %v7847_v56 = vld [vmem:[%s9697_s8 + $0x36c] ss:$16 sps:$4 sm:$0xff]   ;;  %v7842_v57 = vld [vmem:[%s9697_s8 + $0x168] ss:$16 sps:$4 sm:$0xff]  }
 0x2df   : > { %v7845_v58 = vld [vmem:[%s9697_s8 + $0x368] ss:$16 sps:$4 sm:$0xff]   ;;  %v7850_v59 = vld [vmem:[%s9697_s8 + $0x14c] ss:$16 sps:$4 sm:$0xff]  }
 0x2e0   : > { %2305 = vmatprep.mubr.bf16.mxu0 %v1480_v4  ;;  %2346 = vmatprep.mubr.bf16.mxu1 %v1482_v5  ;;  %v7853_v60 = vld [vmem:[%s9697_s8 + $0x34c] ss:$16 sps:$4 sm:$0xff]   ;;  %v7848_v61 = vld [vmem:[%s9697_s8 + $0x148] ss:$16 sps:$4 sm:$0xff]  }
 0x2e1   : > { %2306 = vmatmul.mubr.bf16.vlgmr.msra.gmra.mxu0 %v9884_v8  ;;  %2347 = vmatmul.mubr.bf16.vlgmr.msra.gmra.mxu1 %v9880_v1  ;;  %v7859_v2 = vld [vmem:[%s9697_s8 + $0x32c] ss:$16 sps:$4 sm:$0xff]   ;;  %v7854_v3 = vld [vmem:[%s9697_s8 + $0x128] ss:$16 sps:$4 sm:$0xff]  }
 0x2e2   : > { %2356 = vmatpush1.bf16.msra.mxu0 %v7770_v62  ;;  %2397 = vmatpush1.bf16.msra.mxu1 %v7773_v63  ;;  %v7851_v62 = vld [vmem:[%s9697_s8 + $0x348] ss:$16 sps:$4 sm:$0xff]   ;;  %v7856_v63 = vld [vmem:[%s9697_s8 + $0x12c] ss:$16 sps:$4 sm:$0xff]  }
 0x2e3   : > { %2387 = vmatprep.mubr.bf16.mxu0 %v1480_v4  ;;  %2428 = vmatprep.mubr.bf16.mxu1 %v1482_v5  ;;  %v7857_v4 = vld [vmem:[%s9697_s8 + $0x328] ss:$16 sps:$4 sm:$0xff]   ;;  %v7862_v5 = vld [vmem:[%s9697_s8 + $0x10c] ss:$16 sps:$4 sm:$0xff]  }
 0x2e4   : > { %2357 = vmatprep.subr.bf16.mxu0 %v7778_v6  ;;  %2398 = vmatprep.subr.bf16.mxu1 %v7781_v7  ;;  %v7865_v6 = vld [vmem:[%s9697_s8 + $0x30c] ss:$16 sps:$4 sm:$0xff]   ;;  %v7860_v7 = vld [vmem:[%s9697_s8 + $0x108] ss:$16 sps:$4 sm:$0xff]  }
 0x2e6   : > { %2358 = vmatpush1.bf16.msra.mxu0 %v7776_v9  ;;  %2399 = vmatpush1.bf16.msra.mxu1 %v7779_v10  ;;  %v7863_v9 = vld [vmem:[%s9697_s8 + $0x308] ss:$16 sps:$4 sm:$0xff]   ;;  %v7868_v10 = vld [vmem:[%s9705_s1 + $0xe4] ss:$16 sps:$4 sm:$0xff]   ;;  %s6809_s8 = sshll.u32 %s10627_s30, 3 }
 0x2e7   : > { %2359 = vmatprep.subr.bf16.mxu0 %v7784_v11  ;;  %2400 = vmatprep.subr.bf16.mxu1 %v7787_v12  ;;  %v7866_v11 = vld [vmem:[%s9705_s1 + $0xe0] ss:$16 sps:$4 sm:$0xff]   ;;  %v7871_v12 = vld [vmem:[%s9705_s1 + $0xc4] ss:$16 sps:$4 sm:$0xff]  }
 0x2ea   : > { %2360 = vmatpush1.bf16.msra.mxu0 %v7782_v13  ;;  %2401 = vmatpush1.bf16.msra.mxu1 %v7785_v14  ;;  %v7869_v13 = vld [vmem:[%s9705_s1 + $0xc0] ss:$16 sps:$4 sm:$0xff]   ;;  %v7874_v14 = vld [vmem:[%s9705_s1 + $0xa4] ss:$16 sps:$4 sm:$0xff]  }
 0x2eb   : > { %2361 = vmatprep.subr.bf16.mxu0 %v7790_v15  ;;  %2402 = vmatprep.subr.bf16.mxu1 %v7793_v16  ;;  %v7872_v15 = vld [vmem:[%s9705_s1 + $0xa0] ss:$16 sps:$4 sm:$0xff]   ;;  %v7877_v16 = vld [vmem:[%s9705_s1 + $0x84] ss:$16 sps:$4 sm:$0xff]  }
 0x2ee   : > { %2362 = vmatpush1.bf16.msra.mxu0 %v7788_v17  ;;  %2403 = vmatpush1.bf16.msra.mxu1 %v7791_v18  ;;  %v7875_v17 = vld [vmem:[%s9705_s1 + $0x80] ss:$16 sps:$4 sm:$0xff]  }
 0x2ef   : > { %2363 = vmatprep.subr.bf16.mxu0 %v7796_v19  ;;  %2404 = vmatprep.subr.bf16.mxu1 %v7799_v20  ;;  %v7914_v18 = vld [vmem:[%s9705_s1 + $0x2e0] ss:$16 sps:$4 sm:$0xff]  }
 0x2f0   : > { %v7878_v19 = vld [vmem:[%s9705_s1 + $0x60] ss:$16 sps:$4 sm:$0xff]  }
 0x2f1   : > { %v7920_v20 = vld [vmem:[%s9705_s1 + $0x2c0] ss:$16 sps:$4 sm:$0xff]  }
 0x2f2   : > { %2364 = vmatpush1.bf16.msra.mxu0 %v7794_v21  ;;  %2405 = vmatpush1.bf16.msra.mxu1 %v7797_v22  ;;  %v7922_v21 = vld [vmem:[%s9705_s1 + $0x2c4] ss:$16 sps:$4 sm:$0xff]  }
 0x2f3   : > { %2365 = vmatprep.subr.bf16.mxu0 %v7802_v23  ;;  %2406 = vmatprep.subr.bf16.mxu1 %v7805_v24  ;;  %v7883_v22 = vld [vmem:[%s9705_s1 + $0x44] ss:$16 sps:$4 sm:$0xff]   ;;  %v7881_v23 = vld [vmem:[%s9705_s1 + $0x40] ss:$16 sps:$4 sm:$0xff]  }
 0x2f4   : > { %v7926_v24 = vld [vmem:[%s9705_s1 + $0x2a0] ss:$16 sps:$4 sm:$0xff]  }
 0x2f6   : > { %2366 = vmatpush1.bf16.msra.mxu0 %v7800_v25  ;;  %2407 = vmatpush1.bf16.msra.mxu1 %v7803_v26  ;;  %v7928_v25 = vld [vmem:[%s9705_s1 + $0x2a4] ss:$16 sps:$4 sm:$0xff]  }
 0x2f7   : > { %2367 = vmatprep.subr.bf16.mxu0 %v7808_v27  ;;  %2408 = vmatprep.subr.bf16.mxu1 %v7811_v28  ;;  %v7886_v26 = vld [vmem:[%s9705_s1 + $0x24] ss:$16 sps:$4 sm:$0xff]   ;;  %v7884_v27 = vld [vmem:[%s9705_s1 + $0x20] ss:$16 sps:$4 sm:$0xff]  }
 0x2f8   : > { %v7932_v28 = vld [vmem:[%s9705_s1 + $0x280] ss:$16 sps:$4 sm:$0xff]  }
 0x2fa   : > { %2368 = vmatpush1.bf16.msra.mxu0 %v7806_v29  ;;  %2409 = vmatpush1.bf16.msra.mxu1 %v7809_v30  ;;  %v7934_v29 = vld [vmem:[%s9705_s1 + $0x284] ss:$16 sps:$4 sm:$0xff]  }
 0x2fb   : > { %2369 = vmatprep.subr.bf16.mxu0 %v7814_v31  ;;  %2410 = vmatprep.subr.bf16.mxu1 %v7817_v32  ;;  %v7889_v30 = vld [vmem:[%s9705_s1 + $0x4] ss:$16 sps:$4 sm:$0xff]   ;;  %v7887_v31 = vld [vmem:[%s9705_s1] ss:$16 sps:$4 sm:$0xff]  }
 0x2fc   : > { %v7938_v32 = vld [vmem:[%s9705_s1 + $0x260] ss:$16 sps:$4 sm:$0xff]  }
 0x2fe   : > { %2370 = vmatpush1.bf16.msra.mxu0 %v7812_v33  ;;  %2411 = vmatpush1.bf16.msra.mxu1 %v7815_v34  ;;  %v7940_v33 = vld [vmem:[%s9705_s1 + $0x264] ss:$16 sps:$4 sm:$0xff]  }
 0x2ff   : > { %2371 = vmatprep.subr.bf16.mxu0 %v7820_v35  ;;  %2412 = vmatprep.subr.bf16.mxu1 %v7823_v36  ;;  %v7892_v34 = vld [vmem:[%s9705_s1 + $0x1e4] ss:$16 sps:$4 sm:$0xff]   ;;  %v7890_v35 = vld [vmem:[%s9705_s1 + $0x1e0] ss:$16 sps:$4 sm:$0xff]  }
 0x300   : > { %v7944_v36 = vld [vmem:[%s9705_s1 + $0x240] ss:$16 sps:$4 sm:$0xff]  }
 0x302   : > { %2372 = vmatpush2.bf16.msra.mxu0 %v7818_v37  ;;  %2413 = vmatpush2.bf16.msra.mxu1 %v7821_v38  ;;  %v7946_v37 = vld [vmem:[%s9705_s1 + $0x244] ss:$16 sps:$4 sm:$0xff]  }
 0x303   : > { %2373 = vmatprep.subr.bf16.mxu0 %v7826_v39  ;;  %2414 = vmatprep.subr.bf16.mxu1 %v7829_v44  ;;  %v7895_v38 = vld [vmem:[%s9705_s1 + $0x1c4] ss:$16 sps:$4 sm:$0xff]   ;;  %v7893_v39 = vld [vmem:[%s9705_s1 + $0x1c0] ss:$16 sps:$4 sm:$0xff]  }
 0x304   : > { %v7950_v44 = vld [vmem:[%s9705_s1 + $0x220] ss:$16 sps:$4 sm:$0xff]  }
 0x306   : > { %2374 = vmatpush2.bf16.msra.mxu0 %v7824_v45  ;;  %2415 = vmatpush2.bf16.msra.mxu1 %v7827_v46  ;;  %v7952_v45 = vld [vmem:[%s9705_s1 + $0x224] ss:$16 sps:$4 sm:$0xff]  }
 0x307   : > { %2375 = vmatprep.subr.bf16.mxu0 %v7832_v47  ;;  %2416 = vmatprep.subr.bf16.mxu1 %v7835_v48  ;;  %v7898_v46 = vld [vmem:[%s9705_s1 + $0x1a4] ss:$16 sps:$4 sm:$0xff]   ;;  %v7896_v47 = vld [vmem:[%s9705_s1 + $0x1a0] ss:$16 sps:$4 sm:$0xff]  }
 0x308   : > { %v7956_v48 = vld [vmem:[%s9705_s1 + $0x200] ss:$16 sps:$4 sm:$0xff]  }
 0x30a   : > { %2376 = vmatpush2.bf16.msra.mxu0 %v7830_v49  ;;  %2417 = vmatpush2.bf16.msra.mxu1 %v7833_v50  ;;  %v7958_v49 = vld [vmem:[%s9705_s1 + $0x204] ss:$16 sps:$4 sm:$0xff]  }
 0x30b   : > { %2377 = vmatprep.subr.bf16.mxu0 %v7838_v51  ;;  %2418 = vmatprep.subr.bf16.mxu1 %v7841_v52  ;;  %v7901_v50 = vld [vmem:[%s9705_s1 + $0x184] ss:$16 sps:$4 sm:$0xff]   ;;  %v7899_v51 = vld [vmem:[%s9705_s1 + $0x180] ss:$16 sps:$4 sm:$0xff]  }
 0x30c   : > { %v7962_v52 = vld [vmem:[%s9705_s1 + $0x3e0] ss:$16 sps:$4 sm:$0xff]  }
 0x30e   : > { %2378 = vmatpush2.bf16.msra.mxu0 %v7836_v53  ;;  %2419 = vmatpush2.bf16.msra.mxu1 %v7839_v54  ;;  %v7964_v53 = vld [vmem:[%s9705_s1 + $0x3e4] ss:$16 sps:$4 sm:$0xff]  }
 0x30f   : > { %2379 = vmatprep.subr.bf16.mxu0 %v7844_v55  ;;  %2420 = vmatprep.subr.bf16.mxu1 %v7847_v56  ;;  %v7904_v54 = vld [vmem:[%s9705_s1 + $0x164] ss:$16 sps:$4 sm:$0xff]   ;;  %v7902_v55 = vld [vmem:[%s9705_s1 + $0x160] ss:$16 sps:$4 sm:$0xff]  }
 0x310   : > { %v7968_v56 = vld [vmem:[%s9705_s1 + $0x3c0] ss:$16 sps:$4 sm:$0xff]  }
 0x312   : > { %2380 = vmatpush2.bf16.msra.mxu0 %v7842_v57  ;;  %2421 = vmatpush2.bf16.msra.mxu1 %v7845_v58  ;;  %v7970_v57 = vld [vmem:[%s9705_s1 + $0x3c4] ss:$16 sps:$4 sm:$0xff]  }
 0x313   : > { %2381 = vmatprep.subr.bf16.mxu0 %v7850_v59  ;;  %2422 = vmatprep.subr.bf16.mxu1 %v7853_v60  ;;  %v7907_v58 = vld [vmem:[%s9705_s1 + $0x144] ss:$16 sps:$4 sm:$0xff]   ;;  %v7905_v59 = vld [vmem:[%s9705_s1 + $0x140] ss:$16 sps:$4 sm:$0xff]  }
 0x314   : > { %v7974_v60 = vld [vmem:[%s9705_s1 + $0x3a0] ss:$16 sps:$4 sm:$0xff]  }
 0x316   : > { %2382 = vmatpush2.bf16.msra.mxu0 %v7848_v61  ;;  %2423 = vmatpush2.bf16.msra.mxu1 %v7851_v62  ;;  %v7976_v61 = vld [vmem:[%s9705_s1 + $0x3a4] ss:$16 sps:$4 sm:$0xff]  }
 0x317   : > { %2383 = vmatprep.subr.bf16.mxu0 %v7856_v63  ;;  %2424 = vmatprep.subr.bf16.mxu1 %v7859_v2  ;;  %v7910_v62 = vld [vmem:[%s9705_s1 + $0x124] ss:$16 sps:$4 sm:$0xff]   ;;  %v7908_v63 = vld [vmem:[%s9705_s1 + $0x120] ss:$16 sps:$4 sm:$0xff]  }
 0x318   : > { %v7980_v2 = vld [vmem:[%s9705_s1 + $0x380] ss:$16 sps:$4 sm:$0xff]  }
 0x31a   : > { %2384 = vmatpush2.bf16.msra.mxu0 %v7854_v3  ;;  %2425 = vmatpush2.bf16.msra.mxu1 %v7857_v4  ;;  %v7982_v3 = vld [vmem:[%s9705_s1 + $0x384] ss:$16 sps:$4 sm:$0xff]  }
 0x31b   : > { %2385 = vmatprep.subr.bf16.mxu0 %v7862_v5  ;;  %2426 = vmatprep.subr.bf16.mxu1 %v7865_v6  ;;  %v7913_v4 = vld [vmem:[%s9705_s1 + $0x104] ss:$16 sps:$4 sm:$0xff]   ;;  %v7911_v5 = vld [vmem:[%s9705_s1 + $0x100] ss:$16 sps:$4 sm:$0xff]  }
 0x31c   : > { %v7986_v6 = vld [vmem:[%s9705_s1 + $0x360] ss:$16 sps:$4 sm:$0xff]  }
 0x31e   : > { %2386 = vmatpush2.bf16.msra.mxu0 %v7860_v7  ;;  %2427 = vmatpush2.bf16.msra.mxu1 %v7863_v9  ;;  %v7988_v7 = vld [vmem:[%s9705_s1 + $0x364] ss:$16 sps:$4 sm:$0xff]   ;;  %v7919_v9 = vld [vmem:[%s9705_s1 + $0xec] ss:$16 sps:$4 sm:$0xff]  }
 0x31f   : > { %3235 = vmatprep.subr.bf16.mxu0 %v7868_v10  ;;  %v7992_v10 = vld [vmem:[%s9705_s1 + $0x340] ss:$16 sps:$4 sm:$0xff]  }
 0x321   : > { %2388 = vmatmul.mubr.bf16.vlgmr.msra.gmra.mxu0 %v9884_v8  ;;  %2429 = vmatmul.mubr.bf16.vlgmr.msra.gmra.mxu1 %v9880_v1  ;;  %v7916_v8 = vld [vmem:[%s9705_s1 + $0x2e4] ss:$16 sps:$4 sm:$0xff]  }
 0x322   : > { %3236 = vmatpush1.bf16.msra.mxu0 %v7866_v11  ;;  %v7880_v1 = vld [vmem:[%s9705_s1 + $0x64] ss:$16 sps:$4 sm:$0xff]   ;;  %3276 = vmatprep.subr.bf16.mxu1 %v7916_v8 }
 0x323   : > { %3237 = vmatprep.subr.bf16.mxu0 %v7871_v12  ;;  %3277 = vmatpush1.bf16.msra.mxu1 %v7914_v18  ;;  %v7994_v11 = vld [vmem:[%s9705_s1 + $0x344] ss:$16 sps:$4 sm:$0xff]  }
 0x324   : > { %3278 = vmatprep.subr.bf16.mxu1 %v7922_v21  ;;  %v8000_v12 = vld [vmem:[%s9705_s1 + $0x324] ss:$16 sps:$4 sm:$0xff]  }
 0x326   : > { %3238 = vmatpush1.bf16.msra.mxu0 %v7869_v13  ;;  %v7998_v13 = vld [vmem:[%s9705_s1 + $0x320] ss:$16 sps:$4 sm:$0xff]  }
 0x327   : > { %3239 = vmatprep.subr.bf16.mxu0 %v7874_v14  ;;  %3279 = vmatpush1.bf16.msra.mxu1 %v7920_v20  ;;  %v8006_v14 = vld [vmem:[%s9705_s1 + $0x304] ss:$16 sps:$4 sm:$0xff]  }
 0x328   : > { %3280 = vmatprep.subr.bf16.mxu1 %v7928_v25 }
 0x32a   : > { %3240 = vmatpush1.bf16.msra.mxu0 %v7872_v15  ;;  %v8004_v15 = vld [vmem:[%s9705_s1 + $0x300] ss:$16 sps:$4 sm:$0xff]  }
 0x32b   : > { %3241 = vmatprep.subr.bf16.mxu0 %v7877_v16  ;;  %3281 = vmatpush1.bf16.msra.mxu1 %v7926_v24  ;;  %v8012_v16 = vld [vmem:[%s9705_s1 + $0x2ec] ss:$16 sps:$4 sm:$0xff]  }
 0x32c   : > { %3282 = vmatprep.subr.bf16.mxu1 %v7934_v29 }
 0x32e   : > { %3242 = vmatpush1.bf16.msra.mxu0 %v7875_v17  ;;  %v10016_v17 = vld [vmem:[%s926_s4] sm:$0xf] }
 0x32f   : > { %3243 = vmatprep.subr.bf16.mxu0 %v7880_v1  ;;  %3283 = vmatpush1.bf16.msra.mxu1 %v7932_v28  ;;  %v1616_v18 = vrot.slane %v10016_v17, %v9866_v40  ;;  %v1620_v8 = vrot.slane %v10016_v17, %v9870_v42 }
 0x330   : > { %3284 = vmatprep.subr.bf16.mxu1 %v7940_v33  ;;  %v7917_v33 = vld [vmem:[%s9705_s1 + $0xe8] ss:$16 sps:$4 sm:$0xff]  }
 0x332   : > { %3244 = vmatpush1.bf16.msra.mxu0 %v7878_v19 }
 0x333   : > { %3245 = vmatprep.subr.bf16.mxu0 %v7883_v22  ;;  %3285 = vmatpush1.bf16.msra.mxu1 %v7938_v32 }
 0x334   : > { %3286 = vmatprep.subr.bf16.mxu1 %v7946_v37  ;;  %v7931_v37 = vld [vmem:[%s9705_s1 + $0xac] ss:$16 sps:$4 sm:$0xff]  }
 0x336   : > { %3246 = vmatpush1.bf16.msra.mxu0 %v7881_v23 }
 0x337   : > { %3247 = vmatprep.subr.bf16.mxu0 %v7886_v26  ;;  %3287 = vmatpush1.bf16.msra.mxu1 %v7944_v36  ;;  %v7923_v36 = vld [vmem:[%s9705_s1 + $0xc8] ss:$16 sps:$4 sm:$0xff]  }
 0x338   : > { %3288 = vmatprep.subr.bf16.mxu1 %v7952_v45  ;;  %v7943_v45 = vld [vmem:[%s9705_s1 + $0x6c] ss:$16 sps:$4 sm:$0xff]  }
 0x33a   : > { %3248 = vmatpush1.bf16.msra.mxu0 %v7884_v27 }
 0x33b   : > { %3249 = vmatprep.subr.bf16.mxu0 %v7889_v30  ;;  %3289 = vmatpush1.bf16.msra.mxu1 %v7950_v44  ;;  %v7935_v44 = vld [vmem:[%s9705_s1 + $0x88] ss:$16 sps:$4 sm:$0xff]  }
 0x33c   : > { %3290 = vmatprep.subr.bf16.mxu1 %v7958_v49  ;;  %v7955_v49 = vld [vmem:[%s9705_s1 + $0x2c] ss:$16 sps:$4 sm:$0xff]  }
 0x33e   : > { %3250 = vmatpush1.bf16.msra.mxu0 %v7887_v31 }
 0x33f   : > { %3251 = vmatprep.subr.bf16.mxu0 %v7892_v34  ;;  %3291 = vmatpush1.bf16.msra.mxu1 %v7956_v48  ;;  %v7947_v48 = vld [vmem:[%s9705_s1 + $0x48] ss:$16 sps:$4 sm:$0xff]  }
 0x340   : > { %3292 = vmatprep.subr.bf16.mxu1 %v7964_v53  ;;  %v7967_v53 = vld [vmem:[%s9705_s1 + $0x1ec] ss:$16 sps:$4 sm:$0xff]  }
 0x342   : > { %3252 = vmatpush2.bf16.msra.mxu0 %v7890_v35  ;;  %v7925_v35 = vld [vmem:[%s9705_s1 + $0xcc] ss:$16 sps:$4 sm:$0xff]  }
 0x343   : > { %3253 = vmatprep.subr.bf16.mxu0 %v7895_v38  ;;  %3293 = vmatpush2.bf16.msra.mxu1 %v7962_v52  ;;  %v7929_v38 = vld [vmem:[%s9705_s1 + $0xa8] ss:$16 sps:$4 sm:$0xff]  }
 0x344   : > { %3294 = vmatprep.subr.bf16.mxu1 %v7970_v57  ;;  %v7959_v52 = vld [vmem:[%s9705_s1 + $0x8] ss:$16 sps:$4 sm:$0xff]   ;;  %v7979_v57 = vld [vmem:[%s9705_s1 + $0x1ac] ss:$16 sps:$4 sm:$0xff]  }
 0x346   : > { %3254 = vmatpush2.bf16.msra.mxu0 %v7893_v39  ;;  %v7937_v39 = vld [vmem:[%s9705_s1 + $0x8c] ss:$16 sps:$4 sm:$0xff]  }
 0x347   : > { %3255 = vmatprep.subr.bf16.mxu0 %v7898_v46  ;;  %3295 = vmatpush2.bf16.msra.mxu1 %v7968_v56  ;;  %v7941_v46 = vld [vmem:[%s9705_s1 + $0x68] ss:$16 sps:$4 sm:$0xff]  }
 0x348   : > { %3296 = vmatprep.subr.bf16.mxu1 %v7976_v61  ;;  %v7971_v56 = vld [vmem:[%s9705_s1 + $0x1c8] ss:$16 sps:$4 sm:$0xff]   ;;  %v7991_v61 = vld [vmem:[%s9705_s1 + $0x16c] ss:$16 sps:$4 sm:$0xff]  }
 0x34a   : > { %3256 = vmatpush2.bf16.msra.mxu0 %v7896_v47  ;;  %v7949_v47 = vld [vmem:[%s9705_s1 + $0x4c] ss:$16 sps:$4 sm:$0xff]  }
 0x34b   : > { %3257 = vmatprep.subr.bf16.mxu0 %v7901_v50  ;;  %3297 = vmatpush2.bf16.msra.mxu1 %v7974_v60  ;;  %v7953_v50 = vld [vmem:[%s9705_s1 + $0x28] ss:$16 sps:$4 sm:$0xff]  }
 0x34c   : > { %3298 = vmatprep.subr.bf16.mxu1 %v7982_v3  ;;  %v7983_v60 = vld [vmem:[%s9705_s1 + $0x188] ss:$16 sps:$4 sm:$0xff]  }
 0x34d   : > { %v7995_v3 = vld [vmem:[%s9705_s1 + $0x148] ss:$16 sps:$4 sm:$0xff]  }
 0x34e   : > { %3258 = vmatpush2.bf16.msra.mxu0 %v7899_v51  ;;  %v7961_v51 = vld [vmem:[%s9705_s1 + $0xc] ss:$16 sps:$4 sm:$0xff]  }
 0x34f   : > { %3259 = vmatprep.subr.bf16.mxu0 %v7904_v54  ;;  %3299 = vmatpush2.bf16.msra.mxu1 %v7980_v2  ;;  %v7965_v54 = vld [vmem:[%s9705_s1 + $0x1e8] ss:$16 sps:$4 sm:$0xff]   ;;  %v1624_v2 = vrot.slane %v10016_v17, %v9868_v41 }
 0x350   : > { %3300 = vmatprep.subr.bf16.mxu1 %v7988_v7 }
 0x352   : > { %3260 = vmatpush2.bf16.msra.mxu0 %v7902_v55  ;;  %v7973_v55 = vld [vmem:[%s9705_s1 + $0x1cc] ss:$16 sps:$4 sm:$0xff]  }
 0x353   : > { %3261 = vmatprep.subr.bf16.mxu0 %v7907_v58  ;;  %3301 = vmatpush2.bf16.msra.mxu1 %v7986_v6  ;;  %v7977_v58 = vld [vmem:[%s9705_s1 + $0x1a8] ss:$16 sps:$4 sm:$0xff]  }
 0x354   : > { %3302 = vmatprep.subr.bf16.mxu1 %v7994_v11 }
 0x356   : > { %3262 = vmatpush2.bf16.msra.mxu0 %v7905_v59  ;;  %v7985_v59 = vld [vmem:[%s9705_s1 + $0x18c] ss:$16 sps:$4 sm:$0xff]  }
 0x357   : > { %3263 = vmatprep.subr.bf16.mxu0 %v7910_v62  ;;  %3303 = vmatpush2.bf16.msra.mxu1 %v7992_v10  ;;  %v7989_v62 = vld [vmem:[%s9705_s1 + $0x168] ss:$16 sps:$4 sm:$0xff]  }
 0x358   : > { %3304 = vmatprep.subr.bf16.mxu1 %v8000_v12  ;;  %v8001_v10 = vld [vmem:[%s9705_s1 + $0x128] ss:$16 sps:$4 sm:$0xff]  }
 0x35a   : > { %3264 = vmatpush2.bf16.msra.mxu0 %v7908_v63  ;;  %v7997_v63 = vld [vmem:[%s9705_s1 + $0x14c] ss:$16 sps:$4 sm:$0xff]  }
 0x35b   : > { %3265 = vmatprep.subr.bf16.mxu0 %v7913_v4  ;;  %3305 = vmatpush2.bf16.msra.mxu1 %v7998_v13  ;;  %v8003_v4 = vld [vmem:[%s9705_s1 + $0x12c] ss:$16 sps:$4 sm:$0xff]  }
 0x35c   : > { %3306 = vmatprep.subr.bf16.mxu1 %v8006_v14  ;;  %v8009_v13 = vld [vmem:[%s9705_s1 + $0x10c] ss:$16 sps:$4 sm:$0xff]  }
 0x35e   : > { %3266 = vmatpush2.bf16.msra.mxu0 %v7911_v5  ;;  %v1628_v5 = vrot.slane %v10016_v17, %v9872_v43 }
 0x35f   : > { %3317 = vmatprep.subr.bf16.mxu0 %v7919_v9  ;;  %3307 = vmatpush2.bf16.msra.mxu1 %v8004_v15 }
 0x360   : > { %3358 = vmatprep.subr.bf16.mxu1 %v8012_v16 }
 0x3a1   : > { %v2307_v1 = vpop.f32.mrf.mxu0  ;;  %v2348_v19 = vpop.f32.mrf.mxu1 }
 0x3a2   : > { %v2308_v20 = vadd.f32 %v2307_v1, %v1616_v18  ;;  %v8007_v1 = vld [vmem:[%s9705_s1 + $0x108] ss:$16 sps:$4 sm:$0xff]  }
 0x3a3   : > { %v2309_v21 = vpop.f32.mrf.mxu0  ;;  %v2350_v22 = vpop.f32.mrf.mxu1 }
 0x3a4   : > { %v2349_v23 = vadd.f32 %v2348_v19, %v2308_v20  ;;  %v2310_v24 = vadd.f32 %v2309_v21, %v1620_v8 }
 0x3a5   : > { %v2311_v25 = vpop.f32.mrf.mxu0  ;;  %v2352_v26 = vpop.f32.mrf.mxu1 }
 0x3a6   : > { %v2351_v27 = vadd.f32 %v2350_v22, %v2310_v24  ;;  %v2437_v28 = vmax.f32 %v2349_v23, 0.0  ;;  %v8010_v23 = vld [vmem:[%s9705_s1 + $0x2e8] ss:$16 sps:$4 sm:$0xff]   ;;  %v8015_v25 = vld [vmem:[%s9705_s1 + $0x2cc] ss:$16 sps:$4 sm:$0xff]  }
 0x3a7   : > { %v2312_v29 = vpop.f32.mrf.mxu0  ;;  %v2353_v30 = vpop.f32.mrf.mxu1  ;;  %v8013_v26 = vld [vmem:[%s9705_s1 + $0x2c8] ss:$16 sps:$4 sm:$0xff]  }
 0x3a8   : > { %v2438_v31 = vmax.f32 %v2351_v27, 0.0  ;;  %v10023_v34 = vpack.c.bf16 %v2437_v28, %v2437_v28  ;;  %v8018_v27 = vld [vmem:[%s9705_s1 + $0x2ac] ss:$16 sps:$4 sm:$0xff]   ;;  %v8016_v28 = vld [vmem:[%s9705_s1 + $0x2a8] ss:$16 sps:$4 sm:$0xff]   ;;  %v8058_v30 = vld [vmem:[%s9714_s23 + $0x78] sm:$0xff]  }
 0x3a9   : > { %v8021_v29 = vld [vmem:[%s9705_s1 + $0x28c] ss:$16 sps:$4 sm:$0xff]  }
 0x3aa   : > { %v2442_v32 = vpack.c.bf16 %v2438_v31, %v2438_v31  ;;  %v8059_v31 = vld [vmem:[%s9714_s23 + $0x38] sm:$0xff]  }
 0x3ac   : > { %3267 = vmatprep.mubr.bf16.mxu0 %v2442_v32 }
 0x3ad   : > { %3268 = vmatmul.mubr.bf16.vlgmr.msra.gmra.mxu0 %v10023_v34 }
 0x3ae   : > { %3318 = vmatpush1.bf16.msra.mxu0 %v7917_v33  ;;  %3349 = vmatprep.mubr.bf16.mxu0 %v2442_v32  ;;  %v8060_v32 = vld [vmem:[%s9714_s23 + $0x70] sm:$0xff]  }
 0x3af   : > { %3319 = vmatprep.subr.bf16.mxu0 %v7925_v35  ;;  %v8019_v33 = vld [vmem:[%s9705_s1 + $0x288] ss:$16 sps:$4 sm:$0xff]   ;;  %v8024_v35 = vld [vmem:[%s9705_s1 + $0x26c] ss:$16 sps:$4 sm:$0xff]  }
 0x3b2   : > { %3320 = vmatpush1.bf16.msra.mxu0 %v7923_v36  ;;  %v8062_v36 = vld [vmem:[%s9714_s23 + $0x68] sm:$0xff]  }
 0x3b3   : > { %3321 = vmatprep.subr.bf16.mxu0 %v7931_v37  ;;  %v8022_v37 = vld [vmem:[%s9705_s1 + $0x268] ss:$16 sps:$4 sm:$0xff]  }
 0x3b6   : > { %3322 = vmatpush1.bf16.msra.mxu0 %v7929_v38  ;;  %v8063_v38 = vld [vmem:[%s9714_s23 + $0x28] sm:$0xff]  }
 0x3b7   : > { %3323 = vmatprep.subr.bf16.mxu0 %v7937_v39  ;;  %v8027_v39 = vld [vmem:[%s9705_s1 + $0x24c] ss:$16 sps:$4 sm:$0xff]  }
 0x3ba   : > { %3324 = vmatpush1.bf16.msra.mxu0 %v7935_v44  ;;  %v8064_v44 = vld [vmem:[%s9714_s23 + $0x60] sm:$0xff]  }
 0x3bb   : > { %3325 = vmatprep.subr.bf16.mxu0 %v7943_v45  ;;  %v8025_v45 = vld [vmem:[%s9705_s1 + $0x248] ss:$16 sps:$4 sm:$0xff]  }
 0x3be   : > { %3326 = vmatpush1.bf16.msra.mxu0 %v7941_v46  ;;  %v8065_v46 = vld [vmem:[%s9714_s23 + $0x20] sm:$0xff]  }
 0x3bf   : > { %3327 = vmatprep.subr.bf16.mxu0 %v7949_v47  ;;  %v8030_v47 = vld [vmem:[%s9705_s1 + $0x22c] ss:$16 sps:$4 sm:$0xff]  }
 0x3c2   : > { %3328 = vmatpush1.bf16.msra.mxu0 %v7947_v48  ;;  %v8066_v48 = vld [vmem:[%s9714_s23 + $0x58] sm:$0xff]  }
 0x3c3   : > { %3329 = vmatprep.subr.bf16.mxu0 %v7955_v49  ;;  %v8028_v49 = vld [vmem:[%s9705_s1 + $0x228] ss:$16 sps:$4 sm:$0xff]  }
 0x3c6   : > { %3330 = vmatpush1.bf16.msra.mxu0 %v7953_v50  ;;  %v8067_v50 = vld [vmem:[%s9714_s23 + $0x18] sm:$0xff]  }
 0x3c7   : > { %3331 = vmatprep.subr.bf16.mxu0 %v7961_v51  ;;  %v8033_v51 = vld [vmem:[%s9705_s1 + $0x20c] ss:$16 sps:$4 sm:$0xff]  }
 0x3ca   : > { %3332 = vmatpush1.bf16.msra.mxu0 %v7959_v52  ;;  %v8068_v52 = vld [vmem:[%s9714_s23 + $0x50] sm:$0xff]  }
 0x3cb   : > { %3333 = vmatprep.subr.bf16.mxu0 %v7967_v53  ;;  %v8031_v53 = vld [vmem:[%s9705_s1 + $0x208] ss:$16 sps:$4 sm:$0xff]  }
 0x3ce   : > { %3334 = vmatpush2.bf16.msra.mxu0 %v7965_v54  ;;  %v8069_v54 = vld [vmem:[%s9714_s23 + $0x10] sm:$0xff]  }
 0x3cf   : > { %3335 = vmatprep.subr.bf16.mxu0 %v7973_v55  ;;  %v8036_v55 = vld [vmem:[%s9705_s1 + $0x3ec] ss:$16 sps:$4 sm:$0xff]  }
 0x3d2   : > { %3336 = vmatpush2.bf16.msra.mxu0 %v7971_v56  ;;  %v8034_v56 = vld [vmem:[%s9705_s1 + $0x3e8] ss:$16 sps:$4 sm:$0xff]  }
 0x3d3   : > { %3337 = vmatprep.subr.bf16.mxu0 %v7979_v57  ;;  %v8039_v57 = vld [vmem:[%s9705_s1 + $0x3cc] ss:$16 sps:$4 sm:$0xff]  }
 0x3d6   : > { %3338 = vmatpush2.bf16.msra.mxu0 %v7977_v58  ;;  %v8037_v58 = vld [vmem:[%s9705_s1 + $0x3c8] ss:$16 sps:$4 sm:$0xff]  }
 0x3d7   : > { %3339 = vmatprep.subr.bf16.mxu0 %v7985_v59  ;;  %v8042_v59 = vld [vmem:[%s9705_s1 + $0x3ac] ss:$16 sps:$4 sm:$0xff]  }
 0x3da   : > { %3340 = vmatpush2.bf16.msra.mxu0 %v7983_v60  ;;  %v8040_v60 = vld [vmem:[%s9705_s1 + $0x3a8] ss:$16 sps:$4 sm:$0xff]  }
 0x3db   : > { %3341 = vmatprep.subr.bf16.mxu0 %v7991_v61  ;;  %v8045_v61 = vld [vmem:[%s9705_s1 + $0x38c] ss:$16 sps:$4 sm:$0xff]  }
 0x3de   : > { %3342 = vmatpush2.bf16.msra.mxu0 %v7989_v62  ;;  %v8043_v62 = vld [vmem:[%s9705_s1 + $0x388] ss:$16 sps:$4 sm:$0xff]  }
 0x3df   : > { %3343 = vmatprep.subr.bf16.mxu0 %v7997_v63  ;;  %v8048_v63 = vld [vmem:[%s9705_s1 + $0x36c] ss:$16 sps:$4 sm:$0xff]  }
 0x3e1   : > { %v2389_v6 = vpop.f32.mrf.mxu0  ;;  %v2430_v7 = vpop.f32.mrf.mxu1 }
 0x3e2   : > { %v2390_v9 = vadd.f32 %v2389_v6, %v1624_v2  ;;  %3344 = vmatpush2.bf16.msra.mxu0 %v7995_v3  ;;  %v8046_v2 = vld [vmem:[%s9705_s1 + $0x368] ss:$16 sps:$4 sm:$0xff]   ;;  %v8051_v3 = vld [vmem:[%s9705_s1 + $0x34c] ss:$16 sps:$4 sm:$0xff]  }
 0x3e3   : > { %v2391_v11 = vpop.f32.mrf.mxu0  ;;  %v2432_v12 = vpop.f32.mrf.mxu1  ;;  %3345 = vmatprep.subr.bf16.mxu0 %v8003_v4  ;;  %v8049_v4 = vld [vmem:[%s9705_s1 + $0x348] ss:$16 sps:$4 sm:$0xff]  }
 0x3e4   : > { %v2431_v14 = vadd.f32 %v2430_v7, %v2390_v9  ;;  %v2392_v15 = vadd.f32 %v2391_v11, %v1628_v5  ;;  %v8054_v5 = vld [vmem:[%s9705_s1 + $0x32c] ss:$16 sps:$4 sm:$0xff]   ;;  %v8052_v6 = vld [vmem:[%s9705_s1 + $0x328] ss:$16 sps:$4 sm:$0xff]   ;;  %v8071_v11 = vld [vmem:[%s9714_s23 + $0x8] sm:$0xff]  }
 0x3e5   : > { %v2393_v16 = vpop.f32.mrf.mxu0  ;;  %v2434_v18 = vpop.f32.mrf.mxu1  ;;  %v8057_v7 = vld [vmem:[%s9705_s1 + $0x30c] ss:$16 sps:$4 sm:$0xff]   ;;  %v8055_v9 = vld [vmem:[%s9705_s1 + $0x308] ss:$16 sps:$4 sm:$0xff]  }
 0x3e6   : > { %v2433_v8 = vadd.f32 %v2432_v12, %v2392_v15  ;;  %3346 = vmatpush2.bf16.msra.mxu0 %v8001_v10  ;;  %v2439_v17 = vmax.f32 %v2431_v14, 0.0  ;;  %v8070_v10 = vld [vmem:[%s9714_s23 + $0x48] sm:$0xff]   ;;  %v8072_v12 = vld [vmem:[%s9714_s23 + $0x40] sm:$0xff]   ;;  %v8074_v14 = vld [vmem:[%s9714_s23 + $0xf8] sm:$0xff]  }
 0x3e7   : > { %v2394_v19 = vpop.f32.mrf.mxu0  ;;  %v2435_v20 = vpop.f32.mrf.mxu1  ;;  %3347 = vmatprep.subr.bf16.mxu0 %v8009_v13  ;;  %v8073_v13 = vld [vmem:[%s9714_s23] sm:$0xff]   ;;  %v8075_v15 = vld [vmem:[%s9714_s23 + $0xb8] sm:$0xff]   ;;  %v8076_v16 = vld [vmem:[%s9714_s23 + $0xf0] sm:$0xff]  }
 0x3e8   : > { %v2440_v21 = vmax.f32 %v2433_v8, 0.0  ;;  %v10061_v24 = vpack.c.bf16 %v2439_v17, %v2439_v17  ;;  %v8077_v18 = vld [vmem:[%s9714_s23 + $0xb0] sm:$0xff]   ;;  %v8078_v8 = vld [vmem:[%s9714_s23 + $0xe8] sm:$0xff]   ;;  %v8080_v17 = vld [vmem:[%s9714_s23 + $0xe0] sm:$0xff]  }
 0x3e9   : > { %v8081_v19 = vld [vmem:[%s9714_s23 + $0xa0] sm:$0xff]   ;;  %v8082_v20 = vld [vmem:[%s9714_s23 + $0xd8] sm:$0xff]  }
 0x3ea   : > { %v2444_v22 = vpack.c.bf16 %v2440_v21, %v2440_v21  ;;  %3348 = vmatpush2.bf16.msra.mxu0 %v8007_v1  ;;  %v8079_v1 = vld [vmem:[%s9714_s23 + $0xa8] sm:$0xff]   ;;  %v8083_v21 = vld [vmem:[%s9714_s23 + $0x98] sm:$0xff]  }
 0x3eb   : > { %7469 = vmatprep.subr.bf16.mxu0 %v8058_v30 }
 0x3ec   : > { %3308 = vmatprep.mubr.bf16.mxu1 %v2444_v22 }
 0x3ed   : > { %3309 = vmatmul.mubr.bf16.vlgmr.msra.gmra.mxu1 %v10061_v24  ;;  %3350 = vmatmul.mubr.bf16.vlgmr.msra.gmra.mxu0 %v10023_v34  ;;  %v8061_v34 = vld [vmem:[%s9714_s23 + $0x30] sm:$0xff]  }
 0x3ee   : > { %3359 = vmatpush1.bf16.msra.mxu1 %v8010_v23  ;;  %3390 = vmatprep.mubr.bf16.mxu1 %v2444_v22  ;;  %v8084_v22 = vld [vmem:[%s9714_s23 + $0xd0] sm:$0xff]  }
 0x3ef   : > { %3360 = vmatprep.subr.bf16.mxu1 %v8015_v25  ;;  %7470 = vmatpush3.bf16.msra.mxu0 %v8059_v31  ;;  %v8085_v23 = vld [vmem:[%s9714_s23 + $0x90] sm:$0xff]   ;;  %v8087_v25 = vld [vmem:[%s9714_s23 + $0x88] sm:$0xff]  }
 0x3f0   : > { %7471 = vmatprep.subr.bf16.mxu0 %v8060_v32  ;;  %v2573_v32 = vld [vmem:[%s10616_s22] sm:$0xf] }
 0x3f2   : > { %3361 = vmatpush1.bf16.msra.mxu1 %v8013_v26 }
 0x3f3   : > { %3362 = vmatprep.subr.bf16.mxu1 %v8018_v27  ;;  %7472 = vmatpush3.bf16.msra.mxu0 %v8061_v34  ;;  %v2582_v34 = vrot.slane %v2573_v32, %v9870_v42 }
 0x3f4   : > { %7473 = vmatprep.subr.bf16.mxu0 %v8062_v36 }
 0x3f6   : > { %3363 = vmatpush1.bf16.msra.mxu1 %v8016_v28  ;;  %v8088_v28 = vld [vmem:[%s9714_s23 + $0xc0] sm:$0xff]  }
 0x3f7   : > { %3364 = vmatprep.subr.bf16.mxu1 %v8021_v29  ;;  %7474 = vmatpush3.bf16.msra.mxu0 %v8063_v38  ;;  %v8089_v29 = vld [vmem:[%s9714_s23 + $0x80] sm:$0xff]  }
 0x3f8   : > { %7475 = vmatprep.subr.bf16.mxu0 %v8064_v44 }
 0x3fa   : > { %3365 = vmatpush1.bf16.msra.mxu1 %v8019_v33  ;;  %v2578_v33 = vrot.slane %v2573_v32, %v9866_v40 }
 0x3fb   : > { %3366 = vmatprep.subr.bf16.mxu1 %v8024_v35  ;;  %7476 = vmatpush3.bf16.msra.mxu0 %v8065_v46 }
 0x3fc   : > { %7477 = vmatprep.subr.bf16.mxu0 %v8066_v48 }
 0x3fe   : > { %3367 = vmatpush1.bf16.msra.mxu1 %v8022_v37 }
 0x3ff   : > { %3368 = vmatprep.subr.bf16.mxu1 %v8027_v39  ;;  %7478 = vmatpush3.bf16.msra.mxu0 %v8067_v50 }
 0x400   : > { %7479 = vmatprep.subr.bf16.mxu0 %v8068_v52 }
 0x402   : > { %3369 = vmatpush1.bf16.msra.mxu1 %v8025_v45 }
 0x403   : > { %3370 = vmatprep.subr.bf16.mxu1 %v8030_v47  ;;  %7480 = vmatpush3.bf16.msra.mxu0 %v8069_v54  ;;  %v2590_v54 = vrot.slane %v2573_v32, %v9872_v43 }
 0x404   : > { %7481 = vmatprep.subr.bf16.mxu0 %v8070_v10  ;;  %v8096_v10 = vld [vmem:[%s9723_s27 + $0xc0] ss:$16 sps:$4 sm:$0xff]  }
 0x406   : > { %3371 = vmatpush1.bf16.msra.mxu1 %v8028_v49 }
 0x407   : > { %3372 = vmatprep.subr.bf16.mxu1 %v8033_v51  ;;  %7482 = vmatpush3.bf16.msra.mxu0 %v8071_v11  ;;  %v8099_v11 = vld [vmem:[%s9723_s27 + $0xc8] ss:$16 sps:$4 sm:$0xff]  }
 0x408   : > { %7483 = vmatprep.subr.bf16.mxu0 %v8072_v12  ;;  %v8107_v12 = vld [vmem:[%s9723_s27 + $0xac] ss:$16 sps:$4 sm:$0xff]  }
 0x40a   : > { %3373 = vmatpush1.bf16.msra.mxu1 %v8031_v53  ;;  %v2586_v53 = vrot.slane %v2573_v32, %v9868_v41  ;;  %v8135_v32 = vld [vmem:[%s9723_s27 + $0x8] ss:$16 sps:$4 sm:$0xff]  }
 0x40b   : > { %3374 = vmatprep.subr.bf16.mxu1 %v8036_v55  ;;  %7484 = vmatpush3.bf16.msra.mxu0 %v8073_v13  ;;  %v8102_v13 = vld [vmem:[%s9723_s27 + $0xa0] ss:$16 sps:$4 sm:$0xff]  }
 0x40e   : > { %3375 = vmatpush2.bf16.msra.mxu1 %v8034_v56 }
 0x40f   : > { %3376 = vmatprep.subr.bf16.mxu1 %v8039_v57 }
 0x412   : > { %3377 = vmatpush2.bf16.msra.mxu1 %v8037_v58 }
 0x413   : > { %3378 = vmatprep.subr.bf16.mxu1 %v8042_v59 }
 0x416   : > { %3379 = vmatpush2.bf16.msra.mxu1 %v8040_v60 }
 0x417   : > { %3380 = vmatprep.subr.bf16.mxu1 %v8045_v61 }
 0x41a   : > { %3381 = vmatpush2.bf16.msra.mxu1 %v8043_v62 }
 0x41b   : > { %3382 = vmatprep.subr.bf16.mxu1 %v8048_v63 }
 0x41e   : > { %3383 = vmatpush2.bf16.msra.mxu1 %v8046_v2 }
 0x41f   : > { %3384 = vmatprep.subr.bf16.mxu1 %v8051_v3  ;;  %v8090_v3 = vld [vmem:[%s9723_s27 + $0xe0] ss:$16 sps:$4 sm:$0xff]  }
 0x422   : > { %3385 = vmatpush2.bf16.msra.mxu1 %v8049_v4  ;;  %v8092_v4 = vld [vmem:[%s9723_s27 + $0xe4] ss:$16 sps:$4 sm:$0xff]  }
 0x423   : > { %3386 = vmatprep.subr.bf16.mxu1 %v8054_v5  ;;  %v8093_v5 = vld [vmem:[%s9723_s27 + $0xe8] ss:$16 sps:$4 sm:$0xff]   ;;  %3962 = vmatprep.subr.bf16.mxu0 %v8092_v4 }
 0x424   : > { %v8159_v4 = vld [vmem:[%s9731_s26 + $0x280] ss:$16 sps:$4 sm:$0xff]  }
 0x426   : > { %3387 = vmatpush2.bf16.msra.mxu1 %v8052_v6  ;;  %v8095_v6 = vld [vmem:[%s9723_s27 + $0xec] ss:$16 sps:$4 sm:$0xff]  }
 0x427   : > { %3388 = vmatprep.subr.bf16.mxu1 %v8057_v7  ;;  %v8098_v7 = vld [vmem:[%s9723_s27 + $0xc4] ss:$16 sps:$4 sm:$0xff]  }
 0x42a   : > { %3389 = vmatpush2.bf16.msra.mxu1 %v8055_v9  ;;  %v8101_v9 = vld [vmem:[%s9723_s27 + $0xcc] ss:$16 sps:$4 sm:$0xff]  }
 0x42b   : > { %7491 = vmatprep.subr.bf16.mxu1 %v8074_v14  ;;  %v8105_v14 = vld [vmem:[%s9723_s27 + $0xa8] ss:$16 sps:$4 sm:$0xff]  }
 0x42d   : > { %3391 = vmatmul.mubr.bf16.vlgmr.msra.gmra.mxu1 %v10061_v24  ;;  %v8086_v24 = vld [vmem:[%s9714_s23 + $0xc8] sm:$0xff]   ;;  %s10618_s23 = sld [smem:[#allocation53_spill]] }
 0x42e   : > { %7492 = vmatpush3.bf16.msra.mxu1 %v8075_v15  ;;  %v8110_v15 = vld [vmem:[%s9723_s27 + $0x84] ss:$16 sps:$4 sm:$0xff]  }
 0x42f   : > { %7493 = vmatprep.subr.bf16.mxu1 %v8076_v16  ;;  %v8113_v16 = vld [vmem:[%s9723_s27 + $0x8c] ss:$16 sps:$4 sm:$0xff]  }
 0x432   : > { %7494 = vmatpush3.bf16.msra.mxu1 %v8077_v18  ;;  %v8108_v18 = vld [vmem:[%s9723_s27 + $0x80] ss:$16 sps:$4 sm:$0xff]  }
 0x433   : > { %7495 = vmatprep.subr.bf16.mxu1 %v8078_v8  ;;  %v8111_v8 = vld [vmem:[%s9723_s27 + $0x88] ss:$16 sps:$4 sm:$0xff]  }
 0x436   : > { %7496 = vmatpush3.bf16.msra.mxu1 %v8079_v1  ;;  %v8116_v1 = vld [vmem:[%s9723_s27 + $0x64] ss:$16 sps:$4 sm:$0xff]  }
 0x437   : > { %7497 = vmatprep.subr.bf16.mxu1 %v8080_v17  ;;  %v8119_v17 = vld [vmem:[%s9723_s27 + $0x6c] ss:$16 sps:$4 sm:$0xff]  }
 0x43a   : > { %7498 = vmatpush3.bf16.msra.mxu1 %v8081_v19  ;;  %v8114_v19 = vld [vmem:[%s9723_s27 + $0x60] ss:$16 sps:$4 sm:$0xff]  }
 0x43b   : > { %7499 = vmatprep.subr.bf16.mxu1 %v8082_v20  ;;  %v8117_v20 = vld [vmem:[%s9723_s27 + $0x68] ss:$16 sps:$4 sm:$0xff]  }
 0x43e   : > { %7500 = vmatpush3.bf16.msra.mxu1 %v8083_v21  ;;  %v8122_v21 = vld [vmem:[%s9723_s27 + $0x44] ss:$16 sps:$4 sm:$0xff]  }
 0x43f   : > { %7501 = vmatprep.subr.bf16.mxu1 %v8084_v22  ;;  %v8125_v22 = vld [vmem:[%s9723_s27 + $0x4c] ss:$16 sps:$4 sm:$0xff]  }
 0x442   : > { %7502 = vmatpush3.bf16.msra.mxu1 %v8085_v23  ;;  %v8120_v23 = vld [vmem:[%s9723_s27 + $0x40] ss:$16 sps:$4 sm:$0xff]  }
 0x443   : > { %7503 = vmatprep.subr.bf16.mxu1 %v8086_v24  ;;  %v8123_v24 = vld [vmem:[%s9723_s27 + $0x48] ss:$16 sps:$4 sm:$0xff]  }
 0x446   : > { %7504 = vmatpush3.bf16.msra.mxu1 %v8087_v25  ;;  %v8128_v25 = vld [vmem:[%s9723_s27 + $0x24] ss:$16 sps:$4 sm:$0xff]  }
 0x447   : > { %7505 = vmatprep.subr.bf16.mxu1 %v8088_v28  ;;  %v8129_v28 = vld [vmem:[%s9723_s27 + $0x28] ss:$16 sps:$4 sm:$0xff]  }
 0x44a   : > { %7506 = vmatpush3.bf16.msra.mxu1 %v8089_v29  ;;  %v8134_v29 = vld [vmem:[%s9723_s27 + $0x4] ss:$16 sps:$4 sm:$0xff]  }
 0x44b   : > { %4003 = vmatprep.subr.bf16.mxu1 %v8095_v6  ;;  %v8167_v6 = vld [vmem:[%s9731_s26 + $0x264] ss:$16 sps:$4 sm:$0xff]  }
 0x46d   : > { %v3269_v26 = vpop.f32.mrf.mxu0 }
 0x46e   : > { %v3270_v35 = vadd.f32 %v3269_v26, %v2578_v33  ;;  %v8131_v26 = vld [vmem:[%s9723_s27 + $0x2c] ss:$16 sps:$4 sm:$0xff]  }
 0x46f   : > { %v3271_v27 = vpop.f32.mrf.mxu0  ;;  %v8140_v33 = vld [vmem:[%s9731_s26 + $0xe4] ss:$16 sps:$4 sm:$0xff]  }
 0x470   : > { %v3272_v38 = vadd.f32 %v3271_v27, %v2582_v34  ;;  %v8126_v27 = vld [vmem:[%s9723_s27 + $0x20] ss:$16 sps:$4 sm:$0xff]   ;;  %v8143_v34 = vld [vmem:[%s9731_s26 + $0x2e4] ss:$16 sps:$4 sm:$0xff]  }
 0x471   : > { %v3273_v30 = vpop.f32.mrf.mxu0 }
 0x472   : > { %v8137_v30 = vld [vmem:[%s9723_s27 + $0xc] ss:$16 sps:$4 sm:$0xff]  }
 0x473   : > { %v3274_v31 = vpop.f32.mrf.mxu0 }
 0x474   : > { %v8132_v31 = vld [vmem:[%s9723_s27] ss:$16 sps:$4 sm:$0xff]  }
 0x4ad   : > { %v3310_v36 = vpop.f32.mrf.mxu1  ;;  %v3351_v37 = vpop.f32.mrf.mxu0 }
 0x4ae   : > { %v3311_v39 = vadd.f32 %v3310_v36, %v3270_v35  ;;  %v3352_v55 = vadd.f32 %v3351_v37, %v2586_v53  ;;  %v8141_v53 = vld [vmem:[%s9731_s26 + $0x2e0] ss:$16 sps:$4 sm:$0xff]  }
 0x4af   : > { %v3312_v44 = vpop.f32.mrf.mxu1  ;;  %v3353_v45 = vpop.f32.mrf.mxu0 }
 0x4b0   : > { %v3313_v46 = vadd.f32 %v3312_v44, %v3272_v38  ;;  %v3399_v50 = vpack.c.bf16 %v3311_v39, %v3311_v39  ;;  %v3354_v57 = vadd.f32 %v3353_v45, %v2590_v54  ;;  %v7099_v44 = vld [vmem:[%s10617_s0] ss:$0 sm:$0xff] }
 0x4b1   : > { %v3314_v47 = vpop.f32.mrf.mxu1  ;;  %v3355_v48 = vpop.f32.mrf.mxu0 }
 0x4b2   : > { %v3400_v49 = vpack.c.bf16 %v3313_v46, %v3313_v46 }
 0x4b3   : > { %v3315_v51 = vpop.f32.mrf.mxu1  ;;  %v3356_v52 = vpop.f32.mrf.mxu0 }
 0x4b4   : > { %3698 = vmatprep.mubr.bf16.mxu0 %v3400_v49  ;;  %v8138_v52 = vld [vmem:[%s9731_s26 + $0xe0] ss:$16 sps:$4 sm:$0xff]  }
 0x4b5   : > { %3699 = vmatmul.mubr.bf16.vlgmr.msra.gmra.mxu0 %v3399_v50 }
 0x4b6   : > { %3994 = vmatprep.mubr.bf16.mxu0 %v9058_v0  ;;  %3963 = vmatpush1.bf16.msra.mxu0 %v8090_v3  ;;  %v8156_v3 = vld [vmem:[%s9731_s26 + $0x80] ss:$16 sps:$4 sm:$0xff]  }
 0x4b7   : > { %3964 = vmatprep.subr.bf16.mxu0 %v8098_v7  ;;  %v8162_v7 = vld [vmem:[%s9731_s26 + $0x60] ss:$16 sps:$4 sm:$0xff]  }
 0x4ba   : > { %3965 = vmatpush1.bf16.msra.mxu0 %v8096_v10  ;;  %v8170_v10 = vld [vmem:[%s9731_s26 + $0x44] ss:$16 sps:$4 sm:$0xff]  }
 0x4ed   : > { %v3392_v56 = vpop.f32.mrf.mxu1 }
 0x4ee   : > { %v3393_v58 = vadd.f32 %v3392_v56, %v3352_v55  ;;  %v8146_v55 = vld [vmem:[%s9731_s26 + $0xc4] ss:$16 sps:$4 sm:$0xff]  }
 0x4ef   : > { %v3394_v59 = vpop.f32.mrf.mxu1  ;;  %v8149_v56 = vld [vmem:[%s9731_s26 + $0x2c4] ss:$16 sps:$4 sm:$0xff]  }
 0x4f0   : > { %v3395_v60 = vadd.f32 %v3394_v59, %v3354_v57  ;;  %v3401_v63 = vpack.c.bf16 %v3393_v58, %v3393_v58  ;;  %v8144_v57 = vld [vmem:[%s9731_s26 + $0xc0] ss:$16 sps:$4 sm:$0xff]   ;;  %v8152_v59 = vld [vmem:[%s9731_s26 + $0xa4] ss:$16 sps:$4 sm:$0xff]  }
 0x4f1   : > { %v3396_v61 = vpop.f32.mrf.mxu1  ;;  %v8147_v58 = vld [vmem:[%s9731_s26 + $0x2c0] ss:$16 sps:$4 sm:$0xff]  }
 0x4f2   : > { %v3402_v62 = vpack.c.bf16 %v3395_v60, %v3395_v60  ;;  %v8155_v60 = vld [vmem:[%s9731_s26 + $0x2a4] ss:$16 sps:$4 sm:$0xff]   ;;  %v8150_v61 = vld [vmem:[%s9731_s26 + $0xa0] ss:$16 sps:$4 sm:$0xff]  }
 0x4f3   : > { %v3397_v2 = vpop.f32.mrf.mxu1 }
 0x4f4   : > { %3738 = vmatprep.mubr.bf16.mxu1 %v3402_v62  ;;  %v8153_v62 = vld [vmem:[%s9731_s26 + $0x2a0] ss:$16 sps:$4 sm:$0xff]   ;;  %v8161_v2 = vld [vmem:[%s9731_s26 + $0x284] ss:$16 sps:$4 sm:$0xff]  }
 0x4f5   : > { %3739 = vmatmul.mubr.bf16.vlgmr.msra.gmra.mxu1 %v3401_v63  ;;  %v8158_v63 = vld [vmem:[%s9731_s26 + $0x84] ss:$16 sps:$4 sm:$0xff]  }
 0x4f6   : > { %4035 = vmatprep.mubr.bf16.mxu1 %v9058_v0  ;;  %4004 = vmatpush1.bf16.msra.mxu1 %v8093_v5  ;;  %v8104_v0 = vld [vmem:[%s9723_s27 + $0xa4] ss:$16 sps:$4 sm:$0xff]   ;;  %s1172_s27 = scalar_lea.vmem %s10618_s23, %s6809_s8  ;;  %v8164_v5 = vld [vmem:[%s9731_s26 + $0x64] ss:$16 sps:$4 sm:$0xff]  }
 0x4f7   : > { %4005 = vmatprep.subr.bf16.mxu1 %v8101_v9  ;;  %3966 = vmatprep.subr.bf16.mxu0 %v8104_v0  ;;  %v8165_v9 = vld [vmem:[%s9731_s26 + $0x260] ss:$16 sps:$4 sm:$0xff]  }
 0x4f8   : > { %3967 = vmatpush1.bf16.msra.mxu0 %v8102_v13  ;;  %v8168_v0 = vld [vmem:[%s9731_s26 + $0x40] ss:$16 sps:$4 sm:$0xff]   ;;  %v8176_v13 = vld [vmem:[%s9731_s26 + $0x24] ss:$16 sps:$4 sm:$0xff]  }
 0x4f9   : > { %3968 = vmatprep.subr.bf16.mxu0 %v8110_v15  ;;  %v8174_v15 = vld [vmem:[%s9731_s26 + $0x20] ss:$16 sps:$4 sm:$0xff]  }
 0x4fa   : > { %4006 = vmatpush1.bf16.msra.mxu1 %v8099_v11  ;;  %v8173_v11 = vld [vmem:[%s9731_s26 + $0x244] ss:$16 sps:$4 sm:$0xff]  }
 0x4fb   : > { %4007 = vmatprep.subr.bf16.mxu1 %v8107_v12  ;;  %v8171_v12 = vld [vmem:[%s9731_s26 + $0x240] ss:$16 sps:$4 sm:$0xff]  }
 0x4fc   : > { %3969 = vmatpush1.bf16.msra.mxu0 %v8108_v18  ;;  %v8182_v18 = vld [vmem:[%s9731_s26 + $0x4] ss:$16 sps:$4 sm:$0xff]  }
 0x4fd   : > { %3970 = vmatprep.subr.bf16.mxu0 %v8116_v1  ;;  %v8180_v1 = vld [vmem:[%s9731_s26] ss:$16 sps:$4 sm:$0xff]  }
 0x4fe   : > { %4008 = vmatpush1.bf16.msra.mxu1 %v8105_v14  ;;  %v8179_v14 = vld [vmem:[%s9731_s26 + $0x224] ss:$16 sps:$4 sm:$0xff]  }
 0x4ff   : > { %4009 = vmatprep.subr.bf16.mxu1 %v8113_v16  ;;  %v8177_v16 = vld [vmem:[%s9731_s26 + $0x220] ss:$16 sps:$4 sm:$0xff]  }
 0x500   : > { %3971 = vmatpush1.bf16.msra.mxu0 %v8114_v19  ;;  %v8188_v19 = vld [vmem:[%s9731_s26 + $0x1e4] ss:$16 sps:$4 sm:$0xff]  }
 0x501   : > { %3972 = vmatprep.subr.bf16.mxu0 %v8122_v21  ;;  %v8186_v21 = vld [vmem:[%s9731_s26 + $0x1e0] ss:$16 sps:$4 sm:$0xff]  }
 0x502   : > { %4010 = vmatpush1.bf16.msra.mxu1 %v8111_v8  ;;  %v8185_v8 = vld [vmem:[%s9731_s26 + $0x204] ss:$16 sps:$4 sm:$0xff]  }
 0x503   : > { %4011 = vmatprep.subr.bf16.mxu1 %v8119_v17  ;;  %v8183_v17 = vld [vmem:[%s9731_s26 + $0x200] ss:$16 sps:$4 sm:$0xff]  }
 0x504   : > { %3973 = vmatpush1.bf16.msra.mxu0 %v8120_v23  ;;  %v8194_v23 = vld [vmem:[%s9731_s26 + $0x1c4] ss:$16 sps:$4 sm:$0xff]  }
 0x505   : > { %3974 = vmatprep.subr.bf16.mxu0 %v8128_v25  ;;  %v8192_v25 = vld [vmem:[%s9731_s26 + $0x1c0] ss:$16 sps:$4 sm:$0xff]  }
 0x506   : > { %4012 = vmatpush1.bf16.msra.mxu1 %v8117_v20  ;;  %v8191_v20 = vld [vmem:[%s9731_s26 + $0x3e4] ss:$16 sps:$4 sm:$0xff]  }
 0x507   : > { %4013 = vmatprep.subr.bf16.mxu1 %v8125_v22  ;;  %v8189_v22 = vld [vmem:[%s9731_s26 + $0x3e0] ss:$16 sps:$4 sm:$0xff]  }
 0x508   : > { %3975 = vmatpush1.bf16.msra.mxu0 %v8126_v27  ;;  %v8200_v27 = vld [vmem:[%s9731_s26 + $0x1a4] ss:$16 sps:$4 sm:$0xff]  }
 0x509   : > { %3976 = vmatprep.subr.bf16.mxu0 %v8134_v29  ;;  %v8198_v29 = vld [vmem:[%s9731_s26 + $0x1a0] ss:$16 sps:$4 sm:$0xff]  }
 0x50a   : > { %4014 = vmatpush1.bf16.msra.mxu1 %v8123_v24  ;;  %v8197_v24 = vld [vmem:[%s9731_s26 + $0x3c4] ss:$16 sps:$4 sm:$0xff]  }
 0x50b   : > { %4015 = vmatprep.subr.bf16.mxu1 %v8131_v26  ;;  %v8195_v26 = vld [vmem:[%s9731_s26 + $0x3c0] ss:$16 sps:$4 sm:$0xff]  }
 0x50c   : > { %3977 = vmatpush1.bf16.msra.mxu0 %v8132_v31  ;;  %v8206_v31 = vld [vmem:[%s9731_s26 + $0x184] ss:$16 sps:$4 sm:$0xff]  }
 0x50d   : > { %4842 = vmatprep.subr.bf16.mxu0 %v8140_v33  ;;  %v8204_v33 = vld [vmem:[%s9731_s26 + $0x180] ss:$16 sps:$4 sm:$0xff]  }
 0x50e   : > { %4016 = vmatpush1.bf16.msra.mxu1 %v8129_v28  ;;  %v8203_v28 = vld [vmem:[%s9731_s26 + $0x3a4] ss:$16 sps:$4 sm:$0xff]  }
 0x50f   : > { %4017 = vmatprep.subr.bf16.mxu1 %v8137_v30  ;;  %v8201_v30 = vld [vmem:[%s9731_s26 + $0x3a0] ss:$16 sps:$4 sm:$0xff]  }
 0x512   : > { %4018 = vmatpush1.bf16.msra.mxu1 %v8135_v32  ;;  %v8209_v32 = vld [vmem:[%s9731_s26 + $0x384] ss:$16 sps:$4 sm:$0xff]  }
 0x513   : > { %4883 = vmatprep.subr.bf16.mxu1 %v8143_v34  ;;  %v8207_v34 = vld [vmem:[%s9731_s26 + $0x380] ss:$16 sps:$4 sm:$0xff]  }
 0x575   : > { %v7485_v35 = vpop.f32.mrf.mxu0 }
 0x577   : > { %v7486_v36 = vpop.f32.mrf.mxu0 }
 0x578   : > { %v7487_v39 = vadd.f32 %v7486_v36, %v7485_v35  ;;  %v8212_v35 = vld [vmem:[%s9731_s26 + $0x164] ss:$16 sps:$4 sm:$0xff]  }
 0x579   : > { %v7488_v37 = vpop.f32.mrf.mxu0  ;;  %v8215_v36 = vld [vmem:[%s9731_s26 + $0x364] ss:$16 sps:$4 sm:$0xff]  }
 0x57a   : > { %v3701_v47 = vadd.f32 %v7487_v39, %v7099_v44  ;;  %v8210_v37 = vld [vmem:[%s9731_s26 + $0x160] ss:$16 sps:$4 sm:$0xff]   ;;  %v8218_v39 = vld [vmem:[%s9731_s26 + $0x144] ss:$16 sps:$4 sm:$0xff]  }
 0x57b   : > { %v7489_v38 = vpop.f32.mrf.mxu0  ;;  %v8221_v44 = vld [vmem:[%s9731_s26 + $0x344] ss:$16 sps:$4 sm:$0xff]  }
 0x57c   : > { %v8213_v38 = vld [vmem:[%s9731_s26 + $0x360] ss:$16 sps:$4 sm:$0xff]  }
 0x5b5   : > { %v7507_v45 = vpop.f32.mrf.mxu1 }
 0x5b7   : > { %v7508_v46 = vpop.f32.mrf.mxu1 }
 0x5b8   : > { %v7509_v48 = vadd.f32 %v7508_v46, %v7507_v45  ;;  %v8216_v45 = vld [vmem:[%s9731_s26 + $0x140] ss:$16 sps:$4 sm:$0xff]  }
 0x5b9   : > { %v7510_v49 = vpop.f32.mrf.mxu1  ;;  %v8219_v46 = vld [vmem:[%s9731_s26 + $0x340] ss:$16 sps:$4 sm:$0xff]  }
 0x5ba   : > { %v3741_v50 = vadd.f32 %v7509_v48, %v3701_v47  ;;  %v8224_v47 = vld [vmem:[%s9731_s26 + $0x124] ss:$16 sps:$4 sm:$0xff]   ;;  %v8222_v49 = vld [vmem:[%s9731_s26 + $0x120] ss:$16 sps:$4 sm:$0xff]  }
 0x5bb   : > { %v7511_v51 = vpop.f32.mrf.mxu1  ;;  %v8227_v48 = vld [vmem:[%s9731_s26 + $0x324] ss:$16 sps:$4 sm:$0xff]  }
 0x5bc   : > { %3746 = vst [vmem:[%s1172_s27] sm:$0xff] %v3741_v50  ;;  %v3747_v54 = vpack.c.bf16 %v3741_v50, %v3741_v50  ;;  %v8225_v50 = vld [vmem:[%s9731_s26 + $0x320] ss:$16 sps:$4 sm:$0xff]   ;;  %v8230_v51 = vld [vmem:[%s9731_s26 + $0x104] ss:$16 sps:$4 sm:$0xff]  }
 0x5be   : > { %3995 = vmatmul.mubr.bf16.vlgmr.msra.gmra.mxu0 %v3747_v54  ;;  %4036 = vmatmul.mubr.bf16.vlgmr.msra.gmra.mxu1 %v3747_v54  ;;  %v8231_v54 = vld [vmem:[%s9731_s26 + $0x300] ss:$16 sps:$4 sm:$0xff]  }
 0x5bf   : > { %4843 = vmatpush1.bf16.msra.mxu0 %v8138_v52  ;;  %4884 = vmatpush1.bf16.msra.mxu1 %v8141_v53  ;;  %v8233_v52 = vld [vmem:[%s9731_s26 + $0x304] ss:$16 sps:$4 sm:$0xff]   ;;  %v8228_v53 = vld [vmem:[%s9731_s26 + $0x100] ss:$16 sps:$4 sm:$0xff]  }
 0x5c0   : > { %4844 = vmatprep.subr.bf16.mxu0 %v8146_v55  ;;  %4885 = vmatprep.subr.bf16.mxu1 %v8149_v56  ;;  %v8236_v55 = vld [vmem:[%s9731_s26 + $0xec] ss:$16 sps:$4 sm:$0xff]  }
 0x5c1   : > { %v8239_v56 = vld [vmem:[%s9731_s26 + $0x2ec] ss:$16 sps:$4 sm:$0xff]  }
 0x5c3   : > { %4845 = vmatpush1.bf16.msra.mxu0 %v8144_v57  ;;  %4886 = vmatpush1.bf16.msra.mxu1 %v8147_v58  ;;  %v3780_v57 = vld [vmem:[%s10619_s3] sm:$0xf] }
 0x5c4   : > { %4846 = vmatprep.subr.bf16.mxu0 %v8152_v59  ;;  %4887 = vmatprep.subr.bf16.mxu1 %v8155_v60  ;;  %v3785_v58 = vrot.slane %v3780_v57, %v9866_v40  ;;  %v3793_v59 = vrot.slane %v3780_v57, %v9868_v41  ;;  %v3789_v60 = vrot.slane %v3780_v57, %v9870_v42 }
 0x5c7   : > { %4847 = vmatpush1.bf16.msra.mxu0 %v8150_v61  ;;  %4888 = vmatpush1.bf16.msra.mxu1 %v8153_v62  ;;  %v3797_v61 = vrot.slane %v3780_v57, %v9872_v43  ;;  %v8293_v57 = vld [vmem:[%s9731_s26 + $0x3cc] ss:$16 sps:$4 sm:$0xff]  }
 0x5c8   : > { %4848 = vmatprep.subr.bf16.mxu0 %v8158_v63  ;;  %4889 = vmatprep.subr.bf16.mxu1 %v8161_v2 }
 0x5cb   : > { %4849 = vmatpush1.bf16.msra.mxu0 %v8156_v3  ;;  %4890 = vmatpush1.bf16.msra.mxu1 %v8159_v4 }
 0x5cc   : > { %4850 = vmatprep.subr.bf16.mxu0 %v8164_v5  ;;  %4891 = vmatprep.subr.bf16.mxu1 %v8167_v6 }
 0x5cf   : > { %4851 = vmatpush1.bf16.msra.mxu0 %v8162_v7  ;;  %4892 = vmatpush1.bf16.msra.mxu1 %v8165_v9 }
 0x5d0   : > { %4852 = vmatprep.subr.bf16.mxu0 %v8170_v10  ;;  %4893 = vmatprep.subr.bf16.mxu1 %v8173_v11 }
 0x5d3   : > { %4853 = vmatpush1.bf16.msra.mxu0 %v8168_v0  ;;  %4894 = vmatpush1.bf16.msra.mxu1 %v8171_v12 }
 0x5d4   : > { %4854 = vmatprep.subr.bf16.mxu0 %v8176_v13  ;;  %4895 = vmatprep.subr.bf16.mxu1 %v8179_v14 }
 0x5d7   : > { %4855 = vmatpush1.bf16.msra.mxu0 %v8174_v15  ;;  %4896 = vmatpush1.bf16.msra.mxu1 %v8177_v16 }
 0x5d8   : > { %4856 = vmatprep.subr.bf16.mxu0 %v8182_v18  ;;  %4897 = vmatprep.subr.bf16.mxu1 %v8185_v8  ;;  %v8234_v8 = vld [vmem:[%s9731_s26 + $0xe8] ss:$16 sps:$4 sm:$0xff]  }
 0x5db   : > { %4857 = vmatpush1.bf16.msra.mxu0 %v8180_v1  ;;  %4898 = vmatpush1.bf16.msra.mxu1 %v8183_v17  ;;  %v8237_v1 = vld [vmem:[%s9731_s26 + $0x2e8] ss:$16 sps:$4 sm:$0xff]  }
 0x5dc   : > { %4858 = vmatprep.subr.bf16.mxu0 %v8188_v19  ;;  %4899 = vmatprep.subr.bf16.mxu1 %v8191_v20  ;;  %v8242_v20 = vld [vmem:[%s9731_s26 + $0xcc] ss:$16 sps:$4 sm:$0xff]  }
 0x5df   : > { %4859 = vmatpush2.bf16.msra.mxu0 %v8186_v21  ;;  %4900 = vmatpush2.bf16.msra.mxu1 %v8189_v22  ;;  %v8245_v21 = vld [vmem:[%s9731_s26 + $0x2cc] ss:$16 sps:$4 sm:$0xff]   ;;  %v8240_v22 = vld [vmem:[%s9731_s26 + $0xc8] ss:$16 sps:$4 sm:$0xff]  }
 0x5e0   : > { %4860 = vmatprep.subr.bf16.mxu0 %v8194_v23  ;;  %4901 = vmatprep.subr.bf16.mxu1 %v8197_v24  ;;  %v8243_v23 = vld [vmem:[%s9731_s26 + $0x2c8] ss:$16 sps:$4 sm:$0xff]   ;;  %v8248_v24 = vld [vmem:[%s9731_s26 + $0xac] ss:$16 sps:$4 sm:$0xff]  }
 0x5e3   : > { %4861 = vmatpush2.bf16.msra.mxu0 %v8192_v25  ;;  %4902 = vmatpush2.bf16.msra.mxu1 %v8195_v26  ;;  %v8251_v25 = vld [vmem:[%s9731_s26 + $0x2ac] ss:$16 sps:$4 sm:$0xff]   ;;  %v8246_v26 = vld [vmem:[%s9731_s26 + $0xa8] ss:$16 sps:$4 sm:$0xff]  }
 0x5e4   : > { %4862 = vmatprep.subr.bf16.mxu0 %v8200_v27  ;;  %4903 = vmatprep.subr.bf16.mxu1 %v8203_v28  ;;  %v8249_v27 = vld [vmem:[%s9731_s26 + $0x2a8] ss:$16 sps:$4 sm:$0xff]   ;;  %v8254_v28 = vld [vmem:[%s9731_s26 + $0x8c] ss:$16 sps:$4 sm:$0xff]  }
 0x5e7   : > { %4863 = vmatpush2.bf16.msra.mxu0 %v8198_v29  ;;  %4904 = vmatpush2.bf16.msra.mxu1 %v8201_v30  ;;  %v8257_v29 = vld [vmem:[%s9731_s26 + $0x28c] ss:$16 sps:$4 sm:$0xff]   ;;  %v8252_v30 = vld [vmem:[%s9731_s26 + $0x88] ss:$16 sps:$4 sm:$0xff]  }
 0x5e8   : > { %4864 = vmatprep.subr.bf16.mxu0 %v8206_v31  ;;  %4905 = vmatprep.subr.bf16.mxu1 %v8209_v32  ;;  %v8255_v31 = vld [vmem:[%s9731_s26 + $0x288] ss:$16 sps:$4 sm:$0xff]   ;;  %v8260_v32 = vld [vmem:[%s9731_s26 + $0x6c] ss:$16 sps:$4 sm:$0xff]  }
 0x5eb   : > { %4865 = vmatpush2.bf16.msra.mxu0 %v8204_v33  ;;  %4906 = vmatpush2.bf16.msra.mxu1 %v8207_v34  ;;  %v8263_v33 = vld [vmem:[%s9731_s26 + $0x26c] ss:$16 sps:$4 sm:$0xff]   ;;  %v8258_v34 = vld [vmem:[%s9731_s26 + $0x68] ss:$16 sps:$4 sm:$0xff]  }
 0x5ec   : > { %4866 = vmatprep.subr.bf16.mxu0 %v8212_v35  ;;  %4907 = vmatprep.subr.bf16.mxu1 %v8215_v36  ;;  %v8261_v35 = vld [vmem:[%s9731_s26 + $0x268] ss:$16 sps:$4 sm:$0xff]   ;;  %v8266_v36 = vld [vmem:[%s9731_s26 + $0x4c] ss:$16 sps:$4 sm:$0xff]  }
 0x5ef   : > { %4867 = vmatpush2.bf16.msra.mxu0 %v8210_v37  ;;  %4908 = vmatpush2.bf16.msra.mxu1 %v8213_v38  ;;  %v8269_v37 = vld [vmem:[%s9731_s26 + $0x24c] ss:$16 sps:$4 sm:$0xff]   ;;  %v8264_v38 = vld [vmem:[%s9731_s26 + $0x48] ss:$16 sps:$4 sm:$0xff]  }
 0x5f0   : > { %4868 = vmatprep.subr.bf16.mxu0 %v8218_v39  ;;  %4909 = vmatprep.subr.bf16.mxu1 %v8221_v44  ;;  %v8267_v39 = vld [vmem:[%s9731_s26 + $0x248] ss:$16 sps:$4 sm:$0xff]   ;;  %v8272_v44 = vld [vmem:[%s9731_s26 + $0x2c] ss:$16 sps:$4 sm:$0xff]  }
 0x5f3   : > { %4869 = vmatpush2.bf16.msra.mxu0 %v8216_v45  ;;  %4910 = vmatpush2.bf16.msra.mxu1 %v8219_v46  ;;  %v8275_v45 = vld [vmem:[%s9731_s26 + $0x22c] ss:$16 sps:$4 sm:$0xff]   ;;  %v8270_v46 = vld [vmem:[%s9731_s26 + $0x28] ss:$16 sps:$4 sm:$0xff]  }
 0x5f4   : > { %4870 = vmatprep.subr.bf16.mxu0 %v8224_v47  ;;  %4911 = vmatprep.subr.bf16.mxu1 %v8227_v48  ;;  %v8273_v47 = vld [vmem:[%s9731_s26 + $0x228] ss:$16 sps:$4 sm:$0xff]   ;;  %v8278_v48 = vld [vmem:[%s9731_s26 + $0xc] ss:$16 sps:$4 sm:$0xff]  }
 0x5f7   : > { %4871 = vmatpush2.bf16.msra.mxu0 %v8222_v49  ;;  %4912 = vmatpush2.bf16.msra.mxu1 %v8225_v50  ;;  %v8281_v49 = vld [vmem:[%s9731_s26 + $0x20c] ss:$16 sps:$4 sm:$0xff]   ;;  %v8276_v50 = vld [vmem:[%s9731_s26 + $0x8] ss:$16 sps:$4 sm:$0xff]  }
 0x5f8   : > { %4872 = vmatprep.subr.bf16.mxu0 %v8230_v51  ;;  %4913 = vmatprep.subr.bf16.mxu1 %v8233_v52  ;;  %v8279_v51 = vld [vmem:[%s9731_s26 + $0x208] ss:$16 sps:$4 sm:$0xff]   ;;  %v8284_v52 = vld [vmem:[%s9731_s26 + $0x1ec] ss:$16 sps:$4 sm:$0xff]  }
 0x5fb   : > { %4873 = vmatpush2.bf16.msra.mxu0 %v8228_v53  ;;  %4914 = vmatpush2.bf16.msra.mxu1 %v8231_v54  ;;  %v8287_v53 = vld [vmem:[%s9731_s26 + $0x3ec] ss:$16 sps:$4 sm:$0xff]   ;;  %v8282_v54 = vld [vmem:[%s9731_s26 + $0x1e8] ss:$16 sps:$4 sm:$0xff]  }
 0x5fc   : > { %4924 = vmatprep.subr.bf16.mxu0 %v8236_v55  ;;  %4965 = vmatprep.subr.bf16.mxu1 %v8239_v56  ;;  %v8285_v55 = vld [vmem:[%s9731_s26 + $0x3e8] ss:$16 sps:$4 sm:$0xff]   ;;  %v8290_v56 = vld [vmem:[%s9731_s26 + $0x1cc] ss:$16 sps:$4 sm:$0xff]  }
 0x67e   : > { %v3996_v62 = vpop.f32.mrf.mxu0  ;;  %v4037_v63 = vpop.f32.mrf.mxu1 }
 0x67f   : > { %v3997_v2 = vadd.f32 %v3996_v62, %v3785_v58  ;;  %v4038_v3 = vadd.f32 %v4037_v63, %v3793_v59  ;;  %v8288_v58 = vld [vmem:[%s9731_s26 + $0x1c8] ss:$16 sps:$4 sm:$0xff]  }
 0x680   : > { %v3998_v4 = vpop.f32.mrf.mxu0  ;;  %v4039_v5 = vpop.f32.mrf.mxu1  ;;  %v8291_v59 = vld [vmem:[%s9731_s26 + $0x3c8] ss:$16 sps:$4 sm:$0xff]  }
 0x681   : > { %v3999_v6 = vadd.f32 %v3998_v4, %v3789_v60  ;;  %v4040_v7 = vadd.f32 %v4039_v5, %v3797_v61  ;;  %v4044_v9 = vmax.f32 %v3997_v2, 0.0  ;;  %v4046_v10 = vmax.f32 %v4038_v3, 0.0  ;;  %v8296_v60 = vld [vmem:[%s9731_s26 + $0x1ac] ss:$16 sps:$4 sm:$0xff]   ;;  %v8294_v62 = vld [vmem:[%s9731_s26 + $0x1a8] ss:$16 sps:$4 sm:$0xff]  }
 0x682   : > { %v4000_v11 = vpop.f32.mrf.mxu0  ;;  %v4041_v0 = vpop.f32.mrf.mxu1  ;;  %v8299_v61 = vld [vmem:[%s9731_s26 + $0x3ac] ss:$16 sps:$4 sm:$0xff]   ;;  %v8297_v63 = vld [vmem:[%s9731_s26 + $0x3a8] ss:$16 sps:$4 sm:$0xff]  }
 0x683   : > { %v4045_v12 = vmax.f32 %v3999_v6, 0.0  ;;  %v4047_v13 = vmax.f32 %v4040_v7, 0.0  ;;  %v10250_v17 = vpack.c.bf16 %v4044_v9, %v4044_v9  ;;  %v10252_v19 = vpack.c.bf16 %v4046_v10, %v4046_v10  ;;  %v8302_v2 = vld [vmem:[%s9731_s26 + $0x18c] ss:$16 sps:$4 sm:$0xff]   ;;  %v8300_v4 = vld [vmem:[%s9731_s26 + $0x188] ss:$16 sps:$4 sm:$0xff]  }
 0x684   : > { %v4001_v14 = vpop.f32.mrf.mxu0  ;;  %v4042_v15 = vpop.f32.mrf.mxu1  ;;  %v8305_v3 = vld [vmem:[%s9731_s26 + $0x38c] ss:$16 sps:$4 sm:$0xff]   ;;  %v8303_v5 = vld [vmem:[%s9731_s26 + $0x388] ss:$16 sps:$4 sm:$0xff]  }
 0x685   : > { %v4049_v16 = vpack.c.bf16 %v4045_v12, %v4045_v12  ;;  %v4051_v18 = vpack.c.bf16 %v4047_v13, %v4047_v13  ;;  %v8308_v6 = vld [vmem:[%s9731_s26 + $0x16c] ss:$16 sps:$4 sm:$0xff]   ;;  %v8306_v9 = vld [vmem:[%s9731_s26 + $0x168] ss:$16 sps:$4 sm:$0xff]  }
 0x686   : > { %v8311_v7 = vld [vmem:[%s9731_s26 + $0x36c] ss:$16 sps:$4 sm:$0xff]   ;;  %v8309_v10 = vld [vmem:[%s9731_s26 + $0x368] ss:$16 sps:$4 sm:$0xff]  }
 0x687   : > { %4874 = vmatprep.mubr.bf16.mxu0 %v4049_v16  ;;  %4915 = vmatprep.mubr.bf16.mxu1 %v4051_v18  ;;  %v8314_v11 = vld [vmem:[%s9731_s26 + $0x14c] ss:$16 sps:$4 sm:$0xff]   ;;  %v8312_v12 = vld [vmem:[%s9731_s26 + $0x148] ss:$16 sps:$4 sm:$0xff]  }
 0x688   : > { %4875 = vmatmul.mubr.bf16.vlgmr.msra.gmra.mxu0 %v10250_v17  ;;  %4916 = vmatmul.mubr.bf16.vlgmr.msra.gmra.mxu1 %v10252_v19  ;;  %v8317_v0 = vld [vmem:[%s9731_s26 + $0x34c] ss:$16 sps:$4 sm:$0xff]   ;;  %v8315_v13 = vld [vmem:[%s9731_s26 + $0x348] ss:$16 sps:$4 sm:$0xff]  }
 0x689   : > { %4925 = vmatpush1.bf16.msra.mxu0 %v8234_v8  ;;  %4966 = vmatpush1.bf16.msra.mxu1 %v8237_v1  ;;  %v8320_v14 = vld [vmem:[%s9731_s26 + $0x12c] ss:$16 sps:$4 sm:$0xff]  }
 0x68a   : > { %4956 = vmatprep.mubr.bf16.mxu0 %v4049_v16  ;;  %4997 = vmatprep.mubr.bf16.mxu1 %v4051_v18  ;;  %v8323_v15 = vld [vmem:[%s9731_s26 + $0x32c] ss:$16 sps:$4 sm:$0xff]   ;;  %v8318_v16 = vld [vmem:[%s9731_s26 + $0x128] ss:$16 sps:$4 sm:$0xff]  }
 0x68b   : > { %4926 = vmatprep.subr.bf16.mxu0 %v8242_v20  ;;  %4967 = vmatprep.subr.bf16.mxu1 %v8245_v21  ;;  %v8321_v18 = vld [vmem:[%s9731_s26 + $0x328] ss:$16 sps:$4 sm:$0xff]   ;;  %v8326_v8 = vld [vmem:[%s9731_s26 + $0x10c] ss:$16 sps:$4 sm:$0xff]  }
 0x68c   : > { %v8329_v1 = vld [vmem:[%s9731_s26 + $0x30c] ss:$16 sps:$4 sm:$0xff]   ;;  %v8324_v20 = vld [vmem:[%s9731_s26 + $0x108] ss:$16 sps:$4 sm:$0xff]  }
 0x68d   : > { %4927 = vmatpush1.bf16.msra.mxu0 %v8240_v22  ;;  %4968 = vmatpush1.bf16.msra.mxu1 %v8243_v23  ;;  %v8327_v21 = vld [vmem:[%s9731_s26 + $0x308] ss:$16 sps:$4 sm:$0xff]   ;;  %v8332_v22 = vld [vmem:[%s9739_s6 + $0xe4] ss:$16 sps:$4 sm:$0xff]   ;;  %s10620_s26 = scalar_lea.vmem [#allocation19], %s9688_s25 }
 0x68e   : > { %4928 = vmatprep.subr.bf16.mxu0 %v8248_v24  ;;  %4969 = vmatprep.subr.bf16.mxu1 %v8251_v25  ;;  %v8330_v23 = vld [vmem:[%s9739_s6 + $0xe0] ss:$16 sps:$4 sm:$0xff]   ;;  %v8335_v24 = vld [vmem:[%s9739_s6 + $0xc4] ss:$16 sps:$4 sm:$0xff]  }
 0x68f   : > { %v8333_v25 = vld [vmem:[%s9739_s6 + $0xc0] ss:$16 sps:$4 sm:$0xff]  }
 0x691   : > { %4929 = vmatpush1.bf16.msra.mxu0 %v8246_v26  ;;  %4970 = vmatpush1.bf16.msra.mxu1 %v8249_v27  ;;  %v8338_v26 = vld [vmem:[%s9739_s6 + $0xa4] ss:$16 sps:$4 sm:$0xff]   ;;  %v8336_v27 = vld [vmem:[%s9739_s6 + $0xa0] ss:$16 sps:$4 sm:$0xff]  }
 0x692   : > { %4930 = vmatprep.subr.bf16.mxu0 %v8254_v28  ;;  %4971 = vmatprep.subr.bf16.mxu1 %v8257_v29  ;;  %v8341_v28 = vld [vmem:[%s9739_s6 + $0x84] ss:$16 sps:$4 sm:$0xff]   ;;  %v8339_v29 = vld [vmem:[%s9739_s6 + $0x80] ss:$16 sps:$4 sm:$0xff]  }
 0x695   : > { %4931 = vmatpush1.bf16.msra.mxu0 %v8252_v30  ;;  %4972 = vmatpush1.bf16.msra.mxu1 %v8255_v31  ;;  %v8378_v30 = vld [vmem:[%s9739_s6 + $0x2e0] ss:$16 sps:$4 sm:$0xff]  }
 0x696   : > { %4932 = vmatprep.subr.bf16.mxu0 %v8260_v32  ;;  %4973 = vmatprep.subr.bf16.mxu1 %v8263_v33  ;;  %v8342_v31 = vld [vmem:[%s9739_s6 + $0x60] ss:$16 sps:$4 sm:$0xff]   ;;  %v8386_v33 = vld [vmem:[%s9739_s6 + $0x2c4] ss:$16 sps:$4 sm:$0xff]  }
 0x697   : > { %v8384_v32 = vld [vmem:[%s9739_s6 + $0x2c0] ss:$16 sps:$4 sm:$0xff]  }
 0x699   : > { %4933 = vmatpush1.bf16.msra.mxu0 %v8258_v34  ;;  %4974 = vmatpush1.bf16.msra.mxu1 %v8261_v35  ;;  %v8347_v34 = vld [vmem:[%s9739_s6 + $0x44] ss:$16 sps:$4 sm:$0xff]   ;;  %v8345_v35 = vld [vmem:[%s9739_s6 + $0x40] ss:$16 sps:$4 sm:$0xff]  }
 0x69a   : > { %4934 = vmatprep.subr.bf16.mxu0 %v8266_v36  ;;  %4975 = vmatprep.subr.bf16.mxu1 %v8269_v37  ;;  %v8390_v36 = vld [vmem:[%s9739_s6 + $0x2a0] ss:$16 sps:$4 sm:$0xff]   ;;  %v8392_v37 = vld [vmem:[%s9739_s6 + $0x2a4] ss:$16 sps:$4 sm:$0xff]  }
 0x69d   : > { %4935 = vmatpush1.bf16.msra.mxu0 %v8264_v38  ;;  %4976 = vmatpush1.bf16.msra.mxu1 %v8267_v39  ;;  %v8350_v38 = vld [vmem:[%s9739_s6 + $0x24] ss:$16 sps:$4 sm:$0xff]   ;;  %v8348_v39 = vld [vmem:[%s9739_s6 + $0x20] ss:$16 sps:$4 sm:$0xff]  }
 0x69e   : > { %4936 = vmatprep.subr.bf16.mxu0 %v8272_v44  ;;  %4977 = vmatprep.subr.bf16.mxu1 %v8275_v45  ;;  %v8396_v44 = vld [vmem:[%s9739_s6 + $0x280] ss:$16 sps:$4 sm:$0xff]   ;;  %v8398_v45 = vld [vmem:[%s9739_s6 + $0x284] ss:$16 sps:$4 sm:$0xff]  }
 0x6a1   : > { %4937 = vmatpush1.bf16.msra.mxu0 %v8270_v46  ;;  %4978 = vmatpush1.bf16.msra.mxu1 %v8273_v47  ;;  %v8353_v46 = vld [vmem:[%s9739_s6 + $0x4] ss:$16 sps:$4 sm:$0xff]   ;;  %v8351_v47 = vld [vmem:[%s9739_s6] ss:$16 sps:$4 sm:$0xff]  }
 0x6a2   : > { %4938 = vmatprep.subr.bf16.mxu0 %v8278_v48  ;;  %4979 = vmatprep.subr.bf16.mxu1 %v8281_v49  ;;  %v8402_v48 = vld [vmem:[%s9739_s6 + $0x260] ss:$16 sps:$4 sm:$0xff]   ;;  %v8404_v49 = vld [vmem:[%s9739_s6 + $0x264] ss:$16 sps:$4 sm:$0xff]  }
 0x6a5   : > { %4939 = vmatpush1.bf16.msra.mxu0 %v8276_v50  ;;  %4980 = vmatpush1.bf16.msra.mxu1 %v8279_v51  ;;  %v8356_v50 = vld [vmem:[%s9739_s6 + $0x1e4] ss:$16 sps:$4 sm:$0xff]   ;;  %v8354_v51 = vld [vmem:[%s9739_s6 + $0x1e0] ss:$16 sps:$4 sm:$0xff]  }
 0x6a6   : > { %4940 = vmatprep.subr.bf16.mxu0 %v8284_v52  ;;  %4981 = vmatprep.subr.bf16.mxu1 %v8287_v53  ;;  %v8408_v52 = vld [vmem:[%s9739_s6 + $0x240] ss:$16 sps:$4 sm:$0xff]   ;;  %v8410_v53 = vld [vmem:[%s9739_s6 + $0x244] ss:$16 sps:$4 sm:$0xff]  }
 0x6a9   : > { %4941 = vmatpush2.bf16.msra.mxu0 %v8282_v54  ;;  %4982 = vmatpush2.bf16.msra.mxu1 %v8285_v55  ;;  %v8359_v54 = vld [vmem:[%s9739_s6 + $0x1c4] ss:$16 sps:$4 sm:$0xff]   ;;  %v8357_v55 = vld [vmem:[%s9739_s6 + $0x1c0] ss:$16 sps:$4 sm:$0xff]  }
 0x6aa   : > { %4942 = vmatprep.subr.bf16.mxu0 %v8290_v56  ;;  %4983 = vmatprep.subr.bf16.mxu1 %v8293_v57  ;;  %v8414_v56 = vld [vmem:[%s9739_s6 + $0x220] ss:$16 sps:$4 sm:$0xff]   ;;  %v8416_v57 = vld [vmem:[%s9739_s6 + $0x224] ss:$16 sps:$4 sm:$0xff]  }
 0x6ad   : > { %4943 = vmatpush2.bf16.msra.mxu0 %v8288_v58  ;;  %4984 = vmatpush2.bf16.msra.mxu1 %v8291_v59  ;;  %v8362_v58 = vld [vmem:[%s9739_s6 + $0x1a4] ss:$16 sps:$4 sm:$0xff]   ;;  %v8360_v59 = vld [vmem:[%s9739_s6 + $0x1a0] ss:$16 sps:$4 sm:$0xff]  }
 0x6ae   : > { %4944 = vmatprep.subr.bf16.mxu0 %v8296_v60  ;;  %4985 = vmatprep.subr.bf16.mxu1 %v8299_v61  ;;  %v8420_v60 = vld [vmem:[%s9739_s6 + $0x200] ss:$16 sps:$4 sm:$0xff]   ;;  %v8422_v61 = vld [vmem:[%s9739_s6 + $0x204] ss:$16 sps:$4 sm:$0xff]  }
 0x6b1   : > { %4945 = vmatpush2.bf16.msra.mxu0 %v8294_v62  ;;  %4986 = vmatpush2.bf16.msra.mxu1 %v8297_v63  ;;  %v8365_v62 = vld [vmem:[%s9739_s6 + $0x184] ss:$16 sps:$4 sm:$0xff]   ;;  %v8363_v63 = vld [vmem:[%s9739_s6 + $0x180] ss:$16 sps:$4 sm:$0xff]  }
 0x6b2   : > { %4946 = vmatprep.subr.bf16.mxu0 %v8302_v2  ;;  %4987 = vmatprep.subr.bf16.mxu1 %v8305_v3  ;;  %v8426_v2 = vld [vmem:[%s9739_s6 + $0x3e0] ss:$16 sps:$4 sm:$0xff]   ;;  %v8428_v3 = vld [vmem:[%s9739_s6 + $0x3e4] ss:$16 sps:$4 sm:$0xff]  }
 0x6b5   : > { %4947 = vmatpush2.bf16.msra.mxu0 %v8300_v4  ;;  %4988 = vmatpush2.bf16.msra.mxu1 %v8303_v5  ;;  %v8368_v4 = vld [vmem:[%s9739_s6 + $0x164] ss:$16 sps:$4 sm:$0xff]   ;;  %v8366_v5 = vld [vmem:[%s9739_s6 + $0x160] ss:$16 sps:$4 sm:$0xff]  }
 0x6b6   : > { %4948 = vmatprep.subr.bf16.mxu0 %v8308_v6  ;;  %4989 = vmatprep.subr.bf16.mxu1 %v8311_v7  ;;  %v8432_v6 = vld [vmem:[%s9739_s6 + $0x3c0] ss:$16 sps:$4 sm:$0xff]   ;;  %v8434_v7 = vld [vmem:[%s9739_s6 + $0x3c4] ss:$16 sps:$4 sm:$0xff]  }
 0x6b9   : > { %4949 = vmatpush2.bf16.msra.mxu0 %v8306_v9  ;;  %4990 = vmatpush2.bf16.msra.mxu1 %v8309_v10  ;;  %v8371_v9 = vld [vmem:[%s9739_s6 + $0x144] ss:$16 sps:$4 sm:$0xff]   ;;  %v8369_v10 = vld [vmem:[%s9739_s6 + $0x140] ss:$16 sps:$4 sm:$0xff]  }
 0x6ba   : > { %4950 = vmatprep.subr.bf16.mxu0 %v8314_v11  ;;  %4991 = vmatprep.subr.bf16.mxu1 %v8317_v0  ;;  %v8438_v11 = vld [vmem:[%s9739_s6 + $0x3a0] ss:$16 sps:$4 sm:$0xff]   ;;  %v8440_v0 = vld [vmem:[%s9739_s6 + $0x3a4] ss:$16 sps:$4 sm:$0xff]  }
 0x6bd   : > { %4951 = vmatpush2.bf16.msra.mxu0 %v8312_v12  ;;  %4992 = vmatpush2.bf16.msra.mxu1 %v8315_v13  ;;  %v8374_v12 = vld [vmem:[%s9739_s6 + $0x124] ss:$16 sps:$4 sm:$0xff]   ;;  %v8372_v13 = vld [vmem:[%s9739_s6 + $0x120] ss:$16 sps:$4 sm:$0xff]  }
 0x6be   : > { %4952 = vmatprep.subr.bf16.mxu0 %v8320_v14  ;;  %4993 = vmatprep.subr.bf16.mxu1 %v8323_v15  ;;  %v8444_v14 = vld [vmem:[%s9739_s6 + $0x380] ss:$16 sps:$4 sm:$0xff]   ;;  %v8446_v15 = vld [vmem:[%s9739_s6 + $0x384] ss:$16 sps:$4 sm:$0xff]  }
 0x6c1   : > { %4953 = vmatpush2.bf16.msra.mxu0 %v8318_v16  ;;  %4994 = vmatpush2.bf16.msra.mxu1 %v8321_v18  ;;  %v8377_v16 = vld [vmem:[%s9739_s6 + $0x104] ss:$16 sps:$4 sm:$0xff]   ;;  %v8375_v18 = vld [vmem:[%s9739_s6 + $0x100] ss:$16 sps:$4 sm:$0xff]  }
 0x6c2   : > { %4954 = vmatprep.subr.bf16.mxu0 %v8326_v8  ;;  %4995 = vmatprep.subr.bf16.mxu1 %v8329_v1  ;;  %v8450_v8 = vld [vmem:[%s9739_s6 + $0x360] ss:$16 sps:$4 sm:$0xff]   ;;  %v8452_v1 = vld [vmem:[%s9739_s6 + $0x364] ss:$16 sps:$4 sm:$0xff]  }
 0x6c5   : > { %4955 = vmatpush2.bf16.msra.mxu0 %v8324_v20  ;;  %4996 = vmatpush2.bf16.msra.mxu1 %v8327_v21  ;;  %v8383_v20 = vld [vmem:[%s9739_s6 + $0xec] ss:$16 sps:$4 sm:$0xff]   ;;  %v8456_v21 = vld [vmem:[%s9739_s6 + $0x340] ss:$16 sps:$4 sm:$0xff]  }
 0x6c6   : > { %5804 = vmatprep.subr.bf16.mxu0 %v8332_v22  ;;  %v8458_v22 = vld [vmem:[%s9739_s6 + $0x344] ss:$16 sps:$4 sm:$0xff]  }
 0x6c8   : > { %4957 = vmatmul.mubr.bf16.vlgmr.msra.gmra.mxu0 %v10250_v17  ;;  %4998 = vmatmul.mubr.bf16.vlgmr.msra.gmra.mxu1 %v10252_v19  ;;  %v8380_v17 = vld [vmem:[%s9739_s6 + $0x2e4] ss:$16 sps:$4 sm:$0xff]  }
 0x6c9   : > { %5805 = vmatpush1.bf16.msra.mxu0 %v8330_v23  ;;  %v8344_v19 = vld [vmem:[%s9739_s6 + $0x64] ss:$16 sps:$4 sm:$0xff]   ;;  %5845 = vmatprep.subr.bf16.mxu1 %v8380_v17 }
 0x6ca   : > { %5806 = vmatprep.subr.bf16.mxu0 %v8335_v24  ;;  %5846 = vmatpush1.bf16.msra.mxu1 %v8378_v30  ;;  %v8464_v23 = vld [vmem:[%s9739_s6 + $0x324] ss:$16 sps:$4 sm:$0xff]   ;;  %v8462_v24 = vld [vmem:[%s9739_s6 + $0x320] ss:$16 sps:$4 sm:$0xff]  }
 0x6cb   : > { %5847 = vmatprep.subr.bf16.mxu1 %v8386_v33 }
 0x6cd   : > { %5807 = vmatpush1.bf16.msra.mxu0 %v8333_v25  ;;  %v8470_v25 = vld [vmem:[%s9739_s6 + $0x304] ss:$16 sps:$4 sm:$0xff]  }
 0x6ce   : > { %5808 = vmatprep.subr.bf16.mxu0 %v8338_v26  ;;  %5848 = vmatpush1.bf16.msra.mxu1 %v8384_v32  ;;  %v8468_v26 = vld [vmem:[%s9739_s6 + $0x300] ss:$16 sps:$4 sm:$0xff]  }
 0x6cf   : > { %5849 = vmatprep.subr.bf16.mxu1 %v8392_v37 }
 0x6d1   : > { %5809 = vmatpush1.bf16.msra.mxu0 %v8336_v27  ;;  %v8476_v27 = vld [vmem:[%s9739_s6 + $0x2ec] ss:$16 sps:$4 sm:$0xff]  }
 0x6d2   : > { %5810 = vmatprep.subr.bf16.mxu0 %v8341_v28  ;;  %5850 = vmatpush1.bf16.msra.mxu1 %v8390_v36  ;;  %v10386_v28 = vld [vmem:[%s10620_s26] sm:$0xf] }
 0x6d3   : > { %5851 = vmatprep.subr.bf16.mxu1 %v8398_v45  ;;  %v4189_v30 = vrot.slane %v10386_v28, %v9870_v42 }
 0x6d5   : > { %5811 = vmatpush1.bf16.msra.mxu0 %v8339_v29  ;;  %v4185_v29 = vrot.slane %v10386_v28, %v9866_v40 }
 0x6d6   : > { %5812 = vmatprep.subr.bf16.mxu0 %v8344_v19  ;;  %5852 = vmatpush1.bf16.msra.mxu1 %v8396_v44 }
 0x6d7   : > { %5853 = vmatprep.subr.bf16.mxu1 %v8404_v49 }
 0x6d9   : > { %5813 = vmatpush1.bf16.msra.mxu0 %v8342_v31 }
 0x6da   : > { %5814 = vmatprep.subr.bf16.mxu0 %v8347_v34  ;;  %5854 = vmatpush1.bf16.msra.mxu1 %v8402_v48  ;;  %v8381_v48 = vld [vmem:[%s9739_s6 + $0xe8] ss:$16 sps:$4 sm:$0xff]  }
 0x6db   : > { %5855 = vmatprep.subr.bf16.mxu1 %v8410_v53  ;;  %v8393_v53 = vld [vmem:[%s9739_s6 + $0xa8] ss:$16 sps:$4 sm:$0xff]  }
 0x6dd   : > { %5815 = vmatpush1.bf16.msra.mxu0 %v8345_v35 }
 0x6de   : > { %5816 = vmatprep.subr.bf16.mxu0 %v8350_v38  ;;  %5856 = vmatpush1.bf16.msra.mxu1 %v8408_v52  ;;  %v8395_v52 = vld [vmem:[%s9739_s6 + $0xac] ss:$16 sps:$4 sm:$0xff]  }
 0x6df   : > { %5857 = vmatprep.subr.bf16.mxu1 %v8416_v57  ;;  %v8405_v57 = vld [vmem:[%s9739_s6 + $0x68] ss:$16 sps:$4 sm:$0xff]  }
 0x6e1   : > { %5817 = vmatpush1.bf16.msra.mxu0 %v8348_v39 }
 0x6e2   : > { %5818 = vmatprep.subr.bf16.mxu0 %v8353_v46  ;;  %5858 = vmatpush1.bf16.msra.mxu1 %v8414_v56  ;;  %v8407_v56 = vld [vmem:[%s9739_s6 + $0x6c] ss:$16 sps:$4 sm:$0xff]  }
 0x6e3   : > { %5859 = vmatprep.subr.bf16.mxu1 %v8422_v61  ;;  %v8417_v61 = vld [vmem:[%s9739_s6 + $0x28] ss:$16 sps:$4 sm:$0xff]  }
 0x6e5   : > { %5819 = vmatpush1.bf16.msra.mxu0 %v8351_v47 }
 0x6e6   : > { %5820 = vmatprep.subr.bf16.mxu0 %v8356_v50  ;;  %5860 = vmatpush1.bf16.msra.mxu1 %v8420_v60  ;;  %v8389_v50 = vld [vmem:[%s9739_s6 + $0xcc] ss:$16 sps:$4 sm:$0xff]  }
 0x6e7   : > { %5861 = vmatprep.subr.bf16.mxu1 %v8428_v3  ;;  %v8419_v60 = vld [vmem:[%s9739_s6 + $0x2c] ss:$16 sps:$4 sm:$0xff]   ;;  %v8429_v3 = vld [vmem:[%s9739_s6 + $0x1e8] ss:$16 sps:$4 sm:$0xff]  }
 0x6e9   : > { %5821 = vmatpush2.bf16.msra.mxu0 %v8354_v51  ;;  %v8387_v51 = vld [vmem:[%s9739_s6 + $0xc8] ss:$16 sps:$4 sm:$0xff]  }
 0x6ea   : > { %5822 = vmatprep.subr.bf16.mxu0 %v8359_v54  ;;  %5862 = vmatpush2.bf16.msra.mxu1 %v8426_v2  ;;  %v8401_v54 = vld [vmem:[%s9739_s6 + $0x8c] ss:$16 sps:$4 sm:$0xff]  }
 0x6eb   : > { %5863 = vmatprep.subr.bf16.mxu1 %v8434_v7  ;;  %v8431_v2 = vld [vmem:[%s9739_s6 + $0x1ec] ss:$16 sps:$4 sm:$0xff]   ;;  %v8441_v7 = vld [vmem:[%s9739_s6 + $0x1a8] ss:$16 sps:$4 sm:$0xff]  }
 0x6ed   : > { %5823 = vmatpush2.bf16.msra.mxu0 %v8357_v55  ;;  %v8399_v55 = vld [vmem:[%s9739_s6 + $0x88] ss:$16 sps:$4 sm:$0xff]  }
 0x6ee   : > { %5824 = vmatprep.subr.bf16.mxu0 %v8362_v58  ;;  %5864 = vmatpush2.bf16.msra.mxu1 %v8432_v6  ;;  %v8413_v58 = vld [vmem:[%s9739_s6 + $0x4c] ss:$16 sps:$4 sm:$0xff]  }
 0x6ef   : > { %5865 = vmatprep.subr.bf16.mxu1 %v8440_v0  ;;  %v8443_v6 = vld [vmem:[%s9739_s6 + $0x1ac] ss:$16 sps:$4 sm:$0xff]   ;;  %v8453_v0 = vld [vmem:[%s9739_s6 + $0x168] ss:$16 sps:$4 sm:$0xff]  }
 0x6f1   : > { %5825 = vmatpush2.bf16.msra.mxu0 %v8360_v59  ;;  %v8411_v59 = vld [vmem:[%s9739_s6 + $0x48] ss:$16 sps:$4 sm:$0xff]  }
 0x6f2   : > { %5826 = vmatprep.subr.bf16.mxu0 %v8365_v62  ;;  %5866 = vmatpush2.bf16.msra.mxu1 %v8438_v11  ;;  %v8425_v62 = vld [vmem:[%s9739_s6 + $0xc] ss:$16 sps:$4 sm:$0xff]  }
 0x6f3   : > { %5867 = vmatprep.subr.bf16.mxu1 %v8446_v15  ;;  %v8455_v11 = vld [vmem:[%s9739_s6 + $0x16c] ss:$16 sps:$4 sm:$0xff]  }
 0x6f4   : > { %v8467_v15 = vld [vmem:[%s9739_s6 + $0x12c] ss:$16 sps:$4 sm:$0xff]  }
 0x6f5   : > { %5827 = vmatpush2.bf16.msra.mxu0 %v8363_v63  ;;  %v8423_v63 = vld [vmem:[%s9739_s6 + $0x8] ss:$16 sps:$4 sm:$0xff]  }
 0x6f6   : > { %5828 = vmatprep.subr.bf16.mxu0 %v8368_v4  ;;  %5868 = vmatpush2.bf16.msra.mxu1 %v8444_v14  ;;  %v8437_v4 = vld [vmem:[%s9739_s6 + $0x1cc] ss:$16 sps:$4 sm:$0xff]   ;;  %v8459_v14 = vld [vmem:[%s9739_s6 + $0x148] ss:$16 sps:$4 sm:$0xff]  }
 0x6f7   : > { %5869 = vmatprep.subr.bf16.mxu1 %v8452_v1 }
 0x6f9   : > { %5829 = vmatpush2.bf16.msra.mxu0 %v8366_v5  ;;  %v8435_v5 = vld [vmem:[%s9739_s6 + $0x1c8] ss:$16 sps:$4 sm:$0xff]  }
 0x6fa   : > { %5830 = vmatprep.subr.bf16.mxu0 %v8371_v9  ;;  %5870 = vmatpush2.bf16.msra.mxu1 %v8450_v8  ;;  %v8449_v9 = vld [vmem:[%s9739_s6 + $0x18c] ss:$16 sps:$4 sm:$0xff]  }
 0x6fb   : > { %5871 = vmatprep.subr.bf16.mxu1 %v8458_v22 }
 0x6fd   : > { %5831 = vmatpush2.bf16.msra.mxu0 %v8369_v10  ;;  %v8447_v10 = vld [vmem:[%s9739_s6 + $0x188] ss:$16 sps:$4 sm:$0xff]  }
 0x6fe   : > { %5832 = vmatprep.subr.bf16.mxu0 %v8374_v12  ;;  %5872 = vmatpush2.bf16.msra.mxu1 %v8456_v21  ;;  %v8461_v12 = vld [vmem:[%s9739_s6 + $0x14c] ss:$16 sps:$4 sm:$0xff]  }
 0x6ff   : > { %5873 = vmatprep.subr.bf16.mxu1 %v8464_v23  ;;  %v8473_v23 = vld [vmem:[%s9739_s6 + $0x10c] ss:$16 sps:$4 sm:$0xff]  }
 0x701   : > { %5833 = vmatpush2.bf16.msra.mxu0 %v8372_v13  ;;  %v4193_v13 = vrot.slane %v10386_v28, %v9868_v41 }
 0x702   : > { %5834 = vmatprep.subr.bf16.mxu0 %v8377_v16  ;;  %5874 = vmatpush2.bf16.msra.mxu1 %v8462_v24  ;;  %v4197_v16 = vrot.slane %v10386_v28, %v9872_v43 }
 0x703   : > { %5875 = vmatprep.subr.bf16.mxu1 %v8470_v25 }
 0x705   : > { %5835 = vmatpush2.bf16.msra.mxu0 %v8375_v18 }
 0x706   : > { %5886 = vmatprep.subr.bf16.mxu0 %v8383_v20  ;;  %5876 = vmatpush2.bf16.msra.mxu1 %v8468_v26  ;;  %v8465_v20 = vld [vmem:[%s9739_s6 + $0x128] ss:$16 sps:$4 sm:$0xff]  }
 0x707   : > { %5927 = vmatprep.subr.bf16.mxu1 %v8476_v27 }
 0x748   : > { %v4876_v17 = vpop.f32.mrf.mxu0  ;;  %v4917_v19 = vpop.f32.mrf.mxu1 }
 0x749   : > { %v4877_v31 = vadd.f32 %v4876_v17, %v4185_v29 }
 0x74a   : > { %v4878_v32 = vpop.f32.mrf.mxu0  ;;  %v4919_v33 = vpop.f32.mrf.mxu1 }
 0x74b   : > { %v4918_v34 = vadd.f32 %v4917_v19, %v4877_v31  ;;  %v4879_v35 = vadd.f32 %v4878_v32, %v4189_v30  ;;  %v8471_v30 = vld [vmem:[%s9739_s6 + $0x108] ss:$16 sps:$4 sm:$0xff]  }
 0x74c   : > { %v4880_v36 = vpop.f32.mrf.mxu0  ;;  %v4921_v37 = vpop.f32.mrf.mxu1 }
 0x74d   : > { %v4920_v38 = vadd.f32 %v4919_v33, %v4879_v35  ;;  %v5006_v39 = vmax.f32 %v4918_v34, 0.0  ;;  %v8474_v33 = vld [vmem:[%s9739_s6 + $0x2e8] ss:$16 sps:$4 sm:$0xff]   ;;  %v8479_v35 = vld [vmem:[%s9739_s6 + $0x2cc] ss:$16 sps:$4 sm:$0xff]  }
 0x74e   : > { %v4881_v44 = vpop.f32.mrf.mxu0  ;;  %v4922_v45 = vpop.f32.mrf.mxu1  ;;  %v8477_v36 = vld [vmem:[%s9739_s6 + $0x2c8] ss:$16 sps:$4 sm:$0xff]   ;;  %v8482_v37 = vld [vmem:[%s9739_s6 + $0x2ac] ss:$16 sps:$4 sm:$0xff]  }
 0x74f   : > { %v5007_v46 = vmax.f32 %v4920_v38, 0.0  ;;  %v10393_v49 = vpack.c.bf16 %v5006_v39, %v5006_v39  ;;  %v8480_v38 = vld [vmem:[%s9739_s6 + $0x2a8] ss:$16 sps:$4 sm:$0xff]   ;;  %v8485_v39 = vld [vmem:[%s9739_s6 + $0x28c] ss:$16 sps:$4 sm:$0xff]   ;;  %v8522_v44 = vld [vmem:[%s9748_s2 + $0x78] sm:$0xff]  }
 0x750   : > { %v8523_v45 = vld [vmem:[%s9748_s2 + $0x38] sm:$0xff]  }
 0x751   : > { %v5011_v47 = vpack.c.bf16 %v5007_v46, %v5007_v46  ;;  %v8524_v46 = vld [vmem:[%s9748_s2 + $0x70] sm:$0xff]  }
 0x753   : > { %5836 = vmatprep.mubr.bf16.mxu0 %v5011_v47 }
 0x754   : > { %5837 = vmatmul.mubr.bf16.vlgmr.msra.gmra.mxu0 %v10393_v49 }
 0x755   : > { %5887 = vmatpush1.bf16.msra.mxu0 %v8381_v48  ;;  %5918 = vmatprep.mubr.bf16.mxu0 %v5011_v47  ;;  %v8483_v47 = vld [vmem:[%s9739_s6 + $0x288] ss:$16 sps:$4 sm:$0xff]  }
 0x756   : > { %5888 = vmatprep.subr.bf16.mxu0 %v8389_v50  ;;  %v8525_v48 = vld [vmem:[%s9748_s2 + $0x30] sm:$0xff]   ;;  %v8526_v50 = vld [vmem:[%s9748_s2 + $0x68] sm:$0xff]  }
 0x759   : > { %5889 = vmatpush1.bf16.msra.mxu0 %v8387_v51  ;;  %v8486_v51 = vld [vmem:[%s9739_s6 + $0x268] ss:$16 sps:$4 sm:$0xff]  }
 0x75a   : > { %5890 = vmatprep.subr.bf16.mxu0 %v8395_v52  ;;  %v8527_v52 = vld [vmem:[%s9748_s2 + $0x28] sm:$0xff]  }
 0x75d   : > { %5891 = vmatpush1.bf16.msra.mxu0 %v8393_v53  ;;  %v8491_v53 = vld [vmem:[%s9739_s6 + $0x24c] ss:$16 sps:$4 sm:$0xff]  }
 0x75e   : > { %5892 = vmatprep.subr.bf16.mxu0 %v8401_v54  ;;  %v8528_v54 = vld [vmem:[%s9748_s2 + $0x60] sm:$0xff]  }
 0x761   : > { %5893 = vmatpush1.bf16.msra.mxu0 %v8399_v55  ;;  %v8489_v55 = vld [vmem:[%s9739_s6 + $0x248] ss:$16 sps:$4 sm:$0xff]  }
 0x762   : > { %5894 = vmatprep.subr.bf16.mxu0 %v8407_v56  ;;  %v8529_v56 = vld [vmem:[%s9748_s2 + $0x20] sm:$0xff]  }
 0x765   : > { %5895 = vmatpush1.bf16.msra.mxu0 %v8405_v57  ;;  %v8494_v57 = vld [vmem:[%s9739_s6 + $0x22c] ss:$16 sps:$4 sm:$0xff]  }
 0x766   : > { %5896 = vmatprep.subr.bf16.mxu0 %v8413_v58  ;;  %v8530_v58 = vld [vmem:[%s9748_s2 + $0x58] sm:$0xff]  }
 0x769   : > { %5897 = vmatpush1.bf16.msra.mxu0 %v8411_v59  ;;  %v8492_v59 = vld [vmem:[%s9739_s6 + $0x228] ss:$16 sps:$4 sm:$0xff]  }
 0x76a   : > { %5898 = vmatprep.subr.bf16.mxu0 %v8419_v60  ;;  %v8531_v60 = vld [vmem:[%s9748_s2 + $0x18] sm:$0xff]  }
 0x76d   : > { %5899 = vmatpush1.bf16.msra.mxu0 %v8417_v61  ;;  %v8497_v61 = vld [vmem:[%s9739_s6 + $0x20c] ss:$16 sps:$4 sm:$0xff]  }
 0x76e   : > { %5900 = vmatprep.subr.bf16.mxu0 %v8425_v62  ;;  %v8532_v62 = vld [vmem:[%s9748_s2 + $0x50] sm:$0xff]  }
 0x771   : > { %5901 = vmatpush1.bf16.msra.mxu0 %v8423_v63  ;;  %v8495_v63 = vld [vmem:[%s9739_s6 + $0x208] ss:$16 sps:$4 sm:$0xff]  }
 0x772   : > { %5902 = vmatprep.subr.bf16.mxu0 %v8431_v2  ;;  %v8533_v2 = vld [vmem:[%s9748_s2 + $0x10] sm:$0xff]  }
 0x775   : > { %5903 = vmatpush2.bf16.msra.mxu0 %v8429_v3  ;;  %v8500_v3 = vld [vmem:[%s9739_s6 + $0x3ec] ss:$16 sps:$4 sm:$0xff]  }
 0x776   : > { %5904 = vmatprep.subr.bf16.mxu0 %v8437_v4  ;;  %v8498_v4 = vld [vmem:[%s9739_s6 + $0x3e8] ss:$16 sps:$4 sm:$0xff]  }
 0x779   : > { %5905 = vmatpush2.bf16.msra.mxu0 %v8435_v5  ;;  %v8503_v5 = vld [vmem:[%s9739_s6 + $0x3cc] ss:$16 sps:$4 sm:$0xff]  }
 0x77a   : > { %5906 = vmatprep.subr.bf16.mxu0 %v8443_v6  ;;  %v8501_v6 = vld [vmem:[%s9739_s6 + $0x3c8] ss:$16 sps:$4 sm:$0xff]  }
 0x77d   : > { %5907 = vmatpush2.bf16.msra.mxu0 %v8441_v7  ;;  %v8506_v7 = vld [vmem:[%s9739_s6 + $0x3ac] ss:$16 sps:$4 sm:$0xff]  }
 0x77e   : > { %5908 = vmatprep.subr.bf16.mxu0 %v8449_v9  ;;  %v8504_v9 = vld [vmem:[%s9739_s6 + $0x3a8] ss:$16 sps:$4 sm:$0xff]  }
 0x781   : > { %5909 = vmatpush2.bf16.msra.mxu0 %v8447_v10  ;;  %v8509_v10 = vld [vmem:[%s9739_s6 + $0x38c] ss:$16 sps:$4 sm:$0xff]  }
 0x782   : > { %5910 = vmatprep.subr.bf16.mxu0 %v8455_v11  ;;  %v8507_v11 = vld [vmem:[%s9739_s6 + $0x388] ss:$16 sps:$4 sm:$0xff]  }
 0x785   : > { %5911 = vmatpush2.bf16.msra.mxu0 %v8453_v0  ;;  %v8512_v0 = vld [vmem:[%s9739_s6 + $0x36c] ss:$16 sps:$4 sm:$0xff]  }
 0x786   : > { %5912 = vmatprep.subr.bf16.mxu0 %v8461_v12  ;;  %v8510_v12 = vld [vmem:[%s9739_s6 + $0x368] ss:$16 sps:$4 sm:$0xff]  }
 0x788   : > { %v4958_v18 = vpop.f32.mrf.mxu0  ;;  %v4999_v8 = vpop.f32.mrf.mxu1 }
 0x789   : > { %v4959_v1 = vadd.f32 %v4958_v18, %v4193_v13  ;;  %5913 = vmatpush2.bf16.msra.mxu0 %v8459_v14  ;;  %v8515_v13 = vld [vmem:[%s9739_s6 + $0x34c] ss:$16 sps:$4 sm:$0xff]   ;;  %v8513_v14 = vld [vmem:[%s9739_s6 + $0x348] ss:$16 sps:$4 sm:$0xff]  }
 0x78a   : > { %v4960_v21 = vpop.f32.mrf.mxu0  ;;  %v5001_v22 = vpop.f32.mrf.mxu1  ;;  %5914 = vmatprep.subr.bf16.mxu0 %v8467_v15  ;;  %v8518_v15 = vld [vmem:[%s9739_s6 + $0x32c] ss:$16 sps:$4 sm:$0xff]  }
 0x78b   : > { %v5000_v24 = vadd.f32 %v4999_v8, %v4959_v1  ;;  %v4961_v25 = vadd.f32 %v4960_v21, %v4197_v16  ;;  %v8516_v16 = vld [vmem:[%s9739_s6 + $0x328] ss:$16 sps:$4 sm:$0xff]   ;;  %v8521_v18 = vld [vmem:[%s9739_s6 + $0x30c] ss:$16 sps:$4 sm:$0xff]   ;;  %v8534_v1 = vld [vmem:[%s9748_s2 + $0x48] sm:$0xff]  }
 0x78c   : > { %v4962_v26 = vpop.f32.mrf.mxu0  ;;  %v5003_v27 = vpop.f32.mrf.mxu1  ;;  %v8519_v8 = vld [vmem:[%s9739_s6 + $0x308] ss:$16 sps:$4 sm:$0xff]  }
 0x78d   : > { %v5002_v29 = vadd.f32 %v5001_v22, %v4961_v25  ;;  %5915 = vmatpush2.bf16.msra.mxu0 %v8465_v20  ;;  %v5008_v28 = vmax.f32 %v5000_v24, 0.0  ;;  %v8535_v20 = vld [vmem:[%s9748_s2 + $0x8] sm:$0xff]   ;;  %v8536_v21 = vld [vmem:[%s9748_s2 + $0x40] sm:$0xff]   ;;  %v8539_v24 = vld [vmem:[%s9748_s2 + $0xb8] sm:$0xff]  }
 0x78e   : > { %v4963_v17 = vpop.f32.mrf.mxu0  ;;  %v5004_v19 = vpop.f32.mrf.mxu1  ;;  %5916 = vmatprep.subr.bf16.mxu0 %v8473_v23  ;;  %v8537_v22 = vld [vmem:[%s9748_s2] sm:$0xff]   ;;  %v8538_v23 = vld [vmem:[%s9748_s2 + $0xf8] sm:$0xff]   ;;  %v8540_v25 = vld [vmem:[%s9748_s2 + $0xf0] sm:$0xff]  }
 0x78f   : > { %v5009_v31 = vmax.f32 %v5002_v29, 0.0  ;;  %v10431_v34 = vpack.c.bf16 %v5008_v28, %v5008_v28  ;;  %v8541_v26 = vld [vmem:[%s9748_s2 + $0xb0] sm:$0xff]   ;;  %v8542_v27 = vld [vmem:[%s9748_s2 + $0xe8] sm:$0xff]   ;;  %v8545_v28 = vld [vmem:[%s9748_s2 + $0xa0] sm:$0xff]  }
 0x790   : > { %v8543_v29 = vld [vmem:[%s9748_s2 + $0xa8] sm:$0xff]   ;;  %v8546_v17 = vld [vmem:[%s9748_s2 + $0xd8] sm:$0xff]  }
 0x791   : > { %v5013_v32 = vpack.c.bf16 %v5009_v31, %v5009_v31  ;;  %5917 = vmatpush2.bf16.msra.mxu0 %v8471_v30  ;;  %v8544_v30 = vld [vmem:[%s9748_s2 + $0xe0] sm:$0xff]   ;;  %v8547_v19 = vld [vmem:[%s9748_s2 + $0x98] sm:$0xff]   ;;  %v8548_v31 = vld [vmem:[%s9748_s2 + $0xd0] sm:$0xff]  }
 0x792   : > { %7513 = vmatprep.subr.bf16.mxu0 %v8522_v44 }
 0x793   : > { %5877 = vmatprep.mubr.bf16.mxu1 %v5013_v32 }
 0x794   : > { %5878 = vmatmul.mubr.bf16.vlgmr.msra.gmra.mxu1 %v10431_v34  ;;  %5919 = vmatmul.mubr.bf16.vlgmr.msra.gmra.mxu0 %v10393_v49  ;;  %v8488_v49 = vld [vmem:[%s9739_s6 + $0x26c] ss:$16 sps:$4 sm:$0xff]   ;;  %s10621_s6 = sld [smem:[#allocation54_spill]] }
 0x795   : > { %5928 = vmatpush1.bf16.msra.mxu1 %v8474_v33  ;;  %5959 = vmatprep.mubr.bf16.mxu1 %v5013_v32  ;;  %v8549_v32 = vld [vmem:[%s9748_s2 + $0x90] sm:$0xff]  }
 0x796   : > { %5929 = vmatprep.subr.bf16.mxu1 %v8479_v35  ;;  %7514 = vmatpush3.bf16.msra.mxu0 %v8523_v45  ;;  %v8551_v35 = vld [vmem:[%s9748_s2 + $0x88] sm:$0xff]   ;;  %v5142_v45 = vld [vmem:[%s1015_s18] sm:$0xf] }
 0x797   : > { %7515 = vmatprep.subr.bf16.mxu0 %v8524_v46  ;;  %v5147_v46 = vrot.slane %v5142_v45, %v9866_v40  ;;  %v5155_v40 = vrot.slane %v5142_v45, %v9868_v41 }
 0x799   : > { %5930 = vmatpush1.bf16.msra.mxu1 %v8477_v36 }
 0x79a   : > { %5931 = vmatprep.subr.bf16.mxu1 %v8482_v37  ;;  %7516 = vmatpush3.bf16.msra.mxu0 %v8525_v48 }
 0x79b   : > { %7517 = vmatprep.subr.bf16.mxu0 %v8526_v50 }
 0x79d   : > { %5932 = vmatpush1.bf16.msra.mxu1 %v8480_v38  ;;  %v8552_v38 = vld [vmem:[%s9748_s2 + $0xc0] sm:$0xff]  }
 0x79e   : > { %5933 = vmatprep.subr.bf16.mxu1 %v8485_v39  ;;  %7518 = vmatpush3.bf16.msra.mxu0 %v8527_v52  ;;  %v8553_v39 = vld [vmem:[%s9748_s2 + $0x80] sm:$0xff]  }
 0x79f   : > { %7519 = vmatprep.subr.bf16.mxu0 %v8528_v54 }
 0x7a1   : > { %5934 = vmatpush1.bf16.msra.mxu1 %v8483_v47  ;;  %v5151_v47 = vrot.slane %v5142_v45, %v9870_v42  ;;  %v5159_v42 = vrot.slane %v5142_v45, %v9872_v43 }
 0x7a2   : > { %5935 = vmatprep.subr.bf16.mxu1 %v8488_v49  ;;  %7520 = vmatpush3.bf16.msra.mxu0 %v8529_v56 }
 0x7a3   : > { %7521 = vmatprep.subr.bf16.mxu0 %v8530_v58 }
 0x7a5   : > { %5936 = vmatpush1.bf16.msra.mxu1 %v8486_v51 }
 0x7a6   : > { %5937 = vmatprep.subr.bf16.mxu1 %v8491_v53  ;;  %7522 = vmatpush3.bf16.msra.mxu0 %v8531_v60 }
 0x7a7   : > { %7523 = vmatprep.subr.bf16.mxu0 %v8532_v62 }
 0x7a9   : > { %5938 = vmatpush1.bf16.msra.mxu1 %v8489_v55 }
 0x7aa   : > { %5939 = vmatprep.subr.bf16.mxu1 %v8494_v57  ;;  %7524 = vmatpush3.bf16.msra.mxu0 %v8533_v2 }
 0x7ab   : > { %7525 = vmatprep.subr.bf16.mxu0 %v8534_v1 }
 0x7ad   : > { %5940 = vmatpush1.bf16.msra.mxu1 %v8492_v59 }
 0x7ae   : > { %5941 = vmatprep.subr.bf16.mxu1 %v8497_v61  ;;  %7526 = vmatpush3.bf16.msra.mxu0 %v8535_v20 }
 0x7af   : > { %7527 = vmatprep.subr.bf16.mxu0 %v8536_v21 }
 0x7b1   : > { %5942 = vmatpush1.bf16.msra.mxu1 %v8495_v63 }
 0x7b2   : > { %5943 = vmatprep.subr.bf16.mxu1 %v8500_v3  ;;  %7528 = vmatpush3.bf16.msra.mxu0 %v8537_v22 }
 0x7b5   : > { %5944 = vmatpush2.bf16.msra.mxu1 %v8498_v4 }
 0x7b6   : > { %5945 = vmatprep.subr.bf16.mxu1 %v8503_v5 }
 0x7b9   : > { %5946 = vmatpush2.bf16.msra.mxu1 %v8501_v6 }
 0x7ba   : > { %5947 = vmatprep.subr.bf16.mxu1 %v8506_v7 }
 0x7bd   : > { %5948 = vmatpush2.bf16.msra.mxu1 %v8504_v9 }
 0x7be   : > { %5949 = vmatprep.subr.bf16.mxu1 %v8509_v10 }
 0x7c1   : > { %5950 = vmatpush2.bf16.msra.mxu1 %v8507_v11 }
 0x7c2   : > { %5951 = vmatprep.subr.bf16.mxu1 %v8512_v0 }
 0x7c5   : > { %5952 = vmatpush2.bf16.msra.mxu1 %v8510_v12 }
 0x7c6   : > { %5953 = vmatprep.subr.bf16.mxu1 %v8515_v13 }
 0x7c9   : > { %5954 = vmatpush2.bf16.msra.mxu1 %v8513_v14 }
 0x7ca   : > { %5955 = vmatprep.subr.bf16.mxu1 %v8518_v15 }
 0x7cd   : > { %5956 = vmatpush2.bf16.msra.mxu1 %v8516_v16 }
 0x7ce   : > { %5957 = vmatprep.subr.bf16.mxu1 %v8521_v18  ;;  %v7420_v18 = vld [vmem:[%s1032_s15] ss:$0 sm:$0xff] }
 0x7d1   : > { %5958 = vmatpush2.bf16.msra.mxu1 %v8519_v8 }
 0x7d2   : > { %7535 = vmatprep.subr.bf16.mxu1 %v8538_v23 }
 0x7d4   : > { %5960 = vmatmul.mubr.bf16.vlgmr.msra.gmra.mxu1 %v10431_v34  ;;  %v8550_v34 = vld [vmem:[%s9748_s2 + $0xc8] sm:$0xff]   ;;  %s1176_s2 = scalar_lea.vmem %s10621_s6, %s6809_s8 }
 0x7d5   : > { %7536 = vmatpush3.bf16.msra.mxu1 %v8539_v24 }
 0x7d6   : > { %7537 = vmatprep.subr.bf16.mxu1 %v8540_v25 }
 0x7d9   : > { %7538 = vmatpush3.bf16.msra.mxu1 %v8541_v26 }
 0x7da   : > { %7539 = vmatprep.subr.bf16.mxu1 %v8542_v27 }
 0x7dd   : > { %7540 = vmatpush3.bf16.msra.mxu1 %v8543_v29 }
 0x7de   : > { %7541 = vmatprep.subr.bf16.mxu1 %v8544_v30 }
 0x7e1   : > { %7542 = vmatpush3.bf16.msra.mxu1 %v8545_v28 }
 0x7e2   : > { %7543 = vmatprep.subr.bf16.mxu1 %v8546_v17 }
 0x7e5   : > { %7544 = vmatpush3.bf16.msra.mxu1 %v8547_v19 }
 0x7e6   : > { %7545 = vmatprep.subr.bf16.mxu1 %v8548_v31 }
 0x7e9   : > { %7546 = vmatpush3.bf16.msra.mxu1 %v8549_v32 }
 0x7ea   : > { %7547 = vmatprep.subr.bf16.mxu1 %v8550_v34 }
 0x7ed   : > { %7548 = vmatpush3.bf16.msra.mxu1 %v8551_v35 }
 0x7ee   : > { %7549 = vmatprep.subr.bf16.mxu1 %v8552_v38 }
 0x7f1   : > { %7550 = vmatpush3.bf16.msra.mxu1 %v8553_v39 }
 0x814   : > { %v5838_v33 = vpop.f32.mrf.mxu0 }
 0x815   : > { %v5839_v48 = vadd.f32 %v5838_v33, %v5147_v46 }
 0x816   : > { %v5840_v36 = vpop.f32.mrf.mxu0 }
 0x817   : > { %v5841_v51 = vadd.f32 %v5840_v36, %v5151_v47 }
 0x818   : > { %v5842_v37 = vpop.f32.mrf.mxu0 }
 0x81a   : > { %v5843_v44 = vpop.f32.mrf.mxu0 }
 0x854   : > { %v5879_v49 = vpop.f32.mrf.mxu1  ;;  %v5920_v50 = vpop.f32.mrf.mxu0 }
 0x855   : > { %v5880_v52 = vadd.f32 %v5879_v49, %v5839_v48  ;;  %v5921_v2 = vadd.f32 %v5920_v50, %v5155_v40 }
 0x856   : > { %v5881_v53 = vpop.f32.mrf.mxu1  ;;  %v5922_v54 = vpop.f32.mrf.mxu0 }
 0x857   : > { %v5882_v55 = vadd.f32 %v5881_v53, %v5841_v51  ;;  %v5968_v56 = vmax.f32 %v5880_v52, 0.0  ;;  %v5923_v4 = vadd.f32 %v5922_v54, %v5159_v42 }
 0x858   : > { %v5883_v57 = vpop.f32.mrf.mxu1  ;;  %v5924_v58 = vpop.f32.mrf.mxu0 }
 0x859   : > { %v5969_v59 = vmax.f32 %v5882_v55, 0.0  ;;  %v5972_v63 = vpack.c.bf16 %v5968_v56, %v5968_v56 }
 0x85a   : > { %v5884_v60 = vpop.f32.mrf.mxu1  ;;  %v5925_v61 = vpop.f32.mrf.mxu0 }
 0x85b   : > { %v5973_v62 = vpack.c.bf16 %v5969_v59, %v5969_v59 }
 0x85d   : > { %6271 = vmatprep.mubr.bf16.mxu0 %v5973_v62 }
 0x85e   : > { %6272 = vmatmul.mubr.bf16.vlgmr.msra.gmra.mxu0 %v5972_v63 }
 0x894   : > { %v5961_v3 = vpop.f32.mrf.mxu1 }
 0x895   : > { %v5962_v5 = vadd.f32 %v5961_v3, %v5921_v2 }
 0x896   : > { %v5963_v6 = vpop.f32.mrf.mxu1 }
 0x897   : > { %v5964_v7 = vadd.f32 %v5963_v6, %v5923_v4  ;;  %v5970_v9 = vmax.f32 %v5962_v5, 0.0 }
 0x898   : > { %v5965_v10 = vpop.f32.mrf.mxu1 }
 0x899   : > { %v5971_v11 = vmax.f32 %v5964_v7, 0.0  ;;  %v5974_v13 = vpack.c.bf16 %v5970_v9, %v5970_v9 }
 0x89a   : > { %v5966_v0 = vpop.f32.mrf.mxu1 }
 0x89b   : > { %v5975_v12 = vpack.c.bf16 %v5971_v11, %v5971_v11 }
 0x89d   : > { %6311 = vmatprep.mubr.bf16.mxu1 %v5975_v12 }
 0x89e   : > { %6312 = vmatmul.mubr.bf16.vlgmr.msra.gmra.mxu1 %v5974_v13 }
 0x91e   : > { %v7529_v14 = vpop.f32.mrf.mxu0 }
 0x920   : > { %v7530_v41 = vpop.f32.mrf.mxu0 }
 0x921   : > { %v7531_v16 = vadd.f32 %v7530_v41, %v7529_v14 }
 0x922   : > { %v7532_v15 = vpop.f32.mrf.mxu0 }
 0x923   : > { %v6274_v20 = vadd.f32 %v7531_v16, %v7420_v18 }
 0x924   : > { %v7533_v43 = vpop.f32.mrf.mxu0 }
 0x95e   : > { %v7551_v8 = vpop.f32.mrf.mxu1 }
 0x960   : > { %v7552_v1 = vpop.f32.mrf.mxu1 }
 0x961   : > { %v7553_v21 = vadd.f32 %v7552_v1, %v7551_v8 }
 0x962   : > { %v7554_v22 = vpop.f32.mrf.mxu1 }
 0x963   : > { %v6314_v23 = vadd.f32 %v7553_v21, %v6274_v20 }
 0x964   : > { %v7555_v24 = vpop.f32.mrf.mxu1 }
 0x965   : > { %6319 = vst [vmem:[%s1176_s2] sm:$0xff] %v6314_v23 }
 0x966 PF: > { %s10622_s30 = sld [smem:[#allocation39_spill]] }
 0x967   : > { %s10623_s27 = sld [smem:[#allocation36_spill]] }
 0x968   : > { %s10624_s28 = sld [smem:[#allocation37_spill]] }
 0x969   : > { %s10625_s29 = sld [smem:[#allocation40_spill]] }
 0x96c   : > { %p53_p6 = scmp.ge.s32.totalorder %s10622_s30, 5  }
 0x96e   :  { %55 = sbr.rel (!%p53_p6) target bundleno = 33 (0x21), region = 324 }
 0x973   :  { %6353 = vsyncpa [#allocation3], 1 }
 0x974   :  { %6355 = vsyncpa [#allocation3 + $0x1], 1 }
 0x975   :  { %6356 = vsyncpa [#allocation5], 1 }
 0x976   :  { %6358 = vsyncpa [#allocation5 + $0x1], 1 }
 0x977   :  { %6359 = vsyncpa [#allocation8], 1 }
 0x978   :  { %6361 = vsyncpa [#allocation8 + $0x1], 1 }
 0x979   :  { %6362 = vsyncpa [#allocation11], 1 }
 0x97a   :  { %6364 = vsyncpa [#allocation11 + $0x1], 1 }
 0x97b   :  { %6365 = vsyncpa [#allocation14], 1 }
 0x97c   :  { %6367 = vsyncpa [#allocation14 + $0x1], 1 }
 0x97d   :  { %6368 = vsyncpa [#allocation17], 1 }
 0x97e   :  { %6370 = vsyncpa [#allocation17 + $0x1], 1 }
 0x97f   :  { %6371 = vsyncpa [#allocation20], 1 }
 0x980   :  { %6373 = vsyncpa [#allocation20 + $0x1], 1 }
 0x981   :  { %6374 = vsyncpa [#allocation23], 1 }
 0x982   :  { %6376 = vsyncpa [#allocation23 + $0x1], 1 }
 0x983   :  { %6377 = vsyncpa [#allocation26], 1 }
 0x984   :  { %6379 = vsyncpa [#allocation26 + $0x1], 1 }

</bundles_post_ra>
